<compile_context>
chip_gen: v6e
topology: v6e:2x2x1
jax: 0.10.0
libtpu: 0.0.40
codegen_flags: <defaults>
</compile_context>

<pallas_src>
import jax
import jax.numpy as jnp
from jax import lax
from jax.experimental import pallas as pl
from jax.experimental.pallas import tpu as pltpu

# --- hyper-params (small shapes consistent with the reference module) --------
BS = 8            # batch size
SEQ_LEN = 28      # MNIST rows (max sequence length)
INPUT_DIM = 28    # nn.LSTM(28, ...)
HIDDEN_DIM = 32   # small synthetic hidden size (module uses 300)
NUM_CLASSES = 10
N_LAYERS = 1


# ----------------------------- Pallas kernel ---------------------------------
def lstm_classifier_kernel(maxlen_ref,  # SMEM (1,)   i32  max(lengths)
                           len_ref,     # (B, 1)      i32  per-sequence lengths
                           x_ref,       # (T*B, F)    bf16 time-major inputs, flattened
                           wih_ref,     # (F, 4H)     bf16 W_ih^T, gates [i,f,g,o], g-cols *2
                           whh_ref,     # (H, 4H)     bf16 W_hh^T,               g-cols *2
                           b_ref,       # (1, 4H)     f32  b_ih + b_hh,          g-cols *2
                           fcw_ref,     # (H, C)      f32  fc.weight^T
                           fcb_ref,     # (1, C)      f32  fc.bias
                           out_ref,     # (B, C)      f32
                           hn_ref,      # (B, H)      f32
                           cn_ref,      # (B, H)      f32
                           gx_scr):     # VMEM (T*B, 4H) f32  hoisted input projection
    B = len_ref.shape[0]
    H = whh_ref.shape[0]
    T = x_ref.shape[0] // B

    # ---- prologue: hoist the input projection out of the recurrence ----------
    # One big bf16 MXU matmul (T*B, F) x (F, 4H), f32 accumulate, bias folded in.
    gx_scr[...] = (jnp.dot(x_ref[...], wih_ref[...],
                           preferred_element_type=jnp.float32)
                   + b_ref[...])

    whh = whh_ref[...]                                 # bf16, load once, reuse every step
    len_b = jnp.broadcast_to(len_ref[...], (B, H))     # (B, H) i32, built once

    # ---- recurrence: h, c live in vregs (loop carry), not VMEM ---------------
    def step(t, carry):
        h, c = carry
        row = pl.multiple_of(t * B, B)                 # sublane-aligned slice start
        gates = (gx_scr[pl.ds(row, B), :]              # (B, 4H) precomputed x-part
                 + jnp.dot(h.astype(jnp.bfloat16), whh,
                           preferred_element_type=jnp.float32))

        # Single full-vreg transcendental: gates is exactly one (8,128) f32 vreg
        # at H=32.  g-gate pre-activation was pre-scaled by 2, so
        # tanh(z) = 2*sigmoid(2z) - 1 comes out of the same sigmoid pass.
        sg = jax.nn.sigmoid(gates)
        i_g = sg[:, 0 * H:1 * H]
        f_g = sg[:, 1 * H:2 * H]
        g_g = 2.0 * sg[:, 2 * H:3 * H] - 1.0
        o_g = sg[:, 3 * H:4 * H]

        c_new = f_g * c + i_g * g_g
        h_new = o_g * jnp.tanh(c_new)

        # pack_padded_sequence semantics: state only advances while t < length[b].
        # Single vselect per state; the compare does not depend on h/c.
        m = len_b > t                                  # (B, H) bool
        h = jnp.where(m, h_new, h)
        c = jnp.where(m, c_new, c)
        return h, c

    h0 = jnp.zeros((B, H), jnp.float32)
    h, c = lax.fori_loop(0, T, step, (h0, h0), unroll=True)

    # ---- epilogue -------------------------------------------------------------
    # h_n / c_n: state at each sequence's own last valid step.
    hn_ref[...] = h
    cn_ref[...] = c

    # pad_packed_sequence -> X[:, -1, :]: last padded step is max(lengths)-1; rows
    # with length < max(lengths) read the zero padding there.
    maxlen = maxlen_ref[0]
    last = jnp.where(len_b == maxlen, h, 0.0)          # (B, H)
    out_ref[...] = (jnp.dot(last, fcw_ref[...],
                            preferred_element_type=jnp.float32)
                    + fcb_ref[...])


# ------------------------------- wrapper --------------------------------------
@jax.jit
def classifier_lstm_forward(x, x_lengths, params):
    """x: (B, T, F) float32 batch-first (PyTorch convention). x_lengths: (B,) int32."""
    B, T, F = x.shape
    H = params["w_hh"].shape[1]
    C = params["fc_w"].shape[0]

    lengths = x_lengths.astype(jnp.int32)

    # Time-major, flattened, bf16 for the hoisted input projection.
    x2d = jnp.transpose(x, (1, 0, 2)).reshape(T * B, F).astype(jnp.bfloat16)

    # g-gate columns pre-scaled by 2 so tanh can be recovered from one sigmoid pass
    # (scaling by a power of 2 is exact, also after the bf16 cast).
    gate_scale = jnp.concatenate([jnp.ones((2 * H,), jnp.float32),
                                  jnp.full((H,), 2.0, jnp.float32),
                                  jnp.ones((H,), jnp.float32)])
    wih_t = (params["w_ih"].T * gate_scale[None, :]).astype(jnp.bfloat16)   # (F, 4H)
    whh_t = (params["w_hh"].T * gate_scale[None, :]).astype(jnp.bfloat16)   # (H, 4H)
    bias = ((params["b_ih"] + params["b_hh"]) * gate_scale)[None, :]        # (1, 4H) f32

    fcw_t = params["fc_w"].T                                                # (H, C)
    fcb = params["fc_b"][None, :]                                           # (1, C)

    maxlen = jnp.max(lengths).reshape(1)                                    # (1,) i32
    len_col = lengths.reshape(B, 1)                                         # (B, 1) i32

    vmem = pl.BlockSpec(memory_space=pltpu.MemorySpace.VMEM)
    smem = pl.BlockSpec(memory_space=pltpu.MemorySpace.SMEM)

    out, h_n, c_n = pl.pallas_call(
        lstm_classifier_kernel,
        out_shape=(
            jax.ShapeDtypeStruct((B, C), jnp.float32),
            jax.ShapeDtypeStruct((B, H), jnp.float32),
            jax.ShapeDtypeStruct((B, H), jnp.float32),
        ),
        in_specs=[smem] + [vmem] * 7,
        out_specs=(vmem, vmem, vmem),
        scratch_shapes=[pltpu.VMEM((T * B, 4 * H), jnp.float32)],
    )(maxlen, len_col, x2d, wih_t, whh_t, bias, fcw_t, fcb)

    # hidden1 = (h_n, c_n) with PyTorch shape (num_layers, B, H)
    return out, (h_n[None, :, :], c_n[None, :, :])


# --------------------------- parameter init -----------------------------------
def init_params(key, input_dim, hidden_dim, num_classes):
    k_lstm = 1.0 / jnp.sqrt(hidden_dim)
    k_fc = 1.0 / jnp.sqrt(hidden_dim)
    ks = jax.random.split(key, 6)
    u = lambda k, shape, b: jax.random.uniform(k, shape, jnp.float32, -b, b)
    return {
        "w_ih": u(ks[0], (4 * hidden_dim, input_dim), k_lstm),   # gate order [i, f, g, o]
        "w_hh": u(ks[1], (4 * hidden_dim, hidden_dim), k_lstm),
        "b_ih": u(ks[2], (4 * hidden_dim,), k_lstm),
        "b_hh": u(ks[3], (4 * hidden_dim,), k_lstm),
        "fc_w": u(ks[4], (num_classes, hidden_dim), k_fc),
        "fc_b": u(ks[5], (num_classes,), k_fc),
    }


# --------------------------- pure-JAX reference --------------------------------
# Mirrors the kernel's mixed precision (bf16 matmul operands, f32 accumulation and
# gate math) but uses the textbook sigmoid/tanh LSTM formulation.
def ref_forward(x, x_lengths, params):
    B, T, F = x.shape
    H = params["w_hh"].shape[1]
    wih_t = params["w_ih"].T.astype(jnp.bfloat16)
    whh_t = params["w_hh"].T.astype(jnp.bfloat16)
    bias = params["b_ih"] + params["b_hh"]
    lengths = x_lengths.astype(jnp.int32)
    xt = jnp.transpose(x, (1, 0, 2)).astype(jnp.bfloat16)    # (T, B, F)

    def step(carry, inp):
        h, c = carry
        x_t, t = inp
        gates = (jnp.dot(x_t, wih_t, preferred_element_type=jnp.float32)
                 + jnp.dot(h.astype(jnp.bfloat16), whh_t,
                           preferred_element_type=jnp.float32)
                 + bias)
        i = jax.nn.sigmoid(gates[:, 0 * H:1 * H])
        f = jax.nn.sigmoid(gates[:, 1 * H:2 * H])
        g = jnp.tanh(gates[:, 2 * H:3 * H])
        o = jax.nn.sigmoid(gates[:, 3 * H:4 * H])
        c_new = f * c + i * g
        h_new = o * jnp.tanh(c_new)
        mask = (lengths > t)[:, None]
        h = jnp.where(mask, h_new, h)
        c = jnp.where(mask, c_new, c)
        return (h, c), None

    h0 = jnp.zeros((B, H), jnp.float32)
    (h, c), _ = lax.scan(step, (h0, h0), (xt, jnp.arange(T)))
    last = jnp.where((lengths == jnp.max(lengths))[:, None], h, 0.0)
    out = last @ params["fc_w"].T + params["fc_b"]
    return out, (h[None], c[None])


# ----------------------------------- main --------------------------------------
if __name__ == "__main__":
    key = jax.random.PRNGKey(0)
    k_param, k_x = jax.random.split(key)

    params = init_params(k_param, INPUT_DIM, HIDDEN_DIM, NUM_CLASSES)

    x = jax.random.normal(k_x, (BS, SEQ_LEN, INPUT_DIM), jnp.float32)
    x_lengths = jnp.array([28, 28, 20, 15, 28, 10, 28, 5], dtype=jnp.int32)

    (out, (h_n, c_n)) = classifier_lstm_forward(x, x_lengths, params)
    jax.block_until_ready((out, h_n, c_n))

    out_ref, (hn_ref, cn_ref) = ref_forward(x, x_lengths, params)
    assert jnp.allclose(out, out_ref, atol=1e-3, rtol=1e-3)
    assert jnp.allclose(h_n, hn_ref, atol=1e-3, rtol=1e-3)
    assert jnp.allclose(c_n, cn_ref, atol=1e-3, rtol=1e-3)

    print("KERNEL_OK")
</pallas_src>

<mosaic_0001>
module attributes {stable_mosaic.version = 11 : i64} {
  func.func @lstm_classifier_kernel(%arg0: memref<1xi32, #tpu.memory_space<smem>>, %arg1: memref<8x1xi32, #tpu.memory_space<vmem>>, %arg2: memref<224x28xbf16, #tpu.memory_space<vmem>>, %arg3: memref<28x128xbf16, #tpu.memory_space<vmem>>, %arg4: memref<32x128xbf16, #tpu.memory_space<vmem>>, %arg5: memref<1x128xf32, #tpu.memory_space<vmem>>, %arg6: memref<32x10xf32, #tpu.memory_space<vmem>>, %arg7: memref<1x10xf32, #tpu.memory_space<vmem>>, %arg8: memref<8x10xf32, #tpu.memory_space<vmem>>, %arg9: memref<8x32xf32, #tpu.memory_space<vmem>>, %arg10: memref<8x32xf32, #tpu.memory_space<vmem>>, %arg11: memref<224x128xf32, #tpu.memory_space<vmem>>) attributes {dimension_semantics = [], scalar_prefetch = 0 : i64, scratch_operands = 1 : i64, tpu.core_type = #tpu.core_type<tc>} {
    %c0 = arith.constant 0 : index
    %c0_0 = arith.constant 0 : index
    %0 = vector.load %arg2[%c0, %c0_0] : memref<224x28xbf16, #tpu.memory_space<vmem>>, vector<224x28xbf16>
    %c0_1 = arith.constant 0 : index
    %c0_2 = arith.constant 0 : index
    %1 = vector.load %arg3[%c0_1, %c0_2] : memref<28x128xbf16, #tpu.memory_space<vmem>>, vector<28x128xbf16>
    %cst = arith.constant dense<0.000000e+00> : vector<224x128xf32>
    %2 = tpu.matmul %0, %1, %cst {dimension_numbers = #tpu.dot_dimension_numbers<[1], [0], [0], [1], [0, 0, 1, 1], [], []>} : vector<224x28xbf16>, vector<28x128xbf16>, vector<224x128xf32> -> vector<224x128xf32>
    %c0_3 = arith.constant 0 : index
    %c0_4 = arith.constant 0 : index
    %3 = vector.load %arg5[%c0_3, %c0_4] : memref<1x128xf32, #tpu.memory_space<vmem>>, vector<1x128xf32>
    %4 = vector.broadcast %3 : vector<1x128xf32> to vector<224x128xf32>
    %5 = arith.addf %2, %4 : vector<224x128xf32>
    %c0_5 = arith.constant 0 : index
    %c0_6 = arith.constant 0 : index
    %6 = vector.load %arg11[%c0_5, %c0_6] : memref<224x128xf32, #tpu.memory_space<vmem>>, vector<224x128xf32>
    tpu.vector_store %arg11[%c0_5, %c0_6], %5 {strides = array<i32>} : memref<224x128xf32, #tpu.memory_space<vmem>>, vector<224x128xf32>,
    %c0_7 = arith.constant 0 : index
    %c0_8 = arith.constant 0 : index
    %7 = vector.load %arg4[%c0_7, %c0_8] : memref<32x128xbf16, #tpu.memory_space<vmem>>, vector<32x128xbf16>
    %c0_9 = arith.constant 0 : index
    %c0_10 = arith.constant 0 : index
    %8 = vector.load %arg1[%c0_9, %c0_10] : memref<8x1xi32, #tpu.memory_space<vmem>>, vector<8x1xi32>
    %9 = vector.shape_cast %8 : vector<8x1xi32> to vector<8x1xi32>
    %10 = vector.broadcast %9 : vector<8x1xi32> to vector<8x32xi32>
    %cst_11 = arith.constant 0.000000e+00 : f32
    %11 = vector.broadcast %cst_11 : f32 to vector<8x32xf32>
    %c0_i32 = arith.constant 0 : i32
    %c8_i32 = arith.constant 8 : i32
    %12 = arith.muli %c0_i32, %c8_i32 : i32
    %13 = tpu.assume_multiple %12, 8 : i32
    %14 = arith.index_cast %13 : i32 to index
    %c0_12 = arith.constant 0 : index
    %15 = vector.load %arg11[%14, %c0_12] : memref<224x128xf32, #tpu.memory_space<vmem>>, vector<8x128xf32>
    %16 = arith.truncf %11 : vector<8x32xf32> to vector<8x32xbf16>
    %cst_13 = arith.constant dense<0.000000e+00> : vector<8x128xf32>
    %17 = tpu.matmul %16, %7, %cst_13 {dimension_numbers = #tpu.dot_dimension_numbers<[1], [0], [0], [1], [0, 0, 1, 1], [], []>} : vector<8x32xbf16>, vector<32x128xbf16>, vector<8x128xf32> -> vector<8x128xf32>
    %18 = arith.addf %15, %17 : vector<8x128xf32>
    %19 = arith.negf %18 : vector<8x128xf32>
    %20 = math.exp %19 : vector<8x128xf32>
    %cst_14 = arith.constant 1.000000e+00 : f32
    %21 = vector.broadcast %cst_14 : f32 to vector<8x128xf32>
    %22 = arith.addf %21, %20 : vector<8x128xf32>
    %23 = arith.divf %21, %22 : vector<8x128xf32>
    %24 = vector.extract_strided_slice %23 {offsets = [0, 0], sizes = [8, 32], strides = [1, 1]} : vector<8x128xf32> to vector<8x32xf32>
    %25 = vector.extract_strided_slice %23 {offsets = [0, 32], sizes = [8, 32], strides = [1, 1]} : vector<8x128xf32> to vector<8x32xf32>
    %26 = vector.extract_strided_slice %23 {offsets = [0, 64], sizes = [8, 32], strides = [1, 1]} : vector<8x128xf32> to vector<8x32xf32>
    %cst_15 = arith.constant 2.000000e+00 : f32
    %27 = vector.broadcast %cst_15 : f32 to vector<8x32xf32>
    %28 = arith.mulf %27, %26 : vector<8x32xf32>
    %cst_16 = arith.constant 1.000000e+00 : f32
    %29 = vector.broadcast %cst_16 : f32 to vector<8x32xf32>
    %30 = arith.subf %28, %29 : vector<8x32xf32>
    %31 = vector.extract_strided_slice %23 {offsets = [0, 96], sizes = [8, 32], strides = [1, 1]} : vector<8x128xf32> to vector<8x32xf32>
    %32 = arith.mulf %25, %11 : vector<8x32xf32>
    %33 = arith.mulf %24, %30 : vector<8x32xf32>
    %34 = arith.addf %32, %33 : vector<8x32xf32>
    %35 = math.tanh %34 : vector<8x32xf32>
    %36 = arith.mulf %31, %35 : vector<8x32xf32>
    %37 = vector.broadcast %c0_i32 : i32 to vector<8x32xi32>
    %38 = arith.cmpi sgt, %10, %37 : vector<8x32xi32>
    %39 = arith.select %38, %36, %11 : vector<8x32xi1>, vector<8x32xf32>
    %40 = arith.select %38, %34, %11 : vector<8x32xi1>, vector<8x32xf32>
    %c1_i32 = arith.constant 1 : i32
    %c8_i32_17 = arith.constant 8 : i32
    %41 = arith.muli %c1_i32, %c8_i32_17 : i32
    %42 = tpu.assume_multiple %41, 8 : i32
    %43 = arith.index_cast %42 : i32 to index
    %c0_18 = arith.constant 0 : index
    %44 = vector.load %arg11[%43, %c0_18] : memref<224x128xf32, #tpu.memory_space<vmem>>, vector<8x128xf32>
    %45 = arith.truncf %39 : vector<8x32xf32> to vector<8x32xbf16>
    %cst_19 = arith.constant dense<0.000000e+00> : vector<8x128xf32>
    %46 = tpu.matmul %45, %7, %cst_19 {dimension_numbers = #tpu.dot_dimension_numbers<[1], [0], [0], [1], [0, 0, 1, 1], [], []>} : vector<8x32xbf16>, vector<32x128xbf16>, vector<8x128xf32> -> vector<8x128xf32>
    %47 = arith.addf %44, %46 : vector<8x128xf32>
    %48 = arith.negf %47 : vector<8x128xf32>
    %49 = math.exp %48 : vector<8x128xf32>
    %cst_20 = arith.constant 1.000000e+00 : f32
    %50 = vector.broadcast %cst_20 : f32 to vector<8x128xf32>
    %51 = arith.addf %50, %49 : vector<8x128xf32>
    %52 = arith.divf %50, %51 : vector<8x128xf32>
    %53 = vector.extract_strided_slice %52 {offsets = [0, 0], sizes = [8, 32], strides = [1, 1]} : vector<8x128xf32> to vector<8x32xf32>
    %54 = vector.extract_strided_slice %52 {offsets = [0, 32], sizes = [8, 32], strides = [1, 1]} : vector<8x128xf32> to vector<8x32xf32>
    %55 = vector.extract_strided_slice %52 {offsets = [0, 64], sizes = [8, 32], strides = [1, 1]} : vector<8x128xf32> to vector<8x32xf32>
    %cst_21 = arith.constant 2.000000e+00 : f32
    %56 = vector.broadcast %cst_21 : f32 to vector<8x32xf32>
    %57 = arith.mulf %56, %55 : vector<8x32xf32>
    %cst_22 = arith.constant 1.000000e+00 : f32
    %58 = vector.broadcast %cst_22 : f32 to vector<8x32xf32>
    %59 = arith.subf %57, %58 : vector<8x32xf32>
    %60 = vector.extract_strided_slice %52 {offsets = [0, 96], sizes = [8, 32], strides = [1, 1]} : vector<8x128xf32> to vector<8x32xf32>
    %61 = arith.mulf %54, %40 : vector<8x32xf32>
    %62 = arith.mulf %53, %59 : vector<8x32xf32>
    %63 = arith.addf %61, %62 : vector<8x32xf32>
    %64 = math.tanh %63 : vector<8x32xf32>
    %65 = arith.mulf %60, %64 : vector<8x32xf32>
    %66 = vector.broadcast %c1_i32 : i32 to vector<8x32xi32>
    %67 = arith.cmpi sgt, %10, %66 : vector<8x32xi32>
    %68 = arith.select %67, %65, %39 : vector<8x32xi1>, vector<8x32xf32>
    %69 = arith.select %67, %63, %40 : vector<8x32xi1>, vector<8x32xf32>
    %c2_i32 = arith.constant 2 : i32
    %c8_i32_23 = arith.constant 8 : i32
    %70 = arith.muli %c2_i32, %c8_i32_23 : i32
    %71 = tpu.assume_multiple %70, 8 : i32
    %72 = arith.index_cast %71 : i32 to index
    %c0_24 = arith.constant 0 : index
    %73 = vector.load %arg11[%72, %c0_24] : memref<224x128xf32, #tpu.memory_space<vmem>>, vector<8x128xf32>
    %74 = arith.truncf %68 : vector<8x32xf32> to vector<8x32xbf16>
    %cst_25 = arith.constant dense<0.000000e+00> : vector<8x128xf32>
    %75 = tpu.matmul %74, %7, %cst_25 {dimension_numbers = #tpu.dot_dimension_numbers<[1], [0], [0], [1], [0, 0, 1, 1], [], []>} : vector<8x32xbf16>, vector<32x128xbf16>, vector<8x128xf32> -> vector<8x128xf32>
    %76 = arith.addf %73, %75 : vector<8x128xf32>
    %77 = arith.negf %76 : vector<8x128xf32>
    %78 = math.exp %77 : vector<8x128xf32>
    %cst_26 = arith.constant 1.000000e+00 : f32
    %79 = vector.broadcast %cst_26 : f32 to vector<8x128xf32>
    %80 = arith.addf %79, %78 : vector<8x128xf32>
    %81 = arith.divf %79, %80 : vector<8x128xf32>
    %82 = vector.extract_strided_slice %81 {offsets = [0, 0], sizes = [8, 32], strides = [1, 1]} : vector<8x128xf32> to vector<8x32xf32>
    %83 = vector.extract_strided_slice %81 {offsets = [0, 32], sizes = [8, 32], strides = [1, 1]} : vector<8x128xf32> to vector<8x32xf32>
    %84 = vector.extract_strided_slice %81 {offsets = [0, 64], sizes = [8, 32], strides = [1, 1]} : vector<8x128xf32> to vector<8x32xf32>
    %cst_27 = arith.constant 2.000000e+00 : f32
    %85 = vector.broadcast %cst_27 : f32 to vector<8x32xf32>
    %86 = arith.mulf %85, %84 : vector<8x32xf32>
    %cst_28 = arith.constant 1.000000e+00 : f32
    %87 = vector.broadcast %cst_28 : f32 to vector<8x32xf32>
    %88 = arith.subf %86, %87 : vector<8x32xf32>
    %89 = vector.extract_strided_slice %81 {offsets = [0, 96], sizes = [8, 32], strides = [1, 1]} : vector<8x128xf32> to vector<8x32xf32>
    %90 = arith.mulf %83, %69 : vector<8x32xf32>
    %91 = arith.mulf %82, %88 : vector<8x32xf32>
    %92 = arith.addf %90, %91 : vector<8x32xf32>
    %93 = math.tanh %92 : vector<8x32xf32>
    %94 = arith.mulf %89, %93 : vector<8x32xf32>
    %95 = vector.broadcast %c2_i32 : i32 to vector<8x32xi32>
    %96 = arith.cmpi sgt, %10, %95 : vector<8x32xi32>
    %97 = arith.select %96, %94, %68 : vector<8x32xi1>, vector<8x32xf32>
    %98 = arith.select %96, %92, %69 : vector<8x32xi1>, vector<8x32xf32>
    %c3_i32 = arith.constant 3 : i32
    %c8_i32_29 = arith.constant 8 : i32
    %99 = arith.muli %c3_i32, %c8_i32_29 : i32
    %100 = tpu.assume_multiple %99, 8 : i32
    %101 = arith.index_cast %100 : i32 to index
    %c0_30 = arith.constant 0 : index
    %102 = vector.load %arg11[%101, %c0_30] : memref<224x128xf32, #tpu.memory_space<vmem>>, vector<8x128xf32>
    %103 = arith.truncf %97 : vector<8x32xf32> to vector<8x32xbf16>
    %cst_31 = arith.constant dense<0.000000e+00> : vector<8x128xf32>
    %104 = tpu.matmul %103, %7, %cst_31 {dimension_numbers = #tpu.dot_dimension_numbers<[1], [0], [0], [1], [0, 0, 1, 1], [], []>} : vector<8x32xbf16>, vector<32x128xbf16>, vector<8x128xf32> -> vector<8x128xf32>
    %105 = arith.addf %102, %104 : vector<8x128xf32>
    %106 = arith.negf %105 : vector<8x128xf32>
    %107 = math.exp %106 : vector<8x128xf32>
    %cst_32 = arith.constant 1.000000e+00 : f32
    %108 = vector.broadcast %cst_32 : f32 to vector<8x128xf32>
    %109 = arith.addf %108, %107 : vector<8x128xf32>
    %110 = arith.divf %108, %109 : vector<8x128xf32>
    %111 = vector.extract_strided_slice %110 {offsets = [0, 0], sizes = [8, 32], strides = [1, 1]} : vector<8x128xf32> to vector<8x32xf32>
    %112 = vector.extract_strided_slice %110 {offsets = [0, 32], sizes = [8, 32], strides = [1, 1]} : vector<8x128xf32> to vector<8x32xf32>
    %113 = vector.extract_strided_slice %110 {offsets = [0, 64], sizes = [8, 32], strides = [1, 1]} : vector<8x128xf32> to vector<8x32xf32>
    %cst_33 = arith.constant 2.000000e+00 : f32
    %114 = vector.broadcast %cst_33 : f32 to vector<8x32xf32>
    %115 = arith.mulf %114, %113 : vector<8x32xf32>
    %cst_34 = arith.constant 1.000000e+00 : f32
    %116 = vector.broadcast %cst_34 : f32 to vector<8x32xf32>
    %117 = arith.subf %115, %116 : vector<8x32xf32>
    %118 = vector.extract_strided_slice %110 {offsets = [0, 96], sizes = [8, 32], strides = [1, 1]} : vector<8x128xf32> to vector<8x32xf32>
    %119 = arith.mulf %112, %98 : vector<8x32xf32>
    %120 = arith.mulf %111, %117 : vector<8x32xf32>
    %121 = arith.addf %119, %120 : vector<8x32xf32>
    %122 = math.tanh %121 : vector<8x32xf32>
    %123 = arith.mulf %118, %122 : vector<8x32xf32>
    %124 = vector.broadcast %c3_i32 : i32 to vector<8x32xi32>
    %125 = arith.cmpi sgt, %10, %124 : vector<8x32xi32>
    %126 = arith.select %125, %123, %97 : vector<8x32xi1>, vector<8x32xf32>
    %127 = arith.select %125, %121, %98 : vector<8x32xi1>, vector<8x32xf32>
    %c4_i32 = arith.constant 4 : i32
    %c8_i32_35 = arith.constant 8 : i32
    %128 = arith.muli %c4_i32, %c8_i32_35 : i32
    %129 = tpu.assume_multiple %128, 8 : i32
    %130 = arith.index_cast %129 : i32 to index
    %c0_36 = arith.constant 0 : index
    %131 = vector.load %arg11[%130, %c0_36] : memref<224x128xf32, #tpu.memory_space<vmem>>, vector<8x128xf32>
    %132 = arith.truncf %126 : vector<8x32xf32> to vector<8x32xbf16>
    %cst_37 = arith.constant dense<0.000000e+00> : vector<8x128xf32>
    %133 = tpu.matmul %132, %7, %cst_37 {dimension_numbers = #tpu.dot_dimension_numbers<[1], [0], [0], [1], [0, 0, 1, 1], [], []>} : vector<8x32xbf16>, vector<32x128xbf16>, vector<8x128xf32> -> vector<8x128xf32>
    %134 = arith.addf %131, %133 : vector<8x128xf32>
    %135 = arith.negf %134 : vector<8x128xf32>
    %136 = math.exp %135 : vector<8x128xf32>
    %cst_38 = arith.constant 1.000000e+00 : f32
    %137 = vector.broadcast %cst_38 : f32 to vector<8x128xf32>
    %138 = arith.addf %137, %136 : vector<8x128xf32>
    %139 = arith.divf %137, %138 : vector<8x128xf32>
    %140 = vector.extract_strided_slice %139 {offsets = [0, 0], sizes = [8, 32], strides = [1, 1]} : vector<8x128xf32> to vector<8x32xf32>
    %141 = vector.extract_strided_slice %139 {offsets = [0, 32], sizes = [8, 32], strides = [1, 1]} : vector<8x128xf32> to vector<8x32xf32>
    %142 = vector.extract_strided_slice %139 {offsets = [0, 64], sizes = [8, 32], strides = [1, 1]} : vector<8x128xf32> to vector<8x32xf32>
    %cst_39 = arith.constant 2.000000e+00 : f32
    %143 = vector.broadcast %cst_39 : f32 to vector<8x32xf32>
    %144 = arith.mulf %143, %142 : vector<8x32xf32>
    %cst_40 = arith.constant 1.000000e+00 : f32
    %145 = vector.broadcast %cst_40 : f32 to vector<8x32xf32>
    %146 = arith.subf %144, %145 : vector<8x32xf32>
    %147 = vector.extract_strided_slice %139 {offsets = [0, 96], sizes = [8, 32], strides = [1, 1]} : vector<8x128xf32> to vector<8x32xf32>
    %148 = arith.mulf %141, %127 : vector<8x32xf32>
    %149 = arith.mulf %140, %146 : vector<8x32xf32>
    %150 = arith.addf %148, %149 : vector<8x32xf32>
    %151 = math.tanh %150 : vector<8x32xf32>
    %152 = arith.mulf %147, %151 : vector<8x32xf32>
    %153 = vector.broadcast %c4_i32 : i32 to vector<8x32xi32>
    %154 = arith.cmpi sgt, %10, %153 : vector<8x32xi32>
    %155 = arith.select %154, %152, %126 : vector<8x32xi1>, vector<8x32xf32>
    %156 = arith.select %154, %150, %127 : vector<8x32xi1>, vector<8x32xf32>
    %c5_i32 = arith.constant 5 : i32
    %c8_i32_41 = arith.constant 8 : i32
    %157 = arith.muli %c5_i32, %c8_i32_41 : i32
    %158 = tpu.assume_multiple %157, 8 : i32
    %159 = arith.index_cast %158 : i32 to index
    %c0_42 = arith.constant 0 : index
    %160 = vector.load %arg11[%159, %c0_42] : memref<224x128xf32, #tpu.memory_space<vmem>>, vector<8x128xf32>
    %161 = arith.truncf %155 : vector<8x32xf32> to vector<8x32xbf16>
    %cst_43 = arith.constant dense<0.000000e+00> : vector<8x128xf32>
    %162 = tpu.matmul %161, %7, %cst_43 {dimension_numbers = #tpu.dot_dimension_numbers<[1], [0], [0], [1], [0, 0, 1, 1], [], []>} : vector<8x32xbf16>, vector<32x128xbf16>, vector<8x128xf32> -> vector<8x128xf32>
    %163 = arith.addf %160, %162 : vector<8x128xf32>
    %164 = arith.negf %163 : vector<8x128xf32>
    %165 = math.exp %164 : vector<8x128xf32>
    %cst_44 = arith.constant 1.000000e+00 : f32
    %166 = vector.broadcast %cst_44 : f32 to vector<8x128xf32>
    %167 = arith.addf %166, %165 : vector<8x128xf32>
    %168 = arith.divf %166, %167 : vector<8x128xf32>
    %169 = vector.extract_strided_slice %168 {offsets = [0, 0], sizes = [8, 32], strides = [1, 1]} : vector<8x128xf32> to vector<8x32xf32>
    %170 = vector.extract_strided_slice %168 {offsets = [0, 32], sizes = [8, 32], strides = [1, 1]} : vector<8x128xf32> to vector<8x32xf32>
    %171 = vector.extract_strided_slice %168 {offsets = [0, 64], sizes = [8, 32], strides = [1, 1]} : vector<8x128xf32> to vector<8x32xf32>
    %cst_45 = arith.constant 2.000000e+00 : f32
    %172 = vector.broadcast %cst_45 : f32 to vector<8x32xf32>
    %173 = arith.mulf %172, %171 : vector<8x32xf32>
    %cst_46 = arith.constant 1.000000e+00 : f32
    %174 = vector.broadcast %cst_46 : f32 to vector<8x32xf32>
    %175 = arith.subf %173, %174 : vector<8x32xf32>
    %176 = vector.extract_strided_slice %168 {offsets = [0, 96], sizes = [8, 32], strides = [1, 1]} : vector<8x128xf32> to vector<8x32xf32>
    %177 = arith.mulf %170, %156 : vector<8x32xf32>
    %178 = arith.mulf %169, %175 : vector<8x32xf32>
    %179 = arith.addf %177, %178 : vector<8x32xf32>
    %180 = math.tanh %179 : vector<8x32xf32>
    %181 = arith.mulf %176, %180 : vector<8x32xf32>
    %182 = vector.broadcast %c5_i32 : i32 to vector<8x32xi32>
    %183 = arith.cmpi sgt, %10, %182 : vector<8x32xi32>
    %184 = arith.select %183, %181, %155 : vector<8x32xi1>, vector<8x32xf32>
    %185 = arith.select %183, %179, %156 : vector<8x32xi1>, vector<8x32xf32>
    %c6_i32 = arith.constant 6 : i32
    %c8_i32_47 = arith.constant 8 : i32
    %186 = arith.muli %c6_i32, %c8_i32_47 : i32
    %187 = tpu.assume_multiple %186, 8 : i32
    %188 = arith.index_cast %187 : i32 to index
    %c0_48 = arith.constant 0 : index
    %189 = vector.load %arg11[%188, %c0_48] : memref<224x128xf32, #tpu.memory_space<vmem>>, vector<8x128xf32>
    %190 = arith.truncf %184 : vector<8x32xf32> to vector<8x32xbf16>
    %cst_49 = arith.constant dense<0.000000e+00> : vector<8x128xf32>
    %191 = tpu.matmul %190, %7, %cst_49 {dimension_numbers = #tpu.dot_dimension_numbers<[1], [0], [0], [1], [0, 0, 1, 1], [], []>} : vector<8x32xbf16>, vector<32x128xbf16>, vector<8x128xf32> -> vector<8x128xf32>
    %192 = arith.addf %189, %191 : vector<8x128xf32>
    %193 = arith.negf %192 : vector<8x128xf32>
    %194 = math.exp %193 : vector<8x128xf32>
    %cst_50 = arith.constant 1.000000e+00 : f32
    %195 = vector.broadcast %cst_50 : f32 to vector<8x128xf32>
    %196 = arith.addf %195, %194 : vector<8x128xf32>
    %197 = arith.divf %195, %196 : vector<8x128xf32>
    %198 = vector.extract_strided_slice %197 {offsets = [0, 0], sizes = [8, 32], strides = [1, 1]} : vector<8x128xf32> to vector<8x32xf32>
    %199 = vector.extract_strided_slice %197 {offsets = [0, 32], sizes = [8, 32], strides = [1, 1]} : vector<8x128xf32> to vector<8x32xf32>
    %200 = vector.extract_strided_slice %197 {offsets = [0, 64], sizes = [8, 32], strides = [1, 1]} : vector<8x128xf32> to vector<8x32xf32>
    %cst_51 = arith.constant 2.000000e+00 : f32
    %201 = vector.broadcast %cst_51 : f32 to vector<8x32xf32>
    %202 = arith.mulf %201, %200 : vector<8x32xf32>
    %cst_52 = arith.constant 1.000000e+00 : f32
    %203 = vector.broadcast %cst_52 : f32 to vector<8x32xf32>
    %204 = arith.subf %202, %203 : vector<8x32xf32>
    %205 = vector.extract_strided_slice %197 {offsets = [0, 96], sizes = [8, 32], strides = [1, 1]} : vector<8x128xf32> to vector<8x32xf32>
    %206 = arith.mulf %199, %185 : vector<8x32xf32>
    %207 = arith.mulf %198, %204 : vector<8x32xf32>
    %208 = arith.addf %206, %207 : vector<8x32xf32>
    %209 = math.tanh %208 : vector<8x32xf32>
    %210 = arith.mulf %205, %209 : vector<8x32xf32>
    %211 = vector.broadcast %c6_i32 : i32 to vector<8x32xi32>
    %212 = arith.cmpi sgt, %10, %211 : vector<8x32xi32>
    %213 = arith.select %212, %210, %184 : vector<8x32xi1>, vector<8x32xf32>
    %214 = arith.select %212, %208, %185 : vector<8x32xi1>, vector<8x32xf32>
    %c7_i32 = arith.constant 7 : i32
    %c8_i32_53 = arith.constant 8 : i32
    %215 = arith.muli %c7_i32, %c8_i32_53 : i32
    %216 = tpu.assume_multiple %215, 8 : i32
    %217 = arith.index_cast %216 : i32 to index
    %c0_54 = arith.constant 0 : index
    %218 = vector.load %arg11[%217, %c0_54] : memref<224x128xf32, #tpu.memory_space<vmem>>, vector<8x128xf32>
    %219 = arith.truncf %213 : vector<8x32xf32> to vector<8x32xbf16>
    %cst_55 = arith.constant dense<0.000000e+00> : vector<8x128xf32>
    %220 = tpu.matmul %219, %7, %cst_55 {dimension_numbers = #tpu.dot_dimension_numbers<[1], [0], [0], [1], [0, 0, 1, 1], [], []>} : vector<8x32xbf16>, vector<32x128xbf16>, vector<8x128xf32> -> vector<8x128xf32>
    %221 = arith.addf %218, %220 : vector<8x128xf32>
    %222 = arith.negf %221 : vector<8x128xf32>
    %223 = math.exp %222 : vector<8x128xf32>
    %cst_56 = arith.constant 1.000000e+00 : f32
    %224 = vector.broadcast %cst_56 : f32 to vector<8x128xf32>
    %225 = arith.addf %224, %223 : vector<8x128xf32>
    %226 = arith.divf %224, %225 : vector<8x128xf32>
    %227 = vector.extract_strided_slice %226 {offsets = [0, 0], sizes = [8, 32], strides = [1, 1]} : vector<8x128xf32> to vector<8x32xf32>
    %228 = vector.extract_strided_slice %226 {offsets = [0, 32], sizes = [8, 32], strides = [1, 1]} : vector<8x128xf32> to vector<8x32xf32>
    %229 = vector.extract_strided_slice %226 {offsets = [0, 64], sizes = [8, 32], strides = [1, 1]} : vector<8x128xf32> to vector<8x32xf32>
    %cst_57 = arith.constant 2.000000e+00 : f32
    %230 = vector.broadcast %cst_57 : f32 to vector<8x32xf32>
    %231 = arith.mulf %230, %229 : vector<8x32xf32>
    %cst_58 = arith.constant 1.000000e+00 : f32
    %232 = vector.broadcast %cst_58 : f32 to vector<8x32xf32>
    %233 = arith.subf %231, %232 : vector<8x32xf32>
    %234 = vector.extract_strided_slice %226 {offsets = [0, 96], sizes = [8, 32], strides = [1, 1]} : vector<8x128xf32> to vector<8x32xf32>
    %235 = arith.mulf %228, %214 : vector<8x32xf32>
    %236 = arith.mulf %227, %233 : vector<8x32xf32>
    %237 = arith.addf %235, %236 : vector<8x32xf32>
    %238 = math.tanh %237 : vector<8x32xf32>
    %239 = arith.mulf %234, %238 : vector<8x32xf32>
    %240 = vector.broadcast %c7_i32 : i32 to vector<8x32xi32>
    %241 = arith.cmpi sgt, %10, %240 : vector<8x32xi32>
    %242 = arith.select %241, %239, %213 : vector<8x32xi1>, vector<8x32xf32>
    %243 = arith.select %241, %237, %214 : vector<8x32xi1>, vector<8x32xf32>
    %c8_i32_59 = arith.constant 8 : i32
    %c8_i32_60 = arith.constant 8 : i32
    %244 = arith.muli %c8_i32_59, %c8_i32_60 : i32
    %245 = tpu.assume_multiple %244, 8 : i32
    %246 = arith.index_cast %245 : i32 to index
    %c0_61 = arith.constant 0 : index
    %247 = vector.load %arg11[%246, %c0_61] : memref<224x128xf32, #tpu.memory_space<vmem>>, vector<8x128xf32>
    %248 = arith.truncf %242 : vector<8x32xf32> to vector<8x32xbf16>
    %cst_62 = arith.constant dense<0.000000e+00> : vector<8x128xf32>
    %249 = tpu.matmul %248, %7, %cst_62 {dimension_numbers = #tpu.dot_dimension_numbers<[1], [0], [0], [1], [0, 0, 1, 1], [], []>} : vector<8x32xbf16>, vector<32x128xbf16>, vector<8x128xf32> -> vector<8x128xf32>
    %250 = arith.addf %247, %249 : vector<8x128xf32>
    %251 = arith.negf %250 : vector<8x128xf32>
    %252 = math.exp %251 : vector<8x128xf32>
    %cst_63 = arith.constant 1.000000e+00 : f32
    %253 = vector.broadcast %cst_63 : f32 to vector<8x128xf32>
    %254 = arith.addf %253, %252 : vector<8x128xf32>
    %255 = arith.divf %253, %254 : vector<8x128xf32>
    %256 = vector.extract_strided_slice %255 {offsets = [0, 0], sizes = [8, 32], strides = [1, 1]} : vector<8x128xf32> to vector<8x32xf32>
    %257 = vector.extract_strided_slice %255 {offsets = [0, 32], sizes = [8, 32], strides = [1, 1]} : vector<8x128xf32> to vector<8x32xf32>
    %258 = vector.extract_strided_slice %255 {offsets = [0, 64], sizes = [8, 32], strides = [1, 1]} : vector<8x128xf32> to vector<8x32xf32>
    %cst_64 = arith.constant 2.000000e+00 : f32
    %259 = vector.broadcast %cst_64 : f32 to vector<8x32xf32>
    %260 = arith.mulf %259, %258 : vector<8x32xf32>
    %cst_65 = arith.constant 1.000000e+00 : f32
    %261 = vector.broadcast %cst_65 : f32 to vector<8x32xf32>
    %262 = arith.subf %260, %261 : vector<8x32xf32>
    %263 = vector.extract_strided_slice %255 {offsets = [0, 96], sizes = [8, 32], strides = [1, 1]} : vector<8x128xf32> to vector<8x32xf32>
    %264 = arith.mulf %257, %243 : vector<8x32xf32>
    %265 = arith.mulf %256, %262 : vector<8x32xf32>
    %266 = arith.addf %264, %265 : vector<8x32xf32>
    %267 = math.tanh %266 : vector<8x32xf32>
    %268 = arith.mulf %263, %267 : vector<8x32xf32>
    %269 = vector.broadcast %c8_i32_59 : i32 to vector<8x32xi32>
    %270 = arith.cmpi sgt, %10, %269 : vector<8x32xi32>
    %271 = arith.select %270, %268, %242 : vector<8x32xi1>, vector<8x32xf32>
    %272 = arith.select %270, %266, %243 : vector<8x32xi1>, vector<8x32xf32>
    %c9_i32 = arith.constant 9 : i32
    %c8_i32_66 = arith.constant 8 : i32
    %273 = arith.muli %c9_i32, %c8_i32_66 : i32
    %274 = tpu.assume_multiple %273, 8 : i32
    %275 = arith.index_cast %274 : i32 to index
    %c0_67 = arith.constant 0 : index
    %276 = vector.load %arg11[%275, %c0_67] : memref<224x128xf32, #tpu.memory_space<vmem>>, vector<8x128xf32>
    %277 = arith.truncf %271 : vector<8x32xf32> to vector<8x32xbf16>
    %cst_68 = arith.constant dense<0.000000e+00> : vector<8x128xf32>
    %278 = tpu.matmul %277, %7, %cst_68 {dimension_numbers = #tpu.dot_dimension_numbers<[1], [0], [0], [1], [0, 0, 1, 1], [], []>} : vector<8x32xbf16>, vector<32x128xbf16>, vector<8x128xf32> -> vector<8x128xf32>
    %279 = arith.addf %276, %278 : vector<8x128xf32>
    %280 = arith.negf %279 : vector<8x128xf32>
    %281 = math.exp %280 : vector<8x128xf32>
    %cst_69 = arith.constant 1.000000e+00 : f32
    %282 = vector.broadcast %cst_69 : f32 to vector<8x128xf32>
    %283 = arith.addf %282, %281 : vector<8x128xf32>
    %284 = arith.divf %282, %283 : vector<8x128xf32>
    %285 = vector.extract_strided_slice %284 {offsets = [0, 0], sizes = [8, 32], strides = [1, 1]} : vector<8x128xf32> to vector<8x32xf32>
    %286 = vector.extract_strided_slice %284 {offsets = [0, 32], sizes = [8, 32], strides = [1, 1]} : vector<8x128xf32> to vector<8x32xf32>
    %287 = vector.extract_strided_slice %284 {offsets = [0, 64], sizes = [8, 32], strides = [1, 1]} : vector<8x128xf32> to vector<8x32xf32>
    %cst_70 = arith.constant 2.000000e+00 : f32
    %288 = vector.broadcast %cst_70 : f32 to vector<8x32xf32>
    %289 = arith.mulf %288, %287 : vector<8x32xf32>
    %cst_71 = arith.constant 1.000000e+00 : f32
    %290 = vector.broadcast %cst_71 : f32 to vector<8x32xf32>
    %291 = arith.subf %289, %290 : vector<8x32xf32>
    %292 = vector.extract_strided_slice %284 {offsets = [0, 96], sizes = [8, 32], strides = [1, 1]} : vector<8x128xf32> to vector<8x32xf32>
    %293 = arith.mulf %286, %272 : vector<8x32xf32>
    %294 = arith.mulf %285, %291 : vector<8x32xf32>
    %295 = arith.addf %293, %294 : vector<8x32xf32>
    %296 = math.tanh %295 : vector<8x32xf32>
    %297 = arith.mulf %292, %296 : vector<8x32xf32>
    %298 = vector.broadcast %c9_i32 : i32 to vector<8x32xi32>
    %299 = arith.cmpi sgt, %10, %298 : vector<8x32xi32>
    %300 = arith.select %299, %297, %271 : vector<8x32xi1>, vector<8x32xf32>
    %301 = arith.select %299, %295, %272 : vector<8x32xi1>, vector<8x32xf32>
    %c10_i32 = arith.constant 10 : i32
    %c8_i32_72 = arith.constant 8 : i32
    %302 = arith.muli %c10_i32, %c8_i32_72 : i32
    %303 = tpu.assume_multiple %302, 8 : i32
    %304 = arith.index_cast %303 : i32 to index
    %c0_73 = arith.constant 0 : index
    %305 = vector.load %arg11[%304, %c0_73] : memref<224x128xf32, #tpu.memory_space<vmem>>, vector<8x128xf32>
    %306 = arith.truncf %300 : vector<8x32xf32> to vector<8x32xbf16>
    %cst_74 = arith.constant dense<0.000000e+00> : vector<8x128xf32>
    %307 = tpu.matmul %306, %7, %cst_74 {dimension_numbers = #tpu.dot_dimension_numbers<[1], [0], [0], [1], [0, 0, 1, 1], [], []>} : vector<8x32xbf16>, vector<32x128xbf16>, vector<8x128xf32> -> vector<8x128xf32>
    %308 = arith.addf %305, %307 : vector<8x128xf32>
    %309 = arith.negf %308 : vector<8x128xf32>
    %310 = math.exp %309 : vector<8x128xf32>
    %cst_75 = arith.constant 1.000000e+00 : f32
    %311 = vector.broadcast %cst_75 : f32 to vector<8x128xf32>
    %312 = arith.addf %311, %310 : vector<8x128xf32>
    %313 = arith.divf %311, %312 : vector<8x128xf32>
    %314 = vector.extract_strided_slice %313 {offsets = [0, 0], sizes = [8, 32], strides = [1, 1]} : vector<8x128xf32> to vector<8x32xf32>
    %315 = vector.extract_strided_slice %313 {offsets = [0, 32], sizes = [8, 32], strides = [1, 1]} : vector<8x128xf32> to vector<8x32xf32>
    %316 = vector.extract_strided_slice %313 {offsets = [0, 64], sizes = [8, 32], strides = [1, 1]} : vector<8x128xf32> to vector<8x32xf32>
    %cst_76 = arith.constant 2.000000e+00 : f32
    %317 = vector.broadcast %cst_76 : f32 to vector<8x32xf32>
    %318 = arith.mulf %317, %316 : vector<8x32xf32>
    %cst_77 = arith.constant 1.000000e+00 : f32
    %319 = vector.broadcast %cst_77 : f32 to vector<8x32xf32>
    %320 = arith.subf %318, %319 : vector<8x32xf32>
    %321 = vector.extract_strided_slice %313 {offsets = [0, 96], sizes = [8, 32], strides = [1, 1]} : vector<8x128xf32> to vector<8x32xf32>
    %322 = arith.mulf %315, %301 : vector<8x32xf32>
    %323 = arith.mulf %314, %320 : vector<8x32xf32>
    %324 = arith.addf %322, %323 : vector<8x32xf32>
    %325 = math.tanh %324 : vector<8x32xf32>
    %326 = arith.mulf %321, %325 : vector<8x32xf32>
    %327 = vector.broadcast %c10_i32 : i32 to vector<8x32xi32>
    %328 = arith.cmpi sgt, %10, %327 : vector<8x32xi32>
    %329 = arith.select %328, %326, %300 : vector<8x32xi1>, vector<8x32xf32>
    %330 = arith.select %328, %324, %301 : vector<8x32xi1>, vector<8x32xf32>
    %c11_i32 = arith.constant 11 : i32
    %c8_i32_78 = arith.constant 8 : i32
    %331 = arith.muli %c11_i32, %c8_i32_78 : i32
    %332 = tpu.assume_multiple %331, 8 : i32
    %333 = arith.index_cast %332 : i32 to index
    %c0_79 = arith.constant 0 : index
    %334 = vector.load %arg11[%333, %c0_79] : memref<224x128xf32, #tpu.memory_space<vmem>>, vector<8x128xf32>
    %335 = arith.truncf %329 : vector<8x32xf32> to vector<8x32xbf16>
    %cst_80 = arith.constant dense<0.000000e+00> : vector<8x128xf32>
    %336 = tpu.matmul %335, %7, %cst_80 {dimension_numbers = #tpu.dot_dimension_numbers<[1], [0], [0], [1], [0, 0, 1, 1], [], []>} : vector<8x32xbf16>, vector<32x128xbf16>, vector<8x128xf32> -> vector<8x128xf32>
    %337 = arith.addf %334, %336 : vector<8x128xf32>
    %338 = arith.negf %337 : vector<8x128xf32>
    %339 = math.exp %338 : vector<8x128xf32>
    %cst_81 = arith.constant 1.000000e+00 : f32
    %340 = vector.broadcast %cst_81 : f32 to vector<8x128xf32>
    %341 = arith.addf %340, %339 : vector<8x128xf32>
    %342 = arith.divf %340, %341 : vector<8x128xf32>
    %343 = vector.extract_strided_slice %342 {offsets = [0, 0], sizes = [8, 32], strides = [1, 1]} : vector<8x128xf32> to vector<8x32xf32>
    %344 = vector.extract_strided_slice %342 {offsets = [0, 32], sizes = [8, 32], strides = [1, 1]} : vector<8x128xf32> to vector<8x32xf32>
    %345 = vector.extract_strided_slice %342 {offsets = [0, 64], sizes = [8, 32], strides = [1, 1]} : vector<8x128xf32> to vector<8x32xf32>
    %cst_82 = arith.constant 2.000000e+00 : f32
    %346 = vector.broadcast %cst_82 : f32 to vector<8x32xf32>
    %347 = arith.mulf %346, %345 : vector<8x32xf32>
    %cst_83 = arith.constant 1.000000e+00 : f32
    %348 = vector.broadcast %cst_83 : f32 to vector<8x32xf32>
    %349 = arith.subf %347, %348 : vector<8x32xf32>
    %350 = vector.extract_strided_slice %342 {offsets = [0, 96], sizes = [8, 32], strides = [1, 1]} : vector<8x128xf32> to vector<8x32xf32>
    %351 = arith.mulf %344, %330 : vector<8x32xf32>
    %352 = arith.mulf %343, %349 : vector<8x32xf32>
    %353 = arith.addf %351, %352 : vector<8x32xf32>
    %354 = math.tanh %353 : vector<8x32xf32>
    %355 = arith.mulf %350, %354 : vector<8x32xf32>
    %356 = vector.broadcast %c11_i32 : i32 to vector<8x32xi32>
    %357 = arith.cmpi sgt, %10, %356 : vector<8x32xi32>
    %358 = arith.select %357, %355, %329 : vector<8x32xi1>, vector<8x32xf32>
    %359 = arith.select %357, %353, %330 : vector<8x32xi1>, vector<8x32xf32>
    %c12_i32 = arith.constant 12 : i32
    %c8_i32_84 = arith.constant 8 : i32
    %360 = arith.muli %c12_i32, %c8_i32_84 : i32
    %361 = tpu.assume_multiple %360, 8 : i32
    %362 = arith.index_cast %361 : i32 to index
    %c0_85 = arith.constant 0 : index
    %363 = vector.load %arg11[%362, %c0_85] : memref<224x128xf32, #tpu.memory_space<vmem>>, vector<8x128xf32>
    %364 = arith.truncf %358 : vector<8x32xf32> to vector<8x32xbf16>
    %cst_86 = arith.constant dense<0.000000e+00> : vector<8x128xf32>
    %365 = tpu.matmul %364, %7, %cst_86 {dimension_numbers = #tpu.dot_dimension_numbers<[1], [0], [0], [1], [0, 0, 1, 1], [], []>} : vector<8x32xbf16>, vector<32x128xbf16>, vector<8x128xf32> -> vector<8x128xf32>
    %366 = arith.addf %363, %365 : vector<8x128xf32>
    %367 = arith.negf %366 : vector<8x128xf32>
    %368 = math.exp %367 : vector<8x128xf32>
    %cst_87 = arith.constant 1.000000e+00 : f32
    %369 = vector.broadcast %cst_87 : f32 to vector<8x128xf32>
    %370 = arith.addf %369, %368 : vector<8x128xf32>
    %371 = arith.divf %369, %370 : vector<8x128xf32>
    %372 = vector.extract_strided_slice %371 {offsets = [0, 0], sizes = [8, 32], strides = [1, 1]} : vector<8x128xf32> to vector<8x32xf32>
    %373 = vector.extract_strided_slice %371 {offsets = [0, 32], sizes = [8, 32], strides = [1, 1]} : vector<8x128xf32> to vector<8x32xf32>
    %374 = vector.extract_strided_slice %371 {offsets = [0, 64], sizes = [8, 32], strides = [1, 1]} : vector<8x128xf32> to vector<8x32xf32>
    %cst_88 = arith.constant 2.000000e+00 : f32
    %375 = vector.broadcast %cst_88 : f32 to vector<8x32xf32>
    %376 = arith.mulf %375, %374 : vector<8x32xf32>
    %cst_89 = arith.constant 1.000000e+00 : f32
    %377 = vector.broadcast %cst_89 : f32 to vector<8x32xf32>
    %378 = arith.subf %376, %377 : vector<8x32xf32>
    %379 = vector.extract_strided_slice %371 {offsets = [0, 96], sizes = [8, 32], strides = [1, 1]} : vector<8x128xf32> to vector<8x32xf32>
    %380 = arith.mulf %373, %359 : vector<8x32xf32>
    %381 = arith.mulf %372, %378 : vector<8x32xf32>
    %382 = arith.addf %380, %381 : vector<8x32xf32>
    %383 = math.tanh %382 : vector<8x32xf32>
    %384 = arith.mulf %379, %383 : vector<8x32xf32>
    %385 = vector.broadcast %c12_i32 : i32 to vector<8x32xi32>
    %386 = arith.cmpi sgt, %10, %385 : vector<8x32xi32>
    %387 = arith.select %386, %384, %358 : vector<8x32xi1>, vector<8x32xf32>
    %388 = arith.select %386, %382, %359 : vector<8x32xi1>, vector<8x32xf32>
    %c13_i32 = arith.constant 13 : i32
    %c8_i32_90 = arith.constant 8 : i32
    %389 = arith.muli %c13_i32, %c8_i32_90 : i32
    %390 = tpu.assume_multiple %389, 8 : i32
    %391 = arith.index_cast %390 : i32 to index
    %c0_91 = arith.constant 0 : index
    %392 = vector.load %arg11[%391, %c0_91] : memref<224x128xf32, #tpu.memory_space<vmem>>, vector<8x128xf32>
    %393 = arith.truncf %387 : vector<8x32xf32> to vector<8x32xbf16>
    %cst_92 = arith.constant dense<0.000000e+00> : vector<8x128xf32>
    %394 = tpu.matmul %393, %7, %cst_92 {dimension_numbers = #tpu.dot_dimension_numbers<[1], [0], [0], [1], [0, 0, 1, 1], [], []>} : vector<8x32xbf16>, vector<32x128xbf16>, vector<8x128xf32> -> vector<8x128xf32>
    %395 = arith.addf %392, %394 : vector<8x128xf32>
    %396 = arith.negf %395 : vector<8x128xf32>
    %397 = math.exp %396 : vector<8x128xf32>
    %cst_93 = arith.constant 1.000000e+00 : f32
    %398 = vector.broadcast %cst_93 : f32 to vector<8x128xf32>
    %399 = arith.addf %398, %397 : vector<8x128xf32>
    %400 = arith.divf %398, %399 : vector<8x128xf32>
    %401 = vector.extract_strided_slice %400 {offsets = [0, 0], sizes = [8, 32], strides = [1, 1]} : vector<8x128xf32> to vector<8x32xf32>
    %402 = vector.extract_strided_slice %400 {offsets = [0, 32], sizes = [8, 32], strides = [1, 1]} : vector<8x128xf32> to vector<8x32xf32>
    %403 = vector.extract_strided_slice %400 {offsets = [0, 64], sizes = [8, 32], strides = [1, 1]} : vector<8x128xf32> to vector<8x32xf32>
    %cst_94 = arith.constant 2.000000e+00 : f32
    %404 = vector.broadcast %cst_94 : f32 to vector<8x32xf32>
    %405 = arith.mulf %404, %403 : vector<8x32xf32>
    %cst_95 = arith.constant 1.000000e+00 : f32
    %406 = vector.broadcast %cst_95 : f32 to vector<8x32xf32>
    %407 = arith.subf %405, %406 : vector<8x32xf32>
    %408 = vector.extract_strided_slice %400 {offsets = [0, 96], sizes = [8, 32], strides = [1, 1]} : vector<8x128xf32> to vector<8x32xf32>
    %409 = arith.mulf %402, %388 : vector<8x32xf32>
    %410 = arith.mulf %401, %407 : vector<8x32xf32>
    %411 = arith.addf %409, %410 : vector<8x32xf32>
    %412 = math.tanh %411 : vector<8x32xf32>
    %413 = arith.mulf %408, %412 : vector<8x32xf32>
    %414 = vector.broadcast %c13_i32 : i32 to vector<8x32xi32>
    %415 = arith.cmpi sgt, %10, %414 : vector<8x32xi32>
    %416 = arith.select %415, %413, %387 : vector<8x32xi1>, vector<8x32xf32>
    %417 = arith.select %415, %411, %388 : vector<8x32xi1>, vector<8x32xf32>
    %c14_i32 = arith.constant 14 : i32
    %c8_i32_96 = arith.constant 8 : i32
    %418 = arith.muli %c14_i32, %c8_i32_96 : i32
    %419 = tpu.assume_multiple %418, 8 : i32
    %420 = arith.index_cast %419 : i32 to index
    %c0_97 = arith.constant 0 : index
    %421 = vector.load %arg11[%420, %c0_97] : memref<224x128xf32, #tpu.memory_space<vmem>>, vector<8x128xf32>
    %422 = arith.truncf %416 : vector<8x32xf32> to vector<8x32xbf16>
    %cst_98 = arith.constant dense<0.000000e+00> : vector<8x128xf32>
    %423 = tpu.matmul %422, %7, %cst_98 {dimension_numbers = #tpu.dot_dimension_numbers<[1], [0], [0], [1], [0, 0, 1, 1], [], []>} : vector<8x32xbf16>, vector<32x128xbf16>, vector<8x128xf32> -> vector<8x128xf32>
    %424 = arith.addf %421, %423 : vector<8x128xf32>
    %425 = arith.negf %424 : vector<8x128xf32>
    %426 = math.exp %425 : vector<8x128xf32>
    %cst_99 = arith.constant 1.000000e+00 : f32
    %427 = vector.broadcast %cst_99 : f32 to vector<8x128xf32>
    %428 = arith.addf %427, %426 : vector<8x128xf32>
    %429 = arith.divf %427, %428 : vector<8x128xf32>
    %430 = vector.extract_strided_slice %429 {offsets = [0, 0], sizes = [8, 32], strides = [1, 1]} : vector<8x128xf32> to vector<8x32xf32>
    %431 = vector.extract_strided_slice %429 {offsets = [0, 32], sizes = [8, 32], strides = [1, 1]} : vector<8x128xf32> to vector<8x32xf32>
    %432 = vector.extract_strided_slice %429 {offsets = [0, 64], sizes = [8, 32], strides = [1, 1]} : vector<8x128xf32> to vector<8x32xf32>
    %cst_100 = arith.constant 2.000000e+00 : f32
    %433 = vector.broadcast %cst_100 : f32 to vector<8x32xf32>
    %434 = arith.mulf %433, %432 : vector<8x32xf32>
    %cst_101 = arith.constant 1.000000e+00 : f32
    %435 = vector.broadcast %cst_101 : f32 to vector<8x32xf32>
    %436 = arith.subf %434, %435 : vector<8x32xf32>
    %437 = vector.extract_strided_slice %429 {offsets = [0, 96], sizes = [8, 32], strides = [1, 1]} : vector<8x128xf32> to vector<8x32xf32>
    %438 = arith.mulf %431, %417 : vector<8x32xf32>
    %439 = arith.mulf %430, %436 : vector<8x32xf32>
    %440 = arith.addf %438, %439 : vector<8x32xf32>
    %441 = math.tanh %440 : vector<8x32xf32>
    %442 = arith.mulf %437, %441 : vector<8x32xf32>
    %443 = vector.broadcast %c14_i32 : i32 to vector<8x32xi32>
    %444 = arith.cmpi sgt, %10, %443 : vector<8x32xi32>
    %445 = arith.select %444, %442, %416 : vector<8x32xi1>, vector<8x32xf32>
    %446 = arith.select %444, %440, %417 : vector<8x32xi1>, vector<8x32xf32>
    %c15_i32 = arith.constant 15 : i32
    %c8_i32_102 = arith.constant 8 : i32
    %447 = arith.muli %c15_i32, %c8_i32_102 : i32
    %448 = tpu.assume_multiple %447, 8 : i32
    %449 = arith.index_cast %448 : i32 to index
    %c0_103 = arith.constant 0 : index
    %450 = vector.load %arg11[%449, %c0_103] : memref<224x128xf32, #tpu.memory_space<vmem>>, vector<8x128xf32>
    %451 = arith.truncf %445 : vector<8x32xf32> to vector<8x32xbf16>
    %cst_104 = arith.constant dense<0.000000e+00> : vector<8x128xf32>
    %452 = tpu.matmul %451, %7, %cst_104 {dimension_numbers = #tpu.dot_dimension_numbers<[1], [0], [0], [1], [0, 0, 1, 1], [], []>} : vector<8x32xbf16>, vector<32x128xbf16>, vector<8x128xf32> -> vector<8x128xf32>
    %453 = arith.addf %450, %452 : vector<8x128xf32>
    %454 = arith.negf %453 : vector<8x128xf32>
    %455 = math.exp %454 : vector<8x128xf32>
    %cst_105 = arith.constant 1.000000e+00 : f32
    %456 = vector.broadcast %cst_105 : f32 to vector<8x128xf32>
    %457 = arith.addf %456, %455 : vector<8x128xf32>
    %458 = arith.divf %456, %457 : vector<8x128xf32>
    %459 = vector.extract_strided_slice %458 {offsets = [0, 0], sizes = [8, 32], strides = [1, 1]} : vector<8x128xf32> to vector<8x32xf32>
    %460 = vector.extract_strided_slice %458 {offsets = [0, 32], sizes = [8, 32], strides = [1, 1]} : vector<8x128xf32> to vector<8x32xf32>
    %461 = vector.extract_strided_slice %458 {offsets = [0, 64], sizes = [8, 32], strides = [1, 1]} : vector<8x128xf32> to vector<8x32xf32>
    %cst_106 = arith.constant 2.000000e+00 : f32
    %462 = vector.broadcast %cst_106 : f32 to vector<8x32xf32>
    %463 = arith.mulf %462, %461 : vector<8x32xf32>
    %cst_107 = arith.constant 1.000000e+00 : f32
    %464 = vector.broadcast %cst_107 : f32 to vector<8x32xf32>
    %465 = arith.subf %463, %464 : vector<8x32xf32>
    %466 = vector.extract_strided_slice %458 {offsets = [0, 96], sizes = [8, 32], strides = [1, 1]} : vector<8x128xf32> to vector<8x32xf32>
    %467 = arith.mulf %460, %446 : vector<8x32xf32>
    %468 = arith.mulf %459, %465 : vector<8x32xf32>
    %469 = arith.addf %467, %468 : vector<8x32xf32>
    %470 = math.tanh %469 : vector<8x32xf32>
    %471 = arith.mulf %466, %470 : vector<8x32xf32>
    %472 = vector.broadcast %c15_i32 : i32 to vector<8x32xi32>
    %473 = arith.cmpi sgt, %10, %472 : vector<8x32xi32>
    %474 = arith.select %473, %471, %445 : vector<8x32xi1>, vector<8x32xf32>
    %475 = arith.select %473, %469, %446 : vector<8x32xi1>, vector<8x32xf32>
    %c16_i32 = arith.constant 16 : i32
    %c8_i32_108 = arith.constant 8 : i32
    %476 = arith.muli %c16_i32, %c8_i32_108 : i32
    %477 = tpu.assume_multiple %476, 8 : i32
    %478 = arith.index_cast %477 : i32 to index
    %c0_109 = arith.constant 0 : index
    %479 = vector.load %arg11[%478, %c0_109] : memref<224x128xf32, #tpu.memory_space<vmem>>, vector<8x128xf32>
    %480 = arith.truncf %474 : vector<8x32xf32> to vector<8x32xbf16>
    %cst_110 = arith.constant dense<0.000000e+00> : vector<8x128xf32>
    %481 = tpu.matmul %480, %7, %cst_110 {dimension_numbers = #tpu.dot_dimension_numbers<[1], [0], [0], [1], [0, 0, 1, 1], [], []>} : vector<8x32xbf16>, vector<32x128xbf16>, vector<8x128xf32> -> vector<8x128xf32>
    %482 = arith.addf %479, %481 : vector<8x128xf32>
    %483 = arith.negf %482 : vector<8x128xf32>
    %484 = math.exp %483 : vector<8x128xf32>
    %cst_111 = arith.constant 1.000000e+00 : f32
    %485 = vector.broadcast %cst_111 : f32 to vector<8x128xf32>
    %486 = arith.addf %485, %484 : vector<8x128xf32>
    %487 = arith.divf %485, %486 : vector<8x128xf32>
    %488 = vector.extract_strided_slice %487 {offsets = [0, 0], sizes = [8, 32], strides = [1, 1]} : vector<8x128xf32> to vector<8x32xf32>
    %489 = vector.extract_strided_slice %487 {offsets = [0, 32], sizes = [8, 32], strides = [1, 1]} : vector<8x128xf32> to vector<8x32xf32>
    %490 = vector.extract_strided_slice %487 {offsets = [0, 64], sizes = [8, 32], strides = [1, 1]} : vector<8x128xf32> to vector<8x32xf32>
    %cst_112 = arith.constant 2.000000e+00 : f32
    %491 = vector.broadcast %cst_112 : f32 to vector<8x32xf32>
    %492 = arith.mulf %491, %490 : vector<8x32xf32>
    %cst_113 = arith.constant 1.000000e+00 : f32
    %493 = vector.broadcast %cst_113 : f32 to vector<8x32xf32>
    %494 = arith.subf %492, %493 : vector<8x32xf32>
    %495 = vector.extract_strided_slice %487 {offsets = [0, 96], sizes = [8, 32], strides = [1, 1]} : vector<8x128xf32> to vector<8x32xf32>
    %496 = arith.mulf %489, %475 : vector<8x32xf32>
    %497 = arith.mulf %488, %494 : vector<8x32xf32>
    %498 = arith.addf %496, %497 : vector<8x32xf32>
    %499 = math.tanh %498 : vector<8x32xf32>
    %500 = arith.mulf %495, %499 : vector<8x32xf32>
    %501 = vector.broadcast %c16_i32 : i32 to vector<8x32xi32>
    %502 = arith.cmpi sgt, %10, %501 : vector<8x32xi32>
    %503 = arith.select %502, %500, %474 : vector<8x32xi1>, vector<8x32xf32>
    %504 = arith.select %502, %498, %475 : vector<8x32xi1>, vector<8x32xf32>
    %c17_i32 = arith.constant 17 : i32
    %c8_i32_114 = arith.constant 8 : i32
    %505 = arith.muli %c17_i32, %c8_i32_114 : i32
    %506 = tpu.assume_multiple %505, 8 : i32
    %507 = arith.index_cast %506 : i32 to index
    %c0_115 = arith.constant 0 : index
    %508 = vector.load %arg11[%507, %c0_115] : memref<224x128xf32, #tpu.memory_space<vmem>>, vector<8x128xf32>
    %509 = arith.truncf %503 : vector<8x32xf32> to vector<8x32xbf16>
    %cst_116 = arith.constant dense<0.000000e+00> : vector<8x128xf32>
    %510 = tpu.matmul %509, %7, %cst_116 {dimension_numbers = #tpu.dot_dimension_numbers<[1], [0], [0], [1], [0, 0, 1, 1], [], []>} : vector<8x32xbf16>, vector<32x128xbf16>, vector<8x128xf32> -> vector<8x128xf32>
    %511 = arith.addf %508, %510 : vector<8x128xf32>
    %512 = arith.negf %511 : vector<8x128xf32>
    %513 = math.exp %512 : vector<8x128xf32>
    %cst_117 = arith.constant 1.000000e+00 : f32
    %514 = vector.broadcast %cst_117 : f32 to vector<8x128xf32>
    %515 = arith.addf %514, %513 : vector<8x128xf32>
    %516 = arith.divf %514, %515 : vector<8x128xf32>
    %517 = vector.extract_strided_slice %516 {offsets = [0, 0], sizes = [8, 32], strides = [1, 1]} : vector<8x128xf32> to vector<8x32xf32>
    %518 = vector.extract_strided_slice %516 {offsets = [0, 32], sizes = [8, 32], strides = [1, 1]} : vector<8x128xf32> to vector<8x32xf32>
    %519 = vector.extract_strided_slice %516 {offsets = [0, 64], sizes = [8, 32], strides = [1, 1]} : vector<8x128xf32> to vector<8x32xf32>
    %cst_118 = arith.constant 2.000000e+00 : f32
    %520 = vector.broadcast %cst_118 : f32 to vector<8x32xf32>
    %521 = arith.mulf %520, %519 : vector<8x32xf32>
    %cst_119 = arith.constant 1.000000e+00 : f32
    %522 = vector.broadcast %cst_119 : f32 to vector<8x32xf32>
    %523 = arith.subf %521, %522 : vector<8x32xf32>
    %524 = vector.extract_strided_slice %516 {offsets = [0, 96], sizes = [8, 32], strides = [1, 1]} : vector<8x128xf32> to vector<8x32xf32>
    %525 = arith.mulf %518, %504 : vector<8x32xf32>
    %526 = arith.mulf %517, %523 : vector<8x32xf32>
    %527 = arith.addf %525, %526 : vector<8x32xf32>
    %528 = math.tanh %527 : vector<8x32xf32>
    %529 = arith.mulf %524, %528 : vector<8x32xf32>
    %530 = vector.broadcast %c17_i32 : i32 to vector<8x32xi32>
    %531 = arith.cmpi sgt, %10, %530 : vector<8x32xi32>
    %532 = arith.select %531, %529, %503 : vector<8x32xi1>, vector<8x32xf32>
    %533 = arith.select %531, %527, %504 : vector<8x32xi1>, vector<8x32xf32>
    %c18_i32 = arith.constant 18 : i32
    %c8_i32_120 = arith.constant 8 : i32
    %534 = arith.muli %c18_i32, %c8_i32_120 : i32
    %535 = tpu.assume_multiple %534, 8 : i32
    %536 = arith.index_cast %535 : i32 to index
    %c0_121 = arith.constant 0 : index
    %537 = vector.load %arg11[%536, %c0_121] : memref<224x128xf32, #tpu.memory_space<vmem>>, vector<8x128xf32>
    %538 = arith.truncf %532 : vector<8x32xf32> to vector<8x32xbf16>
    %cst_122 = arith.constant dense<0.000000e+00> : vector<8x128xf32>
    %539 = tpu.matmul %538, %7, %cst_122 {dimension_numbers = #tpu.dot_dimension_numbers<[1], [0], [0], [1], [0, 0, 1, 1], [], []>} : vector<8x32xbf16>, vector<32x128xbf16>, vector<8x128xf32> -> vector<8x128xf32>
    %540 = arith.addf %537, %539 : vector<8x128xf32>
    %541 = arith.negf %540 : vector<8x128xf32>
    %542 = math.exp %541 : vector<8x128xf32>
    %cst_123 = arith.constant 1.000000e+00 : f32
    %543 = vector.broadcast %cst_123 : f32 to vector<8x128xf32>
    %544 = arith.addf %543, %542 : vector<8x128xf32>
    %545 = arith.divf %543, %544 : vector<8x128xf32>
    %546 = vector.extract_strided_slice %545 {offsets = [0, 0], sizes = [8, 32], strides = [1, 1]} : vector<8x128xf32> to vector<8x32xf32>
    %547 = vector.extract_strided_slice %545 {offsets = [0, 32], sizes = [8, 32], strides = [1, 1]} : vector<8x128xf32> to vector<8x32xf32>
    %548 = vector.extract_strided_slice %545 {offsets = [0, 64], sizes = [8, 32], strides = [1, 1]} : vector<8x128xf32> to vector<8x32xf32>
    %cst_124 = arith.constant 2.000000e+00 : f32
    %549 = vector.broadcast %cst_124 : f32 to vector<8x32xf32>
    %550 = arith.mulf %549, %548 : vector<8x32xf32>
    %cst_125 = arith.constant 1.000000e+00 : f32
    %551 = vector.broadcast %cst_125 : f32 to vector<8x32xf32>
    %552 = arith.subf %550, %551 : vector<8x32xf32>
    %553 = vector.extract_strided_slice %545 {offsets = [0, 96], sizes = [8, 32], strides = [1, 1]} : vector<8x128xf32> to vector<8x32xf32>
    %554 = arith.mulf %547, %533 : vector<8x32xf32>
    %555 = arith.mulf %546, %552 : vector<8x32xf32>
    %556 = arith.addf %554, %555 : vector<8x32xf32>
    %557 = math.tanh %556 : vector<8x32xf32>
    %558 = arith.mulf %553, %557 : vector<8x32xf32>
    %559 = vector.broadcast %c18_i32 : i32 to vector<8x32xi32>
    %560 = arith.cmpi sgt, %10, %559 : vector<8x32xi32>
    %561 = arith.select %560, %558, %532 : vector<8x32xi1>, vector<8x32xf32>
    %562 = arith.select %560, %556, %533 : vector<8x32xi1>, vector<8x32xf32>
    %c19_i32 = arith.constant 19 : i32
    %c8_i32_126 = arith.constant 8 : i32
    %563 = arith.muli %c19_i32, %c8_i32_126 : i32
    %564 = tpu.assume_multiple %563, 8 : i32
    %565 = arith.index_cast %564 : i32 to index
    %c0_127 = arith.constant 0 : index
    %566 = vector.load %arg11[%565, %c0_127] : memref<224x128xf32, #tpu.memory_space<vmem>>, vector<8x128xf32>
    %567 = arith.truncf %561 : vector<8x32xf32> to vector<8x32xbf16>
    %cst_128 = arith.constant dense<0.000000e+00> : vector<8x128xf32>
    %568 = tpu.matmul %567, %7, %cst_128 {dimension_numbers = #tpu.dot_dimension_numbers<[1], [0], [0], [1], [0, 0, 1, 1], [], []>} : vector<8x32xbf16>, vector<32x128xbf16>, vector<8x128xf32> -> vector<8x128xf32>
    %569 = arith.addf %566, %568 : vector<8x128xf32>
    %570 = arith.negf %569 : vector<8x128xf32>
    %571 = math.exp %570 : vector<8x128xf32>
    %cst_129 = arith.constant 1.000000e+00 : f32
    %572 = vector.broadcast %cst_129 : f32 to vector<8x128xf32>
    %573 = arith.addf %572, %571 : vector<8x128xf32>
    %574 = arith.divf %572, %573 : vector<8x128xf32>
    %575 = vector.extract_strided_slice %574 {offsets = [0, 0], sizes = [8, 32], strides = [1, 1]} : vector<8x128xf32> to vector<8x32xf32>
    %576 = vector.extract_strided_slice %574 {offsets = [0, 32], sizes = [8, 32], strides = [1, 1]} : vector<8x128xf32> to vector<8x32xf32>
    %577 = vector.extract_strided_slice %574 {offsets = [0, 64], sizes = [8, 32], strides = [1, 1]} : vector<8x128xf32> to vector<8x32xf32>
    %cst_130 = arith.constant 2.000000e+00 : f32
    %578 = vector.broadcast %cst_130 : f32 to vector<8x32xf32>
    %579 = arith.mulf %578, %577 : vector<8x32xf32>
    %cst_131 = arith.constant 1.000000e+00 : f32
    %580 = vector.broadcast %cst_131 : f32 to vector<8x32xf32>
    %581 = arith.subf %579, %580 : vector<8x32xf32>
    %582 = vector.extract_strided_slice %574 {offsets = [0, 96], sizes = [8, 32], strides = [1, 1]} : vector<8x128xf32> to vector<8x32xf32>
    %583 = arith.mulf %576, %562 : vector<8x32xf32>
    %584 = arith.mulf %575, %581 : vector<8x32xf32>
    %585 = arith.addf %583, %584 : vector<8x32xf32>
    %586 = math.tanh %585 : vector<8x32xf32>
    %587 = arith.mulf %582, %586 : vector<8x32xf32>
    %588 = vector.broadcast %c19_i32 : i32 to vector<8x32xi32>
    %589 = arith.cmpi sgt, %10, %588 : vector<8x32xi32>
    %590 = arith.select %589, %587, %561 : vector<8x32xi1>, vector<8x32xf32>
    %591 = arith.select %589, %585, %562 : vector<8x32xi1>, vector<8x32xf32>
    %c20_i32 = arith.constant 20 : i32
    %c8_i32_132 = arith.constant 8 : i32
    %592 = arith.muli %c20_i32, %c8_i32_132 : i32
    %593 = tpu.assume_multiple %592, 8 : i32
    %594 = arith.index_cast %593 : i32 to index
    %c0_133 = arith.constant 0 : index
    %595 = vector.load %arg11[%594, %c0_133] : memref<224x128xf32, #tpu.memory_space<vmem>>, vector<8x128xf32>
    %596 = arith.truncf %590 : vector<8x32xf32> to vector<8x32xbf16>
    %cst_134 = arith.constant dense<0.000000e+00> : vector<8x128xf32>
    %597 = tpu.matmul %596, %7, %cst_134 {dimension_numbers = #tpu.dot_dimension_numbers<[1], [0], [0], [1], [0, 0, 1, 1], [], []>} : vector<8x32xbf16>, vector<32x128xbf16>, vector<8x128xf32> -> vector<8x128xf32>
    %598 = arith.addf %595, %597 : vector<8x128xf32>
    %599 = arith.negf %598 : vector<8x128xf32>
    %600 = math.exp %599 : vector<8x128xf32>
    %cst_135 = arith.constant 1.000000e+00 : f32
    %601 = vector.broadcast %cst_135 : f32 to vector<8x128xf32>
    %602 = arith.addf %601, %600 : vector<8x128xf32>
    %603 = arith.divf %601, %602 : vector<8x128xf32>
    %604 = vector.extract_strided_slice %603 {offsets = [0, 0], sizes = [8, 32], strides = [1, 1]} : vector<8x128xf32> to vector<8x32xf32>
    %605 = vector.extract_strided_slice %603 {offsets = [0, 32], sizes = [8, 32], strides = [1, 1]} : vector<8x128xf32> to vector<8x32xf32>
    %606 = vector.extract_strided_slice %603 {offsets = [0, 64], sizes = [8, 32], strides = [1, 1]} : vector<8x128xf32> to vector<8x32xf32>
    %cst_136 = arith.constant 2.000000e+00 : f32
    %607 = vector.broadcast %cst_136 : f32 to vector<8x32xf32>
    %608 = arith.mulf %607, %606 : vector<8x32xf32>
    %cst_137 = arith.constant 1.000000e+00 : f32
    %609 = vector.broadcast %cst_137 : f32 to vector<8x32xf32>
    %610 = arith.subf %608, %609 : vector<8x32xf32>
    %611 = vector.extract_strided_slice %603 {offsets = [0, 96], sizes = [8, 32], strides = [1, 1]} : vector<8x128xf32> to vector<8x32xf32>
    %612 = arith.mulf %605, %591 : vector<8x32xf32>
    %613 = arith.mulf %604, %610 : vector<8x32xf32>
    %614 = arith.addf %612, %613 : vector<8x32xf32>
    %615 = math.tanh %614 : vector<8x32xf32>
    %616 = arith.mulf %611, %615 : vector<8x32xf32>
    %617 = vector.broadcast %c20_i32 : i32 to vector<8x32xi32>
    %618 = arith.cmpi sgt, %10, %617 : vector<8x32xi32>
    %619 = arith.select %618, %616, %590 : vector<8x32xi1>, vector<8x32xf32>
    %620 = arith.select %618, %614, %591 : vector<8x32xi1>, vector<8x32xf32>
    %c21_i32 = arith.constant 21 : i32
    %c8_i32_138 = arith.constant 8 : i32
    %621 = arith.muli %c21_i32, %c8_i32_138 : i32
    %622 = tpu.assume_multiple %621, 8 : i32
    %623 = arith.index_cast %622 : i32 to index
    %c0_139 = arith.constant 0 : index
    %624 = vector.load %arg11[%623, %c0_139] : memref<224x128xf32, #tpu.memory_space<vmem>>, vector<8x128xf32>
    %625 = arith.truncf %619 : vector<8x32xf32> to vector<8x32xbf16>
    %cst_140 = arith.constant dense<0.000000e+00> : vector<8x128xf32>
    %626 = tpu.matmul %625, %7, %cst_140 {dimension_numbers = #tpu.dot_dimension_numbers<[1], [0], [0], [1], [0, 0, 1, 1], [], []>} : vector<8x32xbf16>, vector<32x128xbf16>, vector<8x128xf32> -> vector<8x128xf32>
    %627 = arith.addf %624, %626 : vector<8x128xf32>
    %628 = arith.negf %627 : vector<8x128xf32>
    %629 = math.exp %628 : vector<8x128xf32>
    %cst_141 = arith.constant 1.000000e+00 : f32
    %630 = vector.broadcast %cst_141 : f32 to vector<8x128xf32>
    %631 = arith.addf %630, %629 : vector<8x128xf32>
    %632 = arith.divf %630, %631 : vector<8x128xf32>
    %633 = vector.extract_strided_slice %632 {offsets = [0, 0], sizes = [8, 32], strides = [1, 1]} : vector<8x128xf32> to vector<8x32xf32>
    %634 = vector.extract_strided_slice %632 {offsets = [0, 32], sizes = [8, 32], strides = [1, 1]} : vector<8x128xf32> to vector<8x32xf32>
    %635 = vector.extract_strided_slice %632 {offsets = [0, 64], sizes = [8, 32], strides = [1, 1]} : vector<8x128xf32> to vector<8x32xf32>
    %cst_142 = arith.constant 2.000000e+00 : f32
    %636 = vector.broadcast %cst_142 : f32 to vector<8x32xf32>
    %637 = arith.mulf %636, %635 : vector<8x32xf32>
    %cst_143 = arith.constant 1.000000e+00 : f32
    %638 = vector.broadcast %cst_143 : f32 to vector<8x32xf32>
    %639 = arith.subf %637, %638 : vector<8x32xf32>
    %640 = vector.extract_strided_slice %632 {offsets = [0, 96], sizes = [8, 32], strides = [1, 1]} : vector<8x128xf32> to vector<8x32xf32>
    %641 = arith.mulf %634, %620 : vector<8x32xf32>
    %642 = arith.mulf %633, %639 : vector<8x32xf32>
    %643 = arith.addf %641, %642 : vector<8x32xf32>
    %644 = math.tanh %643 : vector<8x32xf32>
    %645 = arith.mulf %640, %644 : vector<8x32xf32>
    %646 = vector.broadcast %c21_i32 : i32 to vector<8x32xi32>
    %647 = arith.cmpi sgt, %10, %646 : vector<8x32xi32>
    %648 = arith.select %647, %645, %619 : vector<8x32xi1>, vector<8x32xf32>
    %649 = arith.select %647, %643, %620 : vector<8x32xi1>, vector<8x32xf32>
    %c22_i32 = arith.constant 22 : i32
    %c8_i32_144 = arith.constant 8 : i32
    %650 = arith.muli %c22_i32, %c8_i32_144 : i32
    %651 = tpu.assume_multiple %650, 8 : i32
    %652 = arith.index_cast %651 : i32 to index
    %c0_145 = arith.constant 0 : index
    %653 = vector.load %arg11[%652, %c0_145] : memref<224x128xf32, #tpu.memory_space<vmem>>, vector<8x128xf32>
    %654 = arith.truncf %648 : vector<8x32xf32> to vector<8x32xbf16>
    %cst_146 = arith.constant dense<0.000000e+00> : vector<8x128xf32>
    %655 = tpu.matmul %654, %7, %cst_146 {dimension_numbers = #tpu.dot_dimension_numbers<[1], [0], [0], [1], [0, 0, 1, 1], [], []>} : vector<8x32xbf16>, vector<32x128xbf16>, vector<8x128xf32> -> vector<8x128xf32>
    %656 = arith.addf %653, %655 : vector<8x128xf32>
    %657 = arith.negf %656 : vector<8x128xf32>
    %658 = math.exp %657 : vector<8x128xf32>
    %cst_147 = arith.constant 1.000000e+00 : f32
    %659 = vector.broadcast %cst_147 : f32 to vector<8x128xf32>
    %660 = arith.addf %659, %658 : vector<8x128xf32>
    %661 = arith.divf %659, %660 : vector<8x128xf32>
    %662 = vector.extract_strided_slice %661 {offsets = [0, 0], sizes = [8, 32], strides = [1, 1]} : vector<8x128xf32> to vector<8x32xf32>
    %663 = vector.extract_strided_slice %661 {offsets = [0, 32], sizes = [8, 32], strides = [1, 1]} : vector<8x128xf32> to vector<8x32xf32>
    %664 = vector.extract_strided_slice %661 {offsets = [0, 64], sizes = [8, 32], strides = [1, 1]} : vector<8x128xf32> to vector<8x32xf32>
    %cst_148 = arith.constant 2.000000e+00 : f32
    %665 = vector.broadcast %cst_148 : f32 to vector<8x32xf32>
    %666 = arith.mulf %665, %664 : vector<8x32xf32>
    %cst_149 = arith.constant 1.000000e+00 : f32
    %667 = vector.broadcast %cst_149 : f32 to vector<8x32xf32>
    %668 = arith.subf %666, %667 : vector<8x32xf32>
    %669 = vector.extract_strided_slice %661 {offsets = [0, 96], sizes = [8, 32], strides = [1, 1]} : vector<8x128xf32> to vector<8x32xf32>
    %670 = arith.mulf %663, %649 : vector<8x32xf32>
    %671 = arith.mulf %662, %668 : vector<8x32xf32>
    %672 = arith.addf %670, %671 : vector<8x32xf32>
    %673 = math.tanh %672 : vector<8x32xf32>
    %674 = arith.mulf %669, %673 : vector<8x32xf32>
    %675 = vector.broadcast %c22_i32 : i32 to vector<8x32xi32>
    %676 = arith.cmpi sgt, %10, %675 : vector<8x32xi32>
    %677 = arith.select %676, %674, %648 : vector<8x32xi1>, vector<8x32xf32>
    %678 = arith.select %676, %672, %649 : vector<8x32xi1>, vector<8x32xf32>
    %c23_i32 = arith.constant 23 : i32
    %c8_i32_150 = arith.constant 8 : i32
    %679 = arith.muli %c23_i32, %c8_i32_150 : i32
    %680 = tpu.assume_multiple %679, 8 : i32
    %681 = arith.index_cast %680 : i32 to index
    %c0_151 = arith.constant 0 : index
    %682 = vector.load %arg11[%681, %c0_151] : memref<224x128xf32, #tpu.memory_space<vmem>>, vector<8x128xf32>
    %683 = arith.truncf %677 : vector<8x32xf32> to vector<8x32xbf16>
    %cst_152 = arith.constant dense<0.000000e+00> : vector<8x128xf32>
    %684 = tpu.matmul %683, %7, %cst_152 {dimension_numbers = #tpu.dot_dimension_numbers<[1], [0], [0], [1], [0, 0, 1, 1], [], []>} : vector<8x32xbf16>, vector<32x128xbf16>, vector<8x128xf32> -> vector<8x128xf32>
    %685 = arith.addf %682, %684 : vector<8x128xf32>
    %686 = arith.negf %685 : vector<8x128xf32>
    %687 = math.exp %686 : vector<8x128xf32>
    %cst_153 = arith.constant 1.000000e+00 : f32
    %688 = vector.broadcast %cst_153 : f32 to vector<8x128xf32>
    %689 = arith.addf %688, %687 : vector<8x128xf32>
    %690 = arith.divf %688, %689 : vector<8x128xf32>
    %691 = vector.extract_strided_slice %690 {offsets = [0, 0], sizes = [8, 32], strides = [1, 1]} : vector<8x128xf32> to vector<8x32xf32>
    %692 = vector.extract_strided_slice %690 {offsets = [0, 32], sizes = [8, 32], strides = [1, 1]} : vector<8x128xf32> to vector<8x32xf32>
    %693 = vector.extract_strided_slice %690 {offsets = [0, 64], sizes = [8, 32], strides = [1, 1]} : vector<8x128xf32> to vector<8x32xf32>
    %cst_154 = arith.constant 2.000000e+00 : f32
    %694 = vector.broadcast %cst_154 : f32 to vector<8x32xf32>
    %695 = arith.mulf %694, %693 : vector<8x32xf32>
    %cst_155 = arith.constant 1.000000e+00 : f32
    %696 = vector.broadcast %cst_155 : f32 to vector<8x32xf32>
    %697 = arith.subf %695, %696 : vector<8x32xf32>
    %698 = vector.extract_strided_slice %690 {offsets = [0, 96], sizes = [8, 32], strides = [1, 1]} : vector<8x128xf32> to vector<8x32xf32>
    %699 = arith.mulf %692, %678 : vector<8x32xf32>
    %700 = arith.mulf %691, %697 : vector<8x32xf32>
    %701 = arith.addf %699, %700 : vector<8x32xf32>
    %702 = math.tanh %701 : vector<8x32xf32>
    %703 = arith.mulf %698, %702 : vector<8x32xf32>
    %704 = vector.broadcast %c23_i32 : i32 to vector<8x32xi32>
    %705 = arith.cmpi sgt, %10, %704 : vector<8x32xi32>
    %706 = arith.select %705, %703, %677 : vector<8x32xi1>, vector<8x32xf32>
    %707 = arith.select %705, %701, %678 : vector<8x32xi1>, vector<8x32xf32>
    %c24_i32 = arith.constant 24 : i32
    %c8_i32_156 = arith.constant 8 : i32
    %708 = arith.muli %c24_i32, %c8_i32_156 : i32
    %709 = tpu.assume_multiple %708, 8 : i32
    %710 = arith.index_cast %709 : i32 to index
    %c0_157 = arith.constant 0 : index
    %711 = vector.load %arg11[%710, %c0_157] : memref<224x128xf32, #tpu.memory_space<vmem>>, vector<8x128xf32>
    %712 = arith.truncf %706 : vector<8x32xf32> to vector<8x32xbf16>
    %cst_158 = arith.constant dense<0.000000e+00> : vector<8x128xf32>
    %713 = tpu.matmul %712, %7, %cst_158 {dimension_numbers = #tpu.dot_dimension_numbers<[1], [0], [0], [1], [0, 0, 1, 1], [], []>} : vector<8x32xbf16>, vector<32x128xbf16>, vector<8x128xf32> -> vector<8x128xf32>
    %714 = arith.addf %711, %713 : vector<8x128xf32>
    %715 = arith.negf %714 : vector<8x128xf32>
    %716 = math.exp %715 : vector<8x128xf32>
    %cst_159 = arith.constant 1.000000e+00 : f32
    %717 = vector.broadcast %cst_159 : f32 to vector<8x128xf32>
    %718 = arith.addf %717, %716 : vector<8x128xf32>
    %719 = arith.divf %717, %718 : vector<8x128xf32>
    %720 = vector.extract_strided_slice %719 {offsets = [0, 0], sizes = [8, 32], strides = [1, 1]} : vector<8x128xf32> to vector<8x32xf32>
    %721 = vector.extract_strided_slice %719 {offsets = [0, 32], sizes = [8, 32], strides = [1, 1]} : vector<8x128xf32> to vector<8x32xf32>
    %722 = vector.extract_strided_slice %719 {offsets = [0, 64], sizes = [8, 32], strides = [1, 1]} : vector<8x128xf32> to vector<8x32xf32>
    %cst_160 = arith.constant 2.000000e+00 : f32
    %723 = vector.broadcast %cst_160 : f32 to vector<8x32xf32>
    %724 = arith.mulf %723, %722 : vector<8x32xf32>
    %cst_161 = arith.constant 1.000000e+00 : f32
    %725 = vector.broadcast %cst_161 : f32 to vector<8x32xf32>
    %726 = arith.subf %724, %725 : vector<8x32xf32>
    %727 = vector.extract_strided_slice %719 {offsets = [0, 96], sizes = [8, 32], strides = [1, 1]} : vector<8x128xf32> to vector<8x32xf32>
    %728 = arith.mulf %721, %707 : vector<8x32xf32>
    %729 = arith.mulf %720, %726 : vector<8x32xf32>
    %730 = arith.addf %728, %729 : vector<8x32xf32>
    %731 = math.tanh %730 : vector<8x32xf32>
    %732 = arith.mulf %727, %731 : vector<8x32xf32>
    %733 = vector.broadcast %c24_i32 : i32 to vector<8x32xi32>
    %734 = arith.cmpi sgt, %10, %733 : vector<8x32xi32>
    %735 = arith.select %734, %732, %706 : vector<8x32xi1>, vector<8x32xf32>
    %736 = arith.select %734, %730, %707 : vector<8x32xi1>, vector<8x32xf32>
    %c25_i32 = arith.constant 25 : i32
    %c8_i32_162 = arith.constant 8 : i32
    %737 = arith.muli %c25_i32, %c8_i32_162 : i32
    %738 = tpu.assume_multiple %737, 8 : i32
    %739 = arith.index_cast %738 : i32 to index
    %c0_163 = arith.constant 0 : index
    %740 = vector.load %arg11[%739, %c0_163] : memref<224x128xf32, #tpu.memory_space<vmem>>, vector<8x128xf32>
    %741 = arith.truncf %735 : vector<8x32xf32> to vector<8x32xbf16>
    %cst_164 = arith.constant dense<0.000000e+00> : vector<8x128xf32>
    %742 = tpu.matmul %741, %7, %cst_164 {dimension_numbers = #tpu.dot_dimension_numbers<[1], [0], [0], [1], [0, 0, 1, 1], [], []>} : vector<8x32xbf16>, vector<32x128xbf16>, vector<8x128xf32> -> vector<8x128xf32>
    %743 = arith.addf %740, %742 : vector<8x128xf32>
    %744 = arith.negf %743 : vector<8x128xf32>
    %745 = math.exp %744 : vector<8x128xf32>
    %cst_165 = arith.constant 1.000000e+00 : f32
    %746 = vector.broadcast %cst_165 : f32 to vector<8x128xf32>
    %747 = arith.addf %746, %745 : vector<8x128xf32>
    %748 = arith.divf %746, %747 : vector<8x128xf32>
    %749 = vector.extract_strided_slice %748 {offsets = [0, 0], sizes = [8, 32], strides = [1, 1]} : vector<8x128xf32> to vector<8x32xf32>
    %750 = vector.extract_strided_slice %748 {offsets = [0, 32], sizes = [8, 32], strides = [1, 1]} : vector<8x128xf32> to vector<8x32xf32>
    %751 = vector.extract_strided_slice %748 {offsets = [0, 64], sizes = [8, 32], strides = [1, 1]} : vector<8x128xf32> to vector<8x32xf32>
    %cst_166 = arith.constant 2.000000e+00 : f32
    %752 = vector.broadcast %cst_166 : f32 to vector<8x32xf32>
    %753 = arith.mulf %752, %751 : vector<8x32xf32>
    %cst_167 = arith.constant 1.000000e+00 : f32
    %754 = vector.broadcast %cst_167 : f32 to vector<8x32xf32>
    %755 = arith.subf %753, %754 : vector<8x32xf32>
    %756 = vector.extract_strided_slice %748 {offsets = [0, 96], sizes = [8, 32], strides = [1, 1]} : vector<8x128xf32> to vector<8x32xf32>
    %757 = arith.mulf %750, %736 : vector<8x32xf32>
    %758 = arith.mulf %749, %755 : vector<8x32xf32>
    %759 = arith.addf %757, %758 : vector<8x32xf32>
    %760 = math.tanh %759 : vector<8x32xf32>
    %761 = arith.mulf %756, %760 : vector<8x32xf32>
    %762 = vector.broadcast %c25_i32 : i32 to vector<8x32xi32>
    %763 = arith.cmpi sgt, %10, %762 : vector<8x32xi32>
    %764 = arith.select %763, %761, %735 : vector<8x32xi1>, vector<8x32xf32>
    %765 = arith.select %763, %759, %736 : vector<8x32xi1>, vector<8x32xf32>
    %c26_i32 = arith.constant 26 : i32
    %c8_i32_168 = arith.constant 8 : i32
    %766 = arith.muli %c26_i32, %c8_i32_168 : i32
    %767 = tpu.assume_multiple %766, 8 : i32
    %768 = arith.index_cast %767 : i32 to index
    %c0_169 = arith.constant 0 : index
    %769 = vector.load %arg11[%768, %c0_169] : memref<224x128xf32, #tpu.memory_space<vmem>>, vector<8x128xf32>
    %770 = arith.truncf %764 : vector<8x32xf32> to vector<8x32xbf16>
    %cst_170 = arith.constant dense<0.000000e+00> : vector<8x128xf32>
    %771 = tpu.matmul %770, %7, %cst_170 {dimension_numbers = #tpu.dot_dimension_numbers<[1], [0], [0], [1], [0, 0, 1, 1], [], []>} : vector<8x32xbf16>, vector<32x128xbf16>, vector<8x128xf32> -> vector<8x128xf32>
    %772 = arith.addf %769, %771 : vector<8x128xf32>
    %773 = arith.negf %772 : vector<8x128xf32>
    %774 = math.exp %773 : vector<8x128xf32>
    %cst_171 = arith.constant 1.000000e+00 : f32
    %775 = vector.broadcast %cst_171 : f32 to vector<8x128xf32>
    %776 = arith.addf %775, %774 : vector<8x128xf32>
    %777 = arith.divf %775, %776 : vector<8x128xf32>
    %778 = vector.extract_strided_slice %777 {offsets = [0, 0], sizes = [8, 32], strides = [1, 1]} : vector<8x128xf32> to vector<8x32xf32>
    %779 = vector.extract_strided_slice %777 {offsets = [0, 32], sizes = [8, 32], strides = [1, 1]} : vector<8x128xf32> to vector<8x32xf32>
    %780 = vector.extract_strided_slice %777 {offsets = [0, 64], sizes = [8, 32], strides = [1, 1]} : vector<8x128xf32> to vector<8x32xf32>
    %cst_172 = arith.constant 2.000000e+00 : f32
    %781 = vector.broadcast %cst_172 : f32 to vector<8x32xf32>
    %782 = arith.mulf %781, %780 : vector<8x32xf32>
    %cst_173 = arith.constant 1.000000e+00 : f32
    %783 = vector.broadcast %cst_173 : f32 to vector<8x32xf32>
    %784 = arith.subf %782, %783 : vector<8x32xf32>
    %785 = vector.extract_strided_slice %777 {offsets = [0, 96], sizes = [8, 32], strides = [1, 1]} : vector<8x128xf32> to vector<8x32xf32>
    %786 = arith.mulf %779, %765 : vector<8x32xf32>
    %787 = arith.mulf %778, %784 : vector<8x32xf32>
    %788 = arith.addf %786, %787 : vector<8x32xf32>
    %789 = math.tanh %788 : vector<8x32xf32>
    %790 = arith.mulf %785, %789 : vector<8x32xf32>
    %791 = vector.broadcast %c26_i32 : i32 to vector<8x32xi32>
    %792 = arith.cmpi sgt, %10, %791 : vector<8x32xi32>
    %793 = arith.select %792, %790, %764 : vector<8x32xi1>, vector<8x32xf32>
    %794 = arith.select %792, %788, %765 : vector<8x32xi1>, vector<8x32xf32>
    %c27_i32 = arith.constant 27 : i32
    %c8_i32_174 = arith.constant 8 : i32
    %795 = arith.muli %c27_i32, %c8_i32_174 : i32
    %796 = tpu.assume_multiple %795, 8 : i32
    %797 = arith.index_cast %796 : i32 to index
    %c0_175 = arith.constant 0 : index
    %798 = vector.load %arg11[%797, %c0_175] : memref<224x128xf32, #tpu.memory_space<vmem>>, vector<8x128xf32>
    %799 = arith.truncf %793 : vector<8x32xf32> to vector<8x32xbf16>
    %cst_176 = arith.constant dense<0.000000e+00> : vector<8x128xf32>
    %800 = tpu.matmul %799, %7, %cst_176 {dimension_numbers = #tpu.dot_dimension_numbers<[1], [0], [0], [1], [0, 0, 1, 1], [], []>} : vector<8x32xbf16>, vector<32x128xbf16>, vector<8x128xf32> -> vector<8x128xf32>
    %801 = arith.addf %798, %800 : vector<8x128xf32>
    %802 = arith.negf %801 : vector<8x128xf32>
    %803 = math.exp %802 : vector<8x128xf32>
    %cst_177 = arith.constant 1.000000e+00 : f32
    %804 = vector.broadcast %cst_177 : f32 to vector<8x128xf32>
    %805 = arith.addf %804, %803 : vector<8x128xf32>
    %806 = arith.divf %804, %805 : vector<8x128xf32>
    %807 = vector.extract_strided_slice %806 {offsets = [0, 0], sizes = [8, 32], strides = [1, 1]} : vector<8x128xf32> to vector<8x32xf32>
    %808 = vector.extract_strided_slice %806 {offsets = [0, 32], sizes = [8, 32], strides = [1, 1]} : vector<8x128xf32> to vector<8x32xf32>
    %809 = vector.extract_strided_slice %806 {offsets = [0, 64], sizes = [8, 32], strides = [1, 1]} : vector<8x128xf32> to vector<8x32xf32>
    %cst_178 = arith.constant 2.000000e+00 : f32
    %810 = vector.broadcast %cst_178 : f32 to vector<8x32xf32>
    %811 = arith.mulf %810, %809 : vector<8x32xf32>
    %cst_179 = arith.constant 1.000000e+00 : f32
    %812 = vector.broadcast %cst_179 : f32 to vector<8x32xf32>
    %813 = arith.subf %811, %812 : vector<8x32xf32>
    %814 = vector.extract_strided_slice %806 {offsets = [0, 96], sizes = [8, 32], strides = [1, 1]} : vector<8x128xf32> to vector<8x32xf32>
    %815 = arith.mulf %808, %794 : vector<8x32xf32>
    %816 = arith.mulf %807, %813 : vector<8x32xf32>
    %817 = arith.addf %815, %816 : vector<8x32xf32>
    %818 = math.tanh %817 : vector<8x32xf32>
    %819 = arith.mulf %814, %818 : vector<8x32xf32>
    %820 = vector.broadcast %c27_i32 : i32 to vector<8x32xi32>
    %821 = arith.cmpi sgt, %10, %820 : vector<8x32xi32>
    %822 = arith.select %821, %819, %793 : vector<8x32xi1>, vector<8x32xf32>
    %823 = arith.select %821, %817, %794 : vector<8x32xi1>, vector<8x32xf32>
    %c28_i32 = arith.constant 28 : i32
    %c0_180 = arith.constant 0 : index
    %c0_181 = arith.constant 0 : index
    %824 = vector.load %arg9[%c0_180, %c0_181] : memref<8x32xf32, #tpu.memory_space<vmem>>, vector<8x32xf32>
    tpu.vector_store %arg9[%c0_180, %c0_181], %822 {strides = array<i32>} : memref<8x32xf32, #tpu.memory_space<vmem>>, vector<8x32xf32>,
    %c0_182 = arith.constant 0 : index
    %c0_183 = arith.constant 0 : index
    %825 = vector.load %arg10[%c0_182, %c0_183] : memref<8x32xf32, #tpu.memory_space<vmem>>, vector<8x32xf32>
    tpu.vector_store %arg10[%c0_182, %c0_183], %823 {strides = array<i32>} : memref<8x32xf32, #tpu.memory_space<vmem>>, vector<8x32xf32>,
    %c0_184 = arith.constant 0 : index
    %826 = memref.load %arg0[%c0_184] : memref<1xi32, #tpu.memory_space<smem>>
    %827 = vector.broadcast %826 : i32 to vector<8x32xi32>
    %828 = arith.cmpi eq, %10, %827 : vector<8x32xi32>
    %cst_185 = arith.constant 0.000000e+00 : f32
    %829 = vector.broadcast %cst_185 : f32 to vector<8x32xf32>
    %830 = arith.select %828, %822, %829 : vector<8x32xi1>, vector<8x32xf32>
    %c0_186 = arith.constant 0 : index
    %c0_187 = arith.constant 0 : index
    %831 = vector.load %arg6[%c0_186, %c0_187] : memref<32x10xf32, #tpu.memory_space<vmem>>, vector<32x10xf32>
    %cst_188 = arith.constant dense<0.000000e+00> : vector<8x10xf32>
    %832 = tpu.matmul %830, %831, %cst_188 {dimension_numbers = #tpu.dot_dimension_numbers<[1], [0], [0], [1], [0, 0, 1, 1], [], []>} : vector<8x32xf32>, vector<32x10xf32>, vector<8x10xf32> -> vector<8x10xf32>
    %c0_189 = arith.constant 0 : index
    %c0_190 = arith.constant 0 : index
    %833 = vector.load %arg7[%c0_189, %c0_190] : memref<1x10xf32, #tpu.memory_space<vmem>>, vector<1x10xf32>
    %834 = vector.broadcast %833 : vector<1x10xf32> to vector<8x10xf32>
    %835 = arith.addf %832, %834 : vector<8x10xf32>
    %c0_191 = arith.constant 0 : index
    %c0_192 = arith.constant 0 : index
    %836 = vector.load %arg8[%c0_191, %c0_192] : memref<8x10xf32, #tpu.memory_space<vmem>>, vector<8x10xf32>
    tpu.vector_store %arg8[%c0_191, %c0_192], %835 {strides = array<i32>} : memref<8x10xf32, #tpu.memory_space<vmem>>, vector<8x10xf32>,
    return
  }
}

</mosaic_0001>

<bundles_post_ra>
// kernel: classifier_lstm_forward.1
= control target key start
LH: loop header
LB: loop body
LE: loop exit
PB: predicated region body
PF: predicated region fallthrough
CT: control target
= control target key end

     0   :  { %17 = vsyncpa [#allocation5], 0  ;;  %vm199_vm0 = vcmask 1045504   ;;  %v3477_v0 = vmov 0.0   ;;  %vm3478_vm1 = vmmov 0   ;;  %vm156_vm2 = vcmask 228352   ;;  %s4230_s0 = inlined_call_operand.<no memory space> [shape: s32[1], index: 0, kind: input, shape index: {}]   ;;  %s4231_s1 = inlined_call_operand.vmem [shape: s32[8,1], index: 1, kind: input, shape index: {}]   ;;  %s4232_s2 = inlined_call_operand.vmem [shape: bf16[224,28], index: 2, kind: input, shape index: {}]   ;;  %s4233_s3 = inlined_call_operand.vmem [shape: bf16[28,128], index: 3, kind: input, shape index: {}]   ;;  %s4234_s4 = inlined_call_operand.vmem [shape: bf16[32,128], index: 4, kind: input, shape index: {}]   ;;  %s4235_s5 = inlined_call_operand.vmem [shape: f32[1,128], index: 5, kind: input, shape index: {}]   ;;  %s4236_s6 = inlined_call_operand.vmem [shape: f32[32,10], index: 6, kind: input, shape index: {}]   ;;  %s4237_s7 = inlined_call_operand.vmem [shape: f32[1,10], index: 7, kind: input, shape index: {}]   ;;  %s4238_s8 = inlined_call_operand.hbm [shape: f32[8,10], index: 8, kind: output, shape index: {0}]   ;;  %s4239_s9 = inlined_call_operand.hbm [shape: f32[8,32], index: 9, kind: output, shape index: {1}]   ;;  %s4240_s10 = inlined_call_operand.hbm [shape: f32[8,32], index: 10, kind: output, shape index: {2}]  }
   0x1   :  { %2974 = vmatprep.subr.bf16.mxu1 %v3477_v0  ;;  %v3221_v1 = vld [vmem:[%s4233_s3 + $0x8] sm:$0x3f]   ;;  %v3223_v4 = vld [vmem:[%s4233_s3] sm:$0xff]   ;;  %2978 = vmatprep.mubr.msk.bf16.mxu1 %vm3478_vm1, %v3477_v0  ;;  %v3479_v8 = vmov 0  }
   0x2   :  { %v3548_v2 = vld [vmem:[%s4234_s4 + $0x8] sm:$0xff]   ;;  %3209 = vmatprep.subr.msk.bf16.mxu0 %vm199_vm0, %v3221_v1  ;;  %v201_v3 = vsel %vm199_vm0, %v3221_v1, 0  ;;  %v3559_v5 = vld [vmem:[%s4234_s4] sm:$0xff]   ;;  %3219 = vset.pattern.permute.xlu1 %v3479_v8 }
   0x3   :  { %2975 = vmatpush3.bf16.msra.mxu1 %v3548_v2  ;;  %2943 = vmatpush3.bf16.msra.mxu0 %v201_v3  ;;  %v3225_v6 = vld [vmem:[%s4232_s2] sm:$0xff]   ;;  %v3226_v7 = vld [vmem:[%s4232_s2 + $0x8] sm:$0xff]  }
   0x4   :  { %2976 = vmatprep.subr.bf16.mxu1 %v3477_v0  ;;  %2944 = vmatprep.subr.bf16.mxu0 %v3223_v4 }
   0x5   :  { %3220 = vset.pattern.permute.xlu0 %v3479_v8  ;;  %2946 = vmatprep.mubr.msk.bf16.mxu0 %vm156_vm2, %v3225_v6 }
   0x7   :  { %2977 = vmatpush3.bf16.msra.mxu1 %v3559_v5  ;;  %2945 = vmatpush3.bf16.msra.mxu0 %v3223_v4 }
   0x8   :  { %2982 = vmatprep.subr.bf16.mxu1 %v3477_v0  ;;  %3030 = vmatprep.subr.bf16.mxu0 %v3477_v0 }
   0xa   :  { %2979 = vmatmul.mubr.bf16.vlgmr.msra.gmra.mxu1 %v3479_v8  ;;  %2947 = vmatmul.mubr.msk.bf16.vlgmr.msra.gmra.mxu0 %vm156_vm2, %v3226_v7 }
   0xb   :  { %2983 = vmatpush3.bf16.msra.mxu1 %v3548_v2  ;;  %2986 = vmatprep.mubr.msk.bf16.mxu1 %vm3478_vm1, %v3477_v0 }
   0xc   :  { %2984 = vmatprep.subr.bf16.mxu1 %v3477_v0  ;;  %3031 = vmatpush3.bf16.msra.mxu0 %v3548_v2 }
   0xd   :  { %3032 = vmatprep.subr.bf16.mxu0 %v3477_v0 }
   0xe   :  { %18 = vsyncpa [#allocation7], 0  ;;  %v380_v9 = vld [vmem:[%s4231_s1] sm:$0xff]  ;;  %s3480_s1 = smov 64   ;;  %s3481_s28 = smov 32   ;;  %vm397_vm4 = vcmask 261120  }
   0xf   :  { %2985 = vmatpush3.bf16.msra.mxu1 %v3559_v5  ;;  %382 = vperm.xlu1 %3219, %v380_v9   ;;  %v3591_v12 = vld [vmem:[%s4235_s5] ss:$0 sm:$0xff] }
  0x10   :  { %2990 = vmatprep.subr.bf16.mxu1 %v3477_v0  ;;  %3033 = vmatpush3.bf16.msra.mxu0 %v3559_v5 }
  0x11   :  { %3046 = vmatprep.subr.bf16.mxu0 %v3477_v0 }
  0x8a   :  { %v3597_v31 = vpop.permute.xlu1 %382 }
  0x8b   :  { %vm467_vm3 = vcmp.gt.s32.totalorder %v3597_v31, 0  ;;  %vm545_vm5 = vcmp.gt.s32.totalorder %v3597_v31, 1  ;;  %vm623_vm6 = vcmp.gt.s32.totalorder %v3597_v31, 2  ;;  %vm701_vm7 = vcmp.gt.s32.totalorder %v3597_v31, 3 }
  0x8c   :  { %vm779_vm8 = vcmp.gt.s32.totalorder %v3597_v31, 4  ;;  %vm857_vm9 = vcmp.gt.s32.totalorder %v3597_v31, 5  ;;  %vm935_vm10 = vcmp.gt.s32.totalorder %v3597_v31, 6  ;;  %vm1013_vm11 = vcmp.gt.s32.totalorder %v3597_v31, 7 }
  0x8d   :  { %vm1091_vm12 = vcmp.gt.s32.totalorder %v3597_v31, 8  ;;  %vm1169_vm13 = vcmp.gt.s32.totalorder %v3597_v31, 9  ;;  %vm1247_vm14 = vcmp.gt.s32.totalorder %v3597_v31, 10  ;;  %vm1325_vm15 = vcmp.gt.s32.totalorder %v3597_v31, 11 }
  0x8e   :  { %vm1403_vm0 = vcmp.gt.s32.totalorder %v3597_v31, 12 }
  0xca   :  { %v435_v10 = vpop.f32.mrf.mxu1  ;;  %v3586_v11 = vpop.f32.mrf.mxu0 }
  0xcb   :  { %v246_v63 = vadd.f32 %v3586_v11, %v3591_v12 }
  0xcc   :  { %v2980_v13 = vpop.f32.mrf.mxu1  ;;  %v237_v14 = vpop.f32.mrf.mxu0 }
  0xcd   :  { %v238_v15 = vadd.f32 %v3591_v12, %v237_v14 }
  0xce   :  { %v438_v16 = vpop.f32.mrf.mxu1  ;;  %v3610_v37 = vpop.f32.mrf.mxu0 }
  0xcf   :  { %v441_v17 = vadd.f32 %v435_v10, %v238_v15 }
  0xd0   :  { %v2981_v18 = vpop.f32.mrf.mxu1  ;;  %v240_v38 = vpop.f32.mrf.mxu0 }
  0xd1   :  { %v2752_v19 = vmul.f32 -1.442695, %v441_v17  ;;  %v241_v39 = vadd.f32 %v3591_v12, %v240_v38 }
  0xd3   :  { %3239 = vpow2.f32 %v2752_v19 }
  0xe0   :  { %v3240_v20 = vpop.eup %3239 }
  0xe1   :  { %v445_v21 = vadd.f32 1.0, %v3240_v20 }
  0xe3   :  { %3241 = vrcp.f32 %v445_v21 }
  0xf0   :  { %v3242_v22 = vpop.eup %3241 }
  0xf1   :  { %v448_v23 = vmul.f32 2.0, %v3242_v22  ;;  %v450_v27 = vmul.f32 0.0, %v3242_v22 }
  0xf3   :  { %v2753_v24 = vadd.f32 -1.0, %v448_v23 }
  0xf5   :  { %452 = vrot.lane.b32.xlu0 %v2753_v24, %s3480_s1 }
 0x167   :  { %v453_v25 = vpop.permute.xlu0 %452 }
 0x168   :  { %v455_v26 = vmul.f32 %v3242_v22, %v453_v25 }
 0x16a   :  { %457 = vrot.lane.b32.xlu0 %v455_v26, %s3481_s28 }
 0x1dc   :  { %v458_v28 = vpop.permute.xlu0 %457 }
 0x1dd   :  { %v460_v29 = vadd.f32 %v458_v28, %v450_v27  ;;  %v249_v27 = vadd.f32 %v3610_v37, %v3591_v12 }
 0x1df   :  { %3243 = vtanh.f32 %v460_v29  ;;  %v469_v53 = vsel %vm467_vm3, %v460_v29, 0.0 }
 0x1ec   :  { %v3244_v30 = vpop.eup %3243 }
 0x1ed   :  { %463 = vrot.lane.b32.xlu1 %v3244_v30, %s3480_s1 }
 0x25f   :  { %v464_v32 = vpop.permute.xlu1 %463 }
 0x260   :  { %v466_v33 = vmul.f32 %v3242_v22, %v464_v32 }
 0x262   :  { %v468_v34 = vsel %vm467_vm3, %v466_v33, 0.0  ;;  %vm1559_vm3 = vcmp.gt.s32.totalorder %v3597_v31, 14 }
 0x263   :  { %v472_v35 = vpack.c.bf16 %v468_v34, %v468_v34 }
 0x265   :  { %474 = vrot.lane.b32.xlu0 %v472_v35, %s3481_s28 }
 0x2d7   :  { %v475_v36 = vpop.permute.xlu0 %474 }
 0x2d8   :  { %2987 = vmatmul.mubr.msk.bf16.vlgmr.msra.gmra.mxu1 %vm397_vm4, %v475_v36 }
 0x2d9   :  { %2991 = vmatpush3.bf16.msra.mxu1 %v3548_v2  ;;  %2994 = vmatprep.mubr.msk.bf16.mxu1 %vm3478_vm1, %v3477_v0 }
 0x2da   :  { %2992 = vmatprep.subr.bf16.mxu1 %v3477_v0 }
 0x2dd   :  { %2993 = vmatpush3.bf16.msra.mxu1 %v3559_v5 }
 0x2de   :  { %2998 = vmatprep.subr.bf16.mxu1 %v3477_v0 }
 0x398   :  { %v513_v40 = vpop.f32.mrf.mxu1 }
 0x399   :  { %v519_v41 = vadd.f32 %v513_v40, %v241_v39 }
 0x39a   :  { %v2988_v42 = vpop.f32.mrf.mxu1 }
 0x39b   :  { %v2755_v43 = vmul.f32 -1.442695, %v519_v41 }
 0x39c   :  { %v516_v44 = vpop.f32.mrf.mxu1 }
 0x39d   :  { %3245 = vpow2.f32 %v2755_v43 }
 0x39e   :  { %v2989_v45 = vpop.f32.mrf.mxu1 }
 0x3aa   :  { %v3246_v46 = vpop.eup %3245 }
 0x3ab   :  { %v523_v47 = vadd.f32 1.0, %v3246_v46  ;;  %v3227_v46 = vld [vmem:[%s4232_s2 + $0x10] sm:$0xff]  }
 0x3ac   :  { %2950 = vmatprep.mubr.msk.bf16.mxu0 %vm156_vm2, %v3227_v46 }
 0x3ad   :  { %3247 = vrcp.f32 %v523_v47  ;;  %v3228_v47 = vld [vmem:[%s4232_s2 + $0x18] sm:$0xff]  }
 0x3ae   :  { %2951 = vmatmul.mubr.msk.bf16.gmra.mxu0 %vm156_vm2, %v3228_v47 }
 0x3ba   :  { %v3248_v48 = vpop.eup %3247 }
 0x3bb   :  { %v526_v49 = vmul.f32 2.0, %v3248_v48  ;;  %v528_v54 = vmul.f32 %v3248_v48, %v469_v53 }
 0x3bd   :  { %v2756_v50 = vadd.f32 -1.0, %v526_v49 }
 0x3bf   :  { %530 = vrot.lane.b32.xlu1 %v2756_v50, %s3480_s1 }
 0x431   :  { %v531_v51 = vpop.permute.xlu1 %530 }
 0x432   :  { %v533_v52 = vmul.f32 %v3248_v48, %v531_v51 }
 0x434   :  { %535 = vrot.lane.b32.xlu0 %v533_v52, %s3481_s28 }
 0x4a6   :  { %v536_v55 = vpop.permute.xlu0 %535 }
 0x4a7   :  { %v538_v56 = vadd.f32 %v536_v55, %v528_v54  ;;  %v3673_v54 = vpop.f32.mrf.mxu0 }
 0x4a8   :  { %v262_v47 = vadd.f32 %v3673_v54, %v3591_v12 }
 0x4a9   :  { %3249 = vtanh.f32 %v538_v56  ;;  %v547_v11 = vsel %vm545_vm5, %v538_v56, %v469_v53  ;;  %v253_v55 = vpop.f32.mrf.mxu0 }
 0x4aa   :  { %v254_v56 = vadd.f32 %v3591_v12, %v253_v55 }
 0x4b6   :  { %v3250_v57 = vpop.eup %3249 }
 0x4b7   :  { %541 = vrot.lane.b32.xlu1 %v3250_v57, %s3480_s1 }
 0x529   :  { %v542_v58 = vpop.permute.xlu1 %541 }
 0x52a   :  { %v544_v59 = vmul.f32 %v3248_v48, %v542_v58 }
 0x52c   :  { %v546_v60 = vsel %vm545_vm5, %v544_v59, %v468_v34  ;;  %vm1637_vm5 = vcmp.gt.s32.totalorder %v3597_v31, 15 }
 0x52d   :  { %v550_v61 = vpack.c.bf16 %v546_v60, %v546_v60 }
 0x52f   :  { %552 = vrot.lane.b32.xlu0 %v550_v61, %s3481_s28 }
 0x5a1   :  { %v553_v62 = vpop.permute.xlu0 %552 }
 0x5a2   :  { %2995 = vmatmul.mubr.msk.bf16.vlgmr.msra.gmra.mxu1 %vm397_vm4, %v553_v62 }
 0x5a3   :  { %2999 = vmatpush3.bf16.msra.mxu1 %v3548_v2  ;;  %3002 = vmatprep.mubr.msk.bf16.mxu1 %vm3478_vm1, %v3477_v0 }
 0x5a4   :  { %3000 = vmatprep.subr.bf16.mxu1 %v3477_v0 }
 0x5a7   :  { %3001 = vmatpush3.bf16.msra.mxu1 %v3559_v5 }
 0x5a8   :  { %3006 = vmatprep.subr.bf16.mxu1 %v3477_v0 }
 0x662   :  { %v591_v1 = vpop.f32.mrf.mxu1 }
 0x663   :  { %v597_v3 = vadd.f32 %v591_v1, %v246_v63 }
 0x664   :  { %v2996_v4 = vpop.f32.mrf.mxu1 }
 0x665   :  { %v2758_v6 = vmul.f32 -1.442695, %v597_v3 }
 0x666   :  { %v594_v7 = vpop.f32.mrf.mxu1 }
 0x667   :  { %3251 = vpow2.f32 %v2758_v6 }
 0x668   :  { %v2997_v8 = vpop.f32.mrf.mxu1 }
 0x674   :  { %v3252_v9 = vpop.eup %3251 }
 0x675   :  { %v601_v10 = vadd.f32 1.0, %v3252_v9 }
 0x677   :  { %3253 = vrcp.f32 %v601_v10 }
 0x684   :  { %v3254_v13 = vpop.eup %3253 }
 0x685   :  { %v604_v14 = vmul.f32 2.0, %v3254_v13  ;;  %v606_v18 = vmul.f32 %v3254_v13, %v547_v11 }
 0x687   :  { %v2759_v15 = vadd.f32 -1.0, %v604_v14 }
 0x689   :  { %608 = vrot.lane.b32.xlu1 %v2759_v15, %s3480_s1 }
 0x6fb   :  { %v609_v16 = vpop.permute.xlu1 %608 }
 0x6fc   :  { %v611_v17 = vmul.f32 %v3254_v13, %v609_v16 }
 0x6fe   :  { %613 = vrot.lane.b32.xlu0 %v611_v17, %s3481_s28 }
 0x770   :  { %v614_v19 = vpop.permute.xlu0 %613 }
 0x771   :  { %v616_v20 = vadd.f32 %v614_v19, %v606_v18 }
 0x773   :  { %3255 = vtanh.f32 %v616_v20  ;;  %v625_v37 = vsel %vm623_vm6, %v616_v20, %v547_v11  ;;  %v3692_v20 = vpop.f32.mrf.mxu0 }
 0x780   :  { %v3256_v21 = vpop.eup %3255 }
 0x781   :  { %619 = vrot.lane.b32.xlu1 %v3256_v21, %s3480_s1  ;;  %v256_v21 = vpop.f32.mrf.mxu0 }
 0x7f3   :  { %v620_v22 = vpop.permute.xlu1 %619 }
 0x7f4   :  { %v622_v23 = vmul.f32 %v3254_v13, %v620_v22  ;;  %v257_v22 = vadd.f32 %v3591_v12, %v256_v21 }
 0x7f6   :  { %v624_v24 = vsel %vm623_vm6, %v622_v23, %v546_v60  ;;  %vm1715_vm6 = vcmp.gt.s32.totalorder %v3597_v31, 16 }
 0x7f7   :  { %v628_v25 = vpack.c.bf16 %v624_v24, %v624_v24 }
 0x7f9   :  { %630 = vrot.lane.b32.xlu0 %v628_v25, %s3481_s28 }
 0x86b   :  { %v631_v26 = vpop.permute.xlu0 %630 }
 0x86c   :  { %3003 = vmatmul.mubr.msk.bf16.vlgmr.msra.gmra.mxu1 %vm397_vm4, %v631_v26 }
 0x86d   :  { %3007 = vmatpush3.bf16.msra.mxu1 %v3548_v2  ;;  %3010 = vmatprep.mubr.msk.bf16.mxu1 %vm3478_vm1, %v3477_v0 }
 0x86e   :  { %3008 = vmatprep.subr.bf16.mxu1 %v3477_v0 }
 0x871   :  { %3009 = vmatpush3.bf16.msra.mxu1 %v3559_v5 }
 0x872   :  { %3014 = vmatprep.subr.bf16.mxu1 %v3477_v0 }
 0x92c   :  { %v669_v28 = vpop.f32.mrf.mxu1 }
 0x92d   :  { %v675_v29 = vadd.f32 %v669_v28, %v249_v27 }
 0x92e   :  { %v3004_v30 = vpop.f32.mrf.mxu1 }
 0x92f   :  { %v2761_v32 = vmul.f32 -1.442695, %v675_v29 }
 0x930   :  { %v672_v33 = vpop.f32.mrf.mxu1 }
 0x931   :  { %3257 = vpow2.f32 %v2761_v32 }
 0x932   :  { %v3005_v34 = vpop.f32.mrf.mxu1 }
 0x93e   :  { %v3258_v35 = vpop.eup %3257 }
 0x93f   :  { %v679_v36 = vadd.f32 1.0, %v3258_v35 }
 0x941   :  { %3259 = vrcp.f32 %v679_v36 }
 0x94e   :  { %v3260_v38 = vpop.eup %3259 }
 0x94f   :  { %v682_v39 = vmul.f32 2.0, %v3260_v38  ;;  %v684_v43 = vmul.f32 %v3260_v38, %v625_v37 }
 0x951   :  { %v2762_v40 = vadd.f32 -1.0, %v682_v39 }
 0x953   :  { %686 = vrot.lane.b32.xlu1 %v2762_v40, %s3480_s1 }
 0x9c5   :  { %v687_v41 = vpop.permute.xlu1 %686 }
 0x9c6   :  { %v689_v42 = vmul.f32 %v3260_v38, %v687_v41 }
 0x9c8   :  { %691 = vrot.lane.b32.xlu0 %v689_v42, %s3481_s28 }
 0xa3a   :  { %v692_v44 = vpop.permute.xlu0 %691 }
 0xa3b   :  { %v694_v45 = vadd.f32 %v692_v44, %v684_v43 }
 0xa3d   :  { %3261 = vtanh.f32 %v694_v45  ;;  %v703_v9 = vsel %vm701_vm7, %v694_v45, %v625_v37 }
 0xa4a   :  { %v3262_v48 = vpop.eup %3261 }
 0xa4b   :  { %697 = vrot.lane.b32.xlu1 %v3262_v48, %s3480_s1 }
 0xabd   :  { %v698_v49 = vpop.permute.xlu1 %697 }
 0xabe   :  { %v700_v50 = vmul.f32 %v3260_v38, %v698_v49 }
 0xac0   :  { %v702_v51 = vsel %vm701_vm7, %v700_v50, %v624_v24  ;;  %vm1793_vm7 = vcmp.gt.s32.totalorder %v3597_v31, 17 }
 0xac1   :  { %v706_v52 = vpack.c.bf16 %v702_v51, %v702_v51 }
 0xac3   :  { %708 = vrot.lane.b32.xlu0 %v706_v52, %s3481_s28 }
 0xb35   :  { %v709_v53 = vpop.permute.xlu0 %708 }
 0xb36   :  { %3011 = vmatmul.mubr.msk.bf16.vlgmr.msra.gmra.mxu1 %vm397_vm4, %v709_v53 }
 0xb37   :  { %3015 = vmatpush3.bf16.msra.mxu1 %v3548_v2  ;;  %3018 = vmatprep.mubr.msk.bf16.mxu1 %vm3478_vm1, %v3477_v0 }
 0xb38   :  { %3016 = vmatprep.subr.bf16.mxu1 %v3477_v0 }
 0xb3b   :  { %3017 = vmatpush3.bf16.msra.mxu1 %v3559_v5 }
 0xb3c   :  { %3022 = vmatprep.subr.bf16.mxu1 %v3477_v0 }
 0xbf6   :  { %v747_v57 = vpop.f32.mrf.mxu1 }
 0xbf7   :  { %v753_v58 = vadd.f32 %v747_v57, %v254_v56 }
 0xbf8   :  { %v3012_v59 = vpop.f32.mrf.mxu1 }
 0xbf9   :  { %v2764_v60 = vmul.f32 -1.442695, %v753_v58 }
 0xbfa   :  { %v750_v61 = vpop.f32.mrf.mxu1 }
 0xbfb   :  { %3263 = vpow2.f32 %v2764_v60 }
 0xbfc   :  { %v3013_v62 = vpop.f32.mrf.mxu1 }
 0xc08   :  { %v3264_v63 = vpop.eup %3263 }
 0xc09   :  { %v757_v1 = vadd.f32 1.0, %v3264_v63 }
 0xc0b   :  { %3265 = vrcp.f32 %v757_v1 }
 0xc18   :  { %v3266_v3 = vpop.eup %3265 }
 0xc19   :  { %v760_v4 = vmul.f32 2.0, %v3266_v3  ;;  %v762_v10 = vmul.f32 %v3266_v3, %v703_v9 }
 0xc1b   :  { %v2765_v6 = vadd.f32 -1.0, %v760_v4  ;;  %v3230_v4 = vld [vmem:[%s4232_s2 + $0x28] sm:$0xff]  }
 0xc1d   :  { %764 = vrot.lane.b32.xlu1 %v2765_v6, %s3480_s1  ;;  %v3231_v6 = vld [vmem:[%s4232_s2 + $0x30] sm:$0xff]  }
 0xc8f   :  { %v765_v7 = vpop.permute.xlu1 %764 }
 0xc90   :  { %v767_v8 = vmul.f32 %v3266_v3, %v765_v7 }
 0xc92   :  { %769 = vrot.lane.b32.xlu0 %v767_v8, %s3481_s28  ;;  %v3232_v8 = vld [vmem:[%s4232_s2 + $0x38] sm:$0xff]  }
 0xd04   :  { %v770_v13 = vpop.permute.xlu0 %769 }
 0xd05   :  { %v772_v14 = vadd.f32 %v770_v13, %v762_v10  ;;  %v3234_v10 = vld [vmem:[%s4232_s2 + $0x48] sm:$0xff]   ;;  %v3235_v13 = vld [vmem:[%s4232_s2 + $0x50] sm:$0xff]  }
 0xd07   :  { %3267 = vtanh.f32 %v772_v14  ;;  %v781_v38 = vsel %vm779_vm8, %v772_v14, %v703_v9  ;;  %v3233_v9 = vld [vmem:[%s4232_s2 + $0x40] sm:$0xff]   ;;  %v3236_v14 = vld [vmem:[%s4232_s2 + $0x58] sm:$0xff]  }
 0xd14   :  { %v3268_v15 = vpop.eup %3267 }
 0xd15   :  { %775 = vrot.lane.b32.xlu1 %v3268_v15, %s3480_s1  ;;  %v3237_v15 = vld [vmem:[%s4232_s2 + $0x60] sm:$0xff]  }
 0xd87   :  { %v776_v16 = vpop.permute.xlu1 %775 }
 0xd88   :  { %v778_v17 = vmul.f32 %v3266_v3, %v776_v16  ;;  %v3229_v3 = vld [vmem:[%s4232_s2 + $0x20] sm:$0xff]   ;;  %v3238_v16 = vld [vmem:[%s4232_s2 + $0x68] sm:$0xff]  }
 0xd89   :  { %2954 = vmatprep.mubr.msk.bf16.mxu0 %vm156_vm2, %v3229_v3 }
 0xd8a   :  { %v780_v11 = vsel %vm779_vm8, %v778_v17, %v702_v51  ;;  %2955 = vmatmul.mubr.msk.bf16.gmra.mxu0 %vm156_vm2, %v3230_v4  ;;  %vm1871_vm8 = vcmp.gt.s32.totalorder %v3597_v31, 18 }
 0xd8b   :  { %v784_v18 = vpack.c.bf16 %v780_v11, %v780_v11  ;;  %2958 = vmatprep.mubr.msk.bf16.mxu0 %vm156_vm2, %v3231_v6 }
 0xd8d   :  { %786 = vrot.lane.b32.xlu0 %v784_v18, %s3481_s28 }
 0xd92   :  { %2959 = vmatmul.mubr.msk.bf16.gmra.mxu0 %vm156_vm2, %v3232_v8 }
 0xd93   :  { %2962 = vmatprep.mubr.msk.bf16.mxu0 %vm156_vm2, %v3233_v9 }
 0xd9a   :  { %2963 = vmatmul.mubr.msk.bf16.gmra.mxu0 %vm156_vm2, %v3234_v10 }
 0xd9b   :  { %2966 = vmatprep.mubr.msk.bf16.mxu0 %vm156_vm2, %v3235_v13 }
 0xda2   :  { %2967 = vmatmul.mubr.msk.bf16.gmra.mxu0 %vm156_vm2, %v3236_v14 }
 0xda3   :  { %2970 = vmatprep.mubr.msk.bf16.mxu0 %vm156_vm2, %v3237_v15 }
 0xdaa   :  { %2971 = vmatmul.mubr.msk.bf16.gmra.mxu0 %vm156_vm2, %v3238_v16  ;;  %vm1481_vm2 = vcmp.gt.s32.totalorder %v3597_v31, 13 }
 0xdab   :  { %3034 = vmatprep.mubr.msk.bf16.mxu0 %vm3478_vm1, %v3477_v0 }
 0xdff   :  { %v787_v19 = vpop.permute.xlu0 %786 }
 0xe00   :  { %3019 = vmatmul.mubr.msk.bf16.vlgmr.msra.gmra.mxu1 %vm397_vm4, %v787_v19 }
 0xe01   :  { %3023 = vmatpush3.bf16.msra.mxu1 %v3548_v2  ;;  %3026 = vmatprep.mubr.msk.bf16.mxu1 %vm3478_vm1, %v3477_v0 }
 0xe02   :  { %3024 = vmatprep.subr.bf16.mxu1 %v3477_v0 }
 0xe05   :  { %3025 = vmatpush3.bf16.msra.mxu1 %v3559_v5 }
 0xe06   :  { %3038 = vmatprep.subr.bf16.mxu1 %v3477_v0 }
 0xec0   :  { %v825_v23 = vpop.f32.mrf.mxu1 }
 0xec1   :  { %v831_v24 = vadd.f32 %v825_v23, %v257_v22  ;;  %v3777_v22 = vpop.f32.mrf.mxu0 }
 0xec2   :  { %v3020_v25 = vpop.f32.mrf.mxu1 }
 0xec3   :  { %v2767_v26 = vmul.f32 -1.442695, %v831_v24  ;;  %v269_v23 = vpop.f32.mrf.mxu0 }
 0xec4   :  { %v828_v27 = vpop.f32.mrf.mxu1 }
 0xec5   :  { %3269 = vpow2.f32 %v2767_v26  ;;  %v3779_v24 = vpop.f32.mrf.mxu0 }
 0xec6   :  { %v3021_v28 = vpop.f32.mrf.mxu1 }
 0xec7   :  { %v3781_v25 = vpop.f32.mrf.mxu0 }
 0xec9   :  { %v3783_v26 = vpop.f32.mrf.mxu0 }
 0xecb   :  { %v3785_v27 = vpop.f32.mrf.mxu0 }
 0xecd   :  { %v3787_v28 = vpop.f32.mrf.mxu0 }
 0xed2   :  { %v3270_v29 = vpop.eup %3269 }
 0xed3   :  { %v835_v30 = vadd.f32 1.0, %v3270_v29  ;;  %v3789_v29 = vpop.f32.mrf.mxu0 }
 0xed5   :  { %3271 = vrcp.f32 %v835_v30  ;;  %v3791_v30 = vpop.f32.mrf.mxu0 }
 0xee2   :  { %v3272_v32 = vpop.eup %3271 }
 0xee3   :  { %v838_v33 = vmul.f32 2.0, %v3272_v32  ;;  %v840_v39 = vmul.f32 %v3272_v32, %v781_v38 }
 0xee5   :  { %v2768_v34 = vadd.f32 -1.0, %v838_v33 }
 0xee7   :  { %842 = vrot.lane.b32.xlu1 %v2768_v34, %s3480_s1 }
 0xf59   :  { %v843_v35 = vpop.permute.xlu1 %842 }
 0xf5a   :  { %v845_v36 = vmul.f32 %v3272_v32, %v843_v35 }
 0xf5c   :  { %847 = vrot.lane.b32.xlu0 %v845_v36, %s3481_s28 }
 0xfce   :  { %v848_v40 = vpop.permute.xlu0 %847 }
 0xfcf   :  { %v850_v41 = vadd.f32 %v848_v40, %v840_v39 }
 0xfd1   :  { %3273 = vtanh.f32 %v850_v41  ;;  %v3717_v54 = vsel %vm857_vm9, %v850_v41, %v781_v38 }
 0xfde   :  { %v3274_v42 = vpop.eup %3273 }
 0xfdf   :  { %853 = vrot.lane.b32.xlu1 %v3274_v42, %s3480_s1 }
0x1051   :  { %v854_v37 = vpop.permute.xlu1 %853 }
0x1052   :  { %v856_v43 = vmul.f32 %v3272_v32, %v854_v37  ;;  %v3793_v32 = vpop.f32.mrf.mxu0 }
0x1054   :  { %v858_v44 = vsel %vm857_vm9, %v856_v43, %v780_v11  ;;  %v3795_v33 = vpop.f32.mrf.mxu0  ;;  %v265_v43 = vadd.f32 %v3692_v20, %v3591_v12  ;;  %vm1949_vm9 = vcmp.gt.s32.totalorder %v3597_v31, 19 }
0x1055   :  { %v862_v45 = vpack.c.bf16 %v858_v44, %v858_v44 }
0x1056   :  { %v3797_v34 = vpop.f32.mrf.mxu0 }
0x1057   :  { %864 = vrot.lane.b32.xlu0 %v862_v45, %s3481_s28 }
0x1058   :  { %v3799_v35 = vpop.f32.mrf.mxu0 }
0x105a   :  { %v3801_v36 = vpop.f32.mrf.mxu0 }
0x105c   :  { %v3803_v38 = vpop.f32.mrf.mxu0 }
0x105e   :  { %v3805_v39 = vpop.f32.mrf.mxu0 }
0x1060   :  { %v3807_v40 = vpop.f32.mrf.mxu0 }
0x1062   :  { %v3809_v41 = vpop.f32.mrf.mxu0 }
0x1064   :  { %v3811_v42 = vpop.f32.mrf.mxu0 }
0x1066   :  { %v3813_v37 = vpop.f32.mrf.mxu0 }
0x10c9   :  { %v865_v46 = vpop.permute.xlu0 %864 }
0x10ca   :  { %3027 = vmatmul.mubr.msk.bf16.vlgmr.msra.gmra.mxu1 %vm397_vm4, %v865_v46 }
0x10cb   :  { %3039 = vmatpush3.bf16.msra.mxu1 %v3548_v2  ;;  %3042 = vmatprep.mubr.msk.bf16.mxu1 %vm3478_vm1, %v3477_v0 }
0x10cc   :  { %3040 = vmatprep.subr.bf16.mxu1 %v3477_v0 }
0x10cf   :  { %3041 = vmatpush3.bf16.msra.mxu1 %v3559_v5 }
0x10d0   :  { %3054 = vmatprep.subr.bf16.mxu1 %v3477_v0 }
0x118a   :  { %v903_v48 = vpop.f32.mrf.mxu1 }
0x118b   :  { %v909_v49 = vadd.f32 %v903_v48, %v262_v47 }
0x118c   :  { %v3028_v50 = vpop.f32.mrf.mxu1 }
0x118d   :  { %v2770_v51 = vmul.f32 -1.442695, %v909_v49 }
0x118e   :  { %v906_v52 = vpop.f32.mrf.mxu1 }
0x118f   :  { %3275 = vpow2.f32 %v2770_v51 }
0x1190   :  { %v3029_v53 = vpop.f32.mrf.mxu1 }
0x119c   :  { %v3276_v55 = vpop.eup %3275 }
0x119d   :  { %v913_v56 = vadd.f32 1.0, %v3276_v55 }
0x119f   :  { %3277 = vrcp.f32 %v913_v56 }
0x11ac   :  { %v3278_v57 = vpop.eup %3277 }
0x11ad   :  { %v916_v58 = vmul.f32 2.0, %v3278_v57  ;;  %v918_v62 = vmul.f32 %v3278_v57, %v3717_v54 }
0x11af   :  { %v2771_v59 = vadd.f32 -1.0, %v916_v58 }
0x11b1   :  { %920 = vrot.lane.b32.xlu1 %v2771_v59, %s3480_s1 }
0x1223   :  { %v921_v60 = vpop.permute.xlu1 %920 }
0x1224   :  { %v923_v61 = vmul.f32 %v3278_v57, %v921_v60 }
0x1226   :  { %925 = vrot.lane.b32.xlu0 %v923_v61, %s3481_s28 }
0x1298   :  { %v926_v63 = vpop.permute.xlu0 %925 }
0x1299   :  { %v3720_v1 = vadd.f32 %v926_v63, %v918_v62 }
0x129b   :  { %3279 = vtanh.f32 %v3720_v1  ;;  %v937_v20 = vsel %vm935_vm10, %v3720_v1, %v3717_v54  ;;  %v270_v54 = vadd.f32 %v3591_v12, %v269_v23 }
0x12a8   :  { %v3280_v7 = vpop.eup %3279 }
0x12a9   :  { %931 = vrot.lane.b32.xlu1 %v3280_v7, %s3480_s1 }
0x131b   :  { %v932_v17 = vpop.permute.xlu1 %931 }
0x131c   :  { %v934_v11 = vmul.f32 %v3278_v57, %v932_v17 }
0x131e   :  { %v936_v18 = vsel %vm935_vm10, %v934_v11, %v858_v44  ;;  %vm2027_vm10 = vcmp.gt.s32.totalorder %v3597_v31, 20 }
0x131f   :  { %v940_v19 = vpack.c.bf16 %v936_v18, %v936_v18 }
0x1321   :  { %942 = vrot.lane.b32.xlu0 %v940_v19, %s3481_s28 }
0x1393   :  { %v943_v21 = vpop.permute.xlu0 %942 }
0x1394   :  { %3035 = vmatmul.mubr.msk.bf16.vlgmr.msra.gmra.mxu0 %vm397_vm4, %v943_v21 }
0x1395   :  { %3047 = vmatpush3.bf16.msra.mxu0 %v3548_v2  ;;  %3050 = vmatprep.mubr.msk.bf16.mxu0 %vm3478_vm1, %v3477_v0 }
0x1396   :  { %3048 = vmatprep.subr.bf16.mxu0 %v3477_v0 }
0x1399   :  { %3049 = vmatpush3.bf16.msra.mxu0 %v3559_v5 }
0x139a   :  { %3062 = vmatprep.subr.bf16.mxu0 %v3477_v0 }
0x1454   :  { %v981_v44 = vpop.f32.mrf.mxu0 }
0x1455   :  { %v987_v45 = vadd.f32 %v981_v44, %v265_v43 }
0x1456   :  { %v3036_v46 = vpop.f32.mrf.mxu0 }
0x1457   :  { %v2773_v47 = vmul.f32 -1.442695, %v987_v45 }
0x1458   :  { %v984_v48 = vpop.f32.mrf.mxu0 }
0x1459   :  { %3281 = vpow2.f32 %v2773_v47 }
0x145a   :  { %v3037_v49 = vpop.f32.mrf.mxu0 }
0x1466   :  { %v3282_v50 = vpop.eup %3281 }
0x1467   :  { %v991_v51 = vadd.f32 1.0, %v3282_v50 }
0x1469   :  { %3283 = vrcp.f32 %v991_v51  ;;  %v273_v51 = vadd.f32 %v3591_v12, %v3781_v25 }
0x1476   :  { %v3284_v52 = vpop.eup %3283 }
0x1477   :  { %v994_v53 = vmul.f32 2.0, %v3284_v52  ;;  %v996_v58 = vmul.f32 %v3284_v52, %v937_v20 }
0x1479   :  { %v2774_v55 = vadd.f32 -1.0, %v994_v53 }
0x147b   :  { %998 = vrot.lane.b32.xlu1 %v2774_v55, %s3480_s1 }
0x14ed   :  { %v999_v56 = vpop.permute.xlu1 %998 }
0x14ee   :  { %v1001_v57 = vmul.f32 %v3284_v52, %v999_v56 }
0x14f0   :  { %1003 = vrot.lane.b32.xlu0 %v1001_v57, %s3481_s28 }
0x1562   :  { %v1004_v59 = vpop.permute.xlu0 %1003 }
0x1563   :  { %v1006_v60 = vadd.f32 %v1004_v59, %v996_v58 }
0x1565   :  { %3285 = vtanh.f32 %v1006_v60  ;;  %v1015_v21 = vsel %vm1013_vm11, %v1006_v60, %v937_v20 }
0x1572   :  { %v3286_v61 = vpop.eup %3285 }
0x1573   :  { %1009 = vrot.lane.b32.xlu1 %v3286_v61, %s3480_s1 }
0x15e5   :  { %v1010_v62 = vpop.permute.xlu1 %1009 }
0x15e6   :  { %v1012_v63 = vmul.f32 %v3284_v52, %v1010_v62 }
0x15e8   :  { %v1014_v3 = vsel %vm1013_vm11, %v1012_v63, %v936_v18  ;;  %vm2105_vm11 = vcmp.gt.s32.totalorder %v3597_v31, 21 }
0x15e9   :  { %v1018_v4 = vpack.c.bf16 %v1014_v3, %v1014_v3 }
0x15eb   :  { %1020 = vrot.lane.b32.xlu0 %v1018_v4, %s3481_s28 }
0x165d   :  { %v1021_v6 = vpop.permute.xlu0 %1020 }
0x165e   :  { %3043 = vmatmul.mubr.msk.bf16.vlgmr.msra.gmra.mxu1 %vm397_vm4, %v1021_v6 }
0x165f   :  { %3055 = vmatpush3.bf16.msra.mxu1 %v3548_v2  ;;  %3058 = vmatprep.mubr.msk.bf16.mxu1 %vm3478_vm1, %v3477_v0 }
0x1660   :  { %3056 = vmatprep.subr.bf16.mxu1 %v3477_v0 }
0x1663   :  { %3057 = vmatpush3.bf16.msra.mxu1 %v3559_v5 }
0x1664   :  { %3070 = vmatprep.subr.bf16.mxu1 %v3477_v0 }
0x171e   :  { %v1059_v1 = vpop.f32.mrf.mxu1 }
0x171f   :  { %v1065_v7 = vadd.f32 %v1059_v1, %v270_v54 }
0x1720   :  { %v3044_v8 = vpop.f32.mrf.mxu1 }
0x1721   :  { %v2776_v9 = vmul.f32 -1.442695, %v1065_v7 }
0x1722   :  { %v1062_v10 = vpop.f32.mrf.mxu1 }
0x1723   :  { %3287 = vpow2.f32 %v2776_v9 }
0x1724   :  { %v3045_v13 = vpop.f32.mrf.mxu1 }
0x1730   :  { %v3288_v14 = vpop.eup %3287 }
0x1731   :  { %v1069_v15 = vadd.f32 1.0, %v3288_v14  ;;  %v278_v14 = vadd.f32 %v3777_v22, %v3591_v12 }
0x1733   :  { %3289 = vrcp.f32 %v1069_v15 }
0x1740   :  { %v3290_v16 = vpop.eup %3289 }
0x1741   :  { %v1072_v17 = vmul.f32 2.0, %v3290_v16  ;;  %v1074_v23 = vmul.f32 %v3290_v16, %v1015_v21 }
0x1743   :  { %v2777_v11 = vadd.f32 -1.0, %v1072_v17 }
0x1745   :  { %1076 = vrot.lane.b32.xlu1 %v2777_v11, %s3480_s1 }
0x17b7   :  { %v1077_v18 = vpop.permute.xlu1 %1076 }
0x17b8   :  { %v1079_v19 = vmul.f32 %v3290_v16, %v1077_v18 }
0x17ba   :  { %1081 = vrot.lane.b32.xlu0 %v1079_v19, %s3481_s28 }
0x182c   :  { %v1082_v43 = vpop.permute.xlu0 %1081 }
0x182d   :  { %v1084_v44 = vadd.f32 %v1082_v43, %v1074_v23 }
0x182f   :  { %3291 = vtanh.f32 %v1084_v44  ;;  %v1093_v25 = vsel %vm1091_vm12, %v1084_v44, %v1015_v21 }
0x183c   :  { %v3292_v45 = vpop.eup %3291 }
0x183d   :  { %1087 = vrot.lane.b32.xlu1 %v3292_v45, %s3480_s1 }
0x18af   :  { %v1088_v46 = vpop.permute.xlu1 %1087 }
0x18b0   :  { %v1090_v47 = vmul.f32 %v3290_v16, %v1088_v46 }
0x18b2   :  { %v1092_v48 = vsel %vm1091_vm12, %v1090_v47, %v1014_v3  ;;  %vm2183_vm12 = vcmp.gt.s32.totalorder %v3597_v31, 22 }
0x18b3   :  { %v1096_v49 = vpack.c.bf16 %v1092_v48, %v1092_v48 }
0x18b5   :  { %1098 = vrot.lane.b32.xlu0 %v1096_v49, %s3481_s28 }
0x1927   :  { %v1099_v50 = vpop.permute.xlu0 %1098 }
0x1928   :  { %3051 = vmatmul.mubr.msk.bf16.vlgmr.msra.gmra.mxu0 %vm397_vm4, %v1099_v50 }
0x1929   :  { %3063 = vmatpush3.bf16.msra.mxu0 %v3548_v2  ;;  %3066 = vmatprep.mubr.msk.bf16.mxu0 %vm3478_vm1, %v3477_v0 }
0x192a   :  { %3064 = vmatprep.subr.bf16.mxu0 %v3477_v0 }
0x192d   :  { %3065 = vmatpush3.bf16.msra.mxu0 %v3559_v5 }
0x192e   :  { %3078 = vmatprep.subr.bf16.mxu0 %v3477_v0 }
0x19e8   :  { %v1137_v52 = vpop.f32.mrf.mxu0 }
0x19e9   :  { %v1143_v53 = vadd.f32 %v1137_v52, %v273_v51 }
0x19ea   :  { %v3052_v55 = vpop.f32.mrf.mxu0 }
0x19eb   :  { %v2779_v56 = vmul.f32 -1.442695, %v1143_v53 }
0x19ec   :  { %v1140_v57 = vpop.f32.mrf.mxu0 }
0x19ed   :  { %3293 = vpow2.f32 %v2779_v56  ;;  %v3885_v56 = vld [vmem:[%s4234_s4 + $0x8] sm:$0xff]   ;;  %v3894_v57 = vld [vmem:[%s4234_s4] sm:$0xff]  }
0x19ee   :  { %v3053_v20 = vpop.f32.mrf.mxu0 }
0x19ef   :  { %v281_v20 = vadd.f32 %v3779_v24, %v3591_v12 }
0x19fa   :  { %v3294_v58 = vpop.eup %3293 }
0x19fb   :  { %v1147_v59 = vadd.f32 1.0, %v3294_v58 }
0x19fd   :  { %3295 = vrcp.f32 %v1147_v59 }
0x1a0a   :  { %v3296_v60 = vpop.eup %3295 }
0x1a0b   :  { %v1150_v61 = vmul.f32 2.0, %v3296_v60  ;;  %v1152_v4 = vmul.f32 %v3296_v60, %v1093_v25 }
0x1a0d   :  { %v2780_v62 = vadd.f32 -1.0, %v1150_v61 }
0x1a0f   :  { %1154 = vrot.lane.b32.xlu1 %v2780_v62, %s3480_s1 }
0x1a81   :  { %v1155_v63 = vpop.permute.xlu1 %1154 }
0x1a82   :  { %v1157_v3 = vmul.f32 %v3296_v60, %v1155_v63 }
0x1a84   :  { %1159 = vrot.lane.b32.xlu0 %v1157_v3, %s3481_s28 }
0x1af6   :  { %v1160_v6 = vpop.permute.xlu0 %1159 }
0x1af7   :  { %v1162_v54 = vadd.f32 %v1160_v6, %v1152_v4 }
0x1af9   :  { %3297 = vtanh.f32 %v1162_v54  ;;  %v1171_v22 = vsel %vm1169_vm13, %v1162_v54, %v1093_v25 }
0x1b06   :  { %v3298_v1 = vpop.eup %3297 }
0x1b07   :  { %1165 = vrot.lane.b32.xlu1 %v3298_v1, %s3480_s1 }
0x1b79   :  { %v1166_v7 = vpop.permute.xlu1 %1165 }
0x1b7a   :  { %v1168_v8 = vmul.f32 %v3296_v60, %v1166_v7 }
0x1b7c   :  { %v1170_v9 = vsel %vm1169_vm13, %v1168_v8, %v1092_v48  ;;  %vm2261_vm13 = vcmp.gt.s32.totalorder %v3597_v31, 23 }
0x1b7d   :  { %v1174_v10 = vpack.c.bf16 %v1170_v9, %v1170_v9 }
0x1b7f   :  { %1176 = vrot.lane.b32.xlu0 %v1174_v10, %s3481_s28 }
0x1bf1   :  { %v1177_v13 = vpop.permute.xlu0 %1176 }
0x1bf2   :  { %3059 = vmatmul.mubr.msk.bf16.vlgmr.msra.gmra.mxu1 %vm397_vm4, %v1177_v13 }
0x1bf3   :  { %3071 = vmatpush3.bf16.msra.mxu1 %v3548_v2  ;;  %3074 = vmatprep.mubr.msk.bf16.mxu1 %vm3478_vm1, %v3477_v0 }
0x1bf4   :  { %3072 = vmatprep.subr.bf16.mxu1 %v3477_v0 }
0x1bf7   :  { %3073 = vmatpush3.bf16.msra.mxu1 %v3559_v5 }
0x1bf8   :  { %3086 = vmatprep.subr.bf16.mxu1 %v3477_v0 }
0x1cb2   :  { %v1215_v15 = vpop.f32.mrf.mxu1 }
0x1cb3   :  { %v1221_v16 = vadd.f32 %v1215_v15, %v278_v14 }
0x1cb4   :  { %v3060_v17 = vpop.f32.mrf.mxu1 }
0x1cb5   :  { %v2782_v11 = vmul.f32 -1.442695, %v1221_v16 }
0x1cb6   :  { %v1218_v18 = vpop.f32.mrf.mxu1 }
0x1cb7   :  { %3299 = vpow2.f32 %v2782_v11  ;;  %v286_v18 = vadd.f32 %v3591_v12, %v3785_v27 }
0x1cb8   :  { %v3061_v19 = vpop.f32.mrf.mxu1 }
0x1cc4   :  { %v3300_v2 = vpop.eup %3299 }
0x1cc5   :  { %v1225_v21 = vadd.f32 1.0, %v3300_v2 }
0x1cc7   :  { %3301 = vrcp.f32 %v1225_v21 }
0x1cd4   :  { %v3302_v23 = vpop.eup %3301 }
0x1cd5   :  { %v1228_v43 = vmul.f32 2.0, %v3302_v23  ;;  %v1230_v46 = vmul.f32 %v3302_v23, %v1171_v22 }
0x1cd7   :  { %v2783_v44 = vadd.f32 -1.0, %v1228_v43 }
0x1cd9   :  { %1232 = vrot.lane.b32.xlu1 %v2783_v44, %s3480_s1 }
0x1d4b   :  { %v1233_v5 = vpop.permute.xlu1 %1232 }
0x1d4c   :  { %v1235_v45 = vmul.f32 %v3302_v23, %v1233_v5 }
0x1d4e   :  { %1237 = vrot.lane.b32.xlu0 %v1235_v45, %s3481_s28 }
0x1dc0   :  { %v1238_v47 = vpop.permute.xlu0 %1237 }
0x1dc1   :  { %v1240_v48 = vadd.f32 %v1238_v47, %v1230_v46 }
0x1dc3   :  { %3303 = vtanh.f32 %v1240_v48  ;;  %v1249_v24 = vsel %vm1247_vm14, %v1240_v48, %v1171_v22 }
0x1dd0   :  { %v3304_v49 = vpop.eup %3303 }
0x1dd1   :  { %1243 = vrot.lane.b32.xlu1 %v3304_v49, %s3480_s1 }
0x1e43   :  { %v1244_v50 = vpop.permute.xlu1 %1243 }
0x1e44   :  { %v1246_v51 = vmul.f32 %v3302_v23, %v1244_v50 }
0x1e46   :  { %v1248_v52 = vsel %vm1247_vm14, %v1246_v51, %v1170_v9  ;;  %vm2339_vm14 = vcmp.gt.s32.totalorder %v3597_v31, 24 }
0x1e47   :  { %v1252_v53 = vpack.c.bf16 %v1248_v52, %v1248_v52 }
0x1e49   :  { %1254 = vrot.lane.b32.xlu0 %v1252_v53, %s3481_s28 }
0x1ebb   :  { %v1255_v55 = vpop.permute.xlu0 %1254 }
0x1ebc   :  { %3067 = vmatmul.mubr.msk.bf16.vlgmr.msra.gmra.mxu0 %vm397_vm4, %v1255_v55 }
0x1ebd   :  { %3079 = vmatpush3.bf16.msra.mxu0 %v3885_v56  ;;  %3082 = vmatprep.mubr.msk.bf16.mxu0 %vm3478_vm1, %v3477_v0 }
0x1ebe   :  { %3080 = vmatprep.subr.bf16.mxu0 %v3477_v0 }
0x1ec1   :  { %3081 = vmatpush3.bf16.msra.mxu0 %v3894_v57 }
0x1ec2   :  { %3094 = vmatprep.subr.bf16.mxu0 %v3477_v0 }
0x1f7c   :  { %v1293_v58 = vpop.f32.mrf.mxu0 }
0x1f7d   :  { %v1299_v59 = vadd.f32 %v1293_v58, %v281_v20 }
0x1f7e   :  { %v3068_v60 = vpop.f32.mrf.mxu0 }
0x1f7f   :  { %v2785_v61 = vmul.f32 -1.442695, %v1299_v59  ;;  %v3937_v60 = vld [vmem:[%s4235_s5] ss:$0 sm:$0xff] }
0x1f80   :  { %v1296_v62 = vpop.f32.mrf.mxu0 }
0x1f81   :  { %3305 = vpow2.f32 %v2785_v61  ;;  %v289_v61 = vadd.f32 %v3937_v60, %v3789_v29 }
0x1f82   :  { %v3069_v63 = vpop.f32.mrf.mxu0 }
0x1f8e   :  { %v3306_v3 = vpop.eup %3305 }
0x1f8f   :  { %v1303_v25 = vadd.f32 1.0, %v3306_v3 }
0x1f91   :  { %3307 = vrcp.f32 %v1303_v25 }
0x1f9e   :  { %v3308_v4 = vpop.eup %3307 }
0x1f9f   :  { %v1306_v6 = vmul.f32 2.0, %v3308_v4  ;;  %v1308_v8 = vmul.f32 %v3308_v4, %v1249_v24 }
0x1fa1   :  { %v2786_v54 = vadd.f32 -1.0, %v1306_v6 }
0x1fa3   :  { %1310 = vrot.lane.b32.xlu1 %v2786_v54, %s3480_s1 }
0x2015   :  { %v1311_v1 = vpop.permute.xlu1 %1310 }
0x2016   :  { %v1313_v7 = vmul.f32 %v3308_v4, %v1311_v1 }
0x2018   :  { %1315 = vrot.lane.b32.xlu0 %v1313_v7, %s3481_s28 }
0x208a   :  { %v1316_v9 = vpop.permute.xlu0 %1315 }
0x208b   :  { %v1318_v10 = vadd.f32 %v1316_v9, %v1308_v8 }
0x208d   :  { %3309 = vtanh.f32 %v1318_v10  ;;  %v1327_v12 = vsel %vm1325_vm15, %v1318_v10, %v1249_v24 }
0x209a   :  { %v3310_v13 = vpop.eup %3309 }
0x209b   :  { %1321 = vrot.lane.b32.xlu1 %v3310_v13, %s3480_s1 }
0x210d   :  { %v1322_v14 = vpop.permute.xlu1 %1321 }
0x210e   :  { %v1324_v15 = vmul.f32 %v3308_v4, %v1322_v14 }
0x2110   :  { %v1326_v16 = vsel %vm1325_vm15, %v1324_v15, %v1248_v52  ;;  %vm2417_vm15 = vcmp.gt.s32.totalorder %v3597_v31, 25 }
0x2111   :  { %v1330_v17 = vpack.c.bf16 %v1326_v16, %v1326_v16 }
0x2113   :  { %1332 = vrot.lane.b32.xlu0 %v1330_v17, %s3481_s28 }
0x2185   :  { %v1333_v11 = vpop.permute.xlu0 %1332 }
0x2186   :  { %3075 = vmatmul.mubr.msk.bf16.vlgmr.msra.gmra.mxu1 %vm397_vm4, %v1333_v11 }
0x2187   :  { %3087 = vmatpush3.bf16.msra.mxu1 %v3885_v56  ;;  %3090 = vmatprep.mubr.msk.bf16.mxu1 %vm3478_vm1, %v3477_v0 }
0x2188   :  { %3088 = vmatprep.subr.bf16.mxu1 %v3477_v0 }
0x218b   :  { %3089 = vmatpush3.bf16.msra.mxu1 %v3894_v57 }
0x218c   :  { %3102 = vmatprep.subr.bf16.mxu1 %v3477_v0 }
0x2246   :  { %v1371_v19 = vpop.f32.mrf.mxu1 }
0x2247   :  { %v1377_v2 = vadd.f32 %v1371_v19, %v286_v18 }
0x2248   :  { %v3076_v21 = vpop.f32.mrf.mxu1 }
0x2249   :  { %v2788_v23 = vmul.f32 -1.442695, %v1377_v2  ;;  %v294_v21 = vadd.f32 %v3937_v60, %v3783_v26 }
0x224a   :  { %v1374_v43 = vpop.f32.mrf.mxu1 }
0x224b   :  { %3311 = vpow2.f32 %v2788_v23 }
0x224c   :  { %v3077_v44 = vpop.f32.mrf.mxu1 }
0x2258   :  { %v3312_v5 = vpop.eup %3311 }
0x2259   :  { %v1381_v45 = vadd.f32 1.0, %v3312_v5 }
0x225b   :  { %3313 = vrcp.f32 %v1381_v45 }
0x2268   :  { %v3314_v22 = vpop.eup %3313 }
0x2269   :  { %v1384_v46 = vmul.f32 2.0, %v3314_v22  ;;  %v1386_v27 = vmul.f32 %v3314_v22, %v1327_v12 }
0x226b   :  { %v2789_v47 = vadd.f32 -1.0, %v1384_v46 }
0x226d   :  { %1388 = vrot.lane.b32.xlu1 %v2789_v47, %s3480_s1 }
0x22df   :  { %v1389_v48 = vpop.permute.xlu1 %1388 }
0x22e0   :  { %v1391_v49 = vmul.f32 %v3314_v22, %v1389_v48 }
0x22e2   :  { %1393 = vrot.lane.b32.xlu0 %v1391_v49, %s3481_s28 }
0x2354   :  { %v1394_v50 = vpop.permute.xlu0 %1393 }
0x2355   :  { %v1396_v51 = vadd.f32 %v1394_v50, %v1386_v27 }
0x2357   :  { %3315 = vtanh.f32 %v1396_v51  ;;  %v1405_v29 = vsel %vm1403_vm0, %v1396_v51, %v1327_v12 }
0x2364   :  { %v3316_v52 = vpop.eup %3315 }
0x2365   :  { %1399 = vrot.lane.b32.xlu1 %v3316_v52, %s3480_s1 }
0x23d7   :  { %v1400_v53 = vpop.permute.xlu1 %1399 }
0x23d8   :  { %v1402_v55 = vmul.f32 %v3314_v22, %v1400_v53 }
0x23da   :  { %v1404_v20 = vsel %vm1403_vm0, %v1402_v55, %v1326_v16  ;;  %vm2573_vm0 = vcmp.gt.s32.totalorder %v3597_v31, 27 }
0x23db   :  { %v1408_v58 = vpack.c.bf16 %v1404_v20, %v1404_v20 }
0x23dd   :  { %1410 = vrot.lane.b32.xlu0 %v1408_v58, %s3481_s28 }
0x244f   :  { %v1411_v59 = vpop.permute.xlu0 %1410 }
0x2450   :  { %3083 = vmatmul.mubr.msk.bf16.vlgmr.msra.gmra.mxu0 %vm397_vm4, %v1411_v59 }
0x2451   :  { %3095 = vmatpush3.bf16.msra.mxu0 %v3885_v56  ;;  %3098 = vmatprep.mubr.msk.bf16.mxu0 %vm3478_vm1, %v3477_v0 }
0x2452   :  { %3096 = vmatprep.subr.bf16.mxu0 %v3477_v0 }
0x2455   :  { %3097 = vmatpush3.bf16.msra.mxu0 %v3894_v57 }
0x2456   :  { %3110 = vmatprep.subr.bf16.mxu0 %v3477_v0 }
0x2510   :  { %v1449_v62 = vpop.f32.mrf.mxu0 }
0x2511   :  { %v1455_v63 = vadd.f32 %v1449_v62, %v289_v61 }
0x2512   :  { %v3084_v3 = vpop.f32.mrf.mxu0 }
0x2513   :  { %v2791_v25 = vmul.f32 -1.442695, %v1455_v63  ;;  %v297_v63 = vadd.f32 %v3937_v60, %v3787_v28 }
0x2514   :  { %v1452_v4 = vpop.f32.mrf.mxu0 }
0x2515   :  { %3317 = vpow2.f32 %v2791_v25 }
0x2516   :  { %v3085_v6 = vpop.f32.mrf.mxu0 }
0x2522   :  { %v3318_v54 = vpop.eup %3317 }
0x2523   :  { %v1459_v1 = vadd.f32 1.0, %v3318_v54 }
0x2525   :  { %3319 = vrcp.f32 %v1459_v1 }
0x2532   :  { %v3320_v7 = vpop.eup %3319 }
0x2533   :  { %v1462_v24 = vmul.f32 2.0, %v3320_v7  ;;  %v1464_v13 = vmul.f32 %v3320_v7, %v1405_v29 }
0x2535   :  { %v2792_v8 = vadd.f32 -1.0, %v1462_v24 }
0x2537   :  { %1466 = vrot.lane.b32.xlu1 %v2792_v8, %s3480_s1 }
0x25a9   :  { %v1467_v9 = vpop.permute.xlu1 %1466 }
0x25aa   :  { %v1469_v10 = vmul.f32 %v3320_v7, %v1467_v9 }
0x25ac   :  { %1471 = vrot.lane.b32.xlu0 %v1469_v10, %s3481_s28 }
0x261e   :  { %v1472_v14 = vpop.permute.xlu0 %1471 }
0x261f   :  { %v1474_v15 = vadd.f32 %v1472_v14, %v1464_v13 }
0x2621   :  { %3321 = vtanh.f32 %v1474_v15  ;;  %v1483_v26 = vsel %vm1481_vm2, %v1474_v15, %v1405_v29 }
0x262e   :  { %v3322_v16 = vpop.eup %3321 }
0x262f   :  { %1477 = vrot.lane.b32.xlu1 %v3322_v16, %s3480_s1 }
0x26a1   :  { %v1478_v17 = vpop.permute.xlu1 %1477 }
0x26a2   :  { %v1480_v11 = vmul.f32 %v3320_v7, %v1478_v17 }
0x26a4   :  { %v1482_v18 = vsel %vm1481_vm2, %v1480_v11, %v1404_v20 }
0x26a5   :  { %v1486_v19 = vpack.c.bf16 %v1482_v18, %v1482_v18 }
0x26a7   :  { %1488 = vrot.lane.b32.xlu0 %v1486_v19, %s3481_s28 }
0x2719   :  { %v1489_v2 = vpop.permute.xlu0 %1488 }
0x271a   :  { %3091 = vmatmul.mubr.msk.bf16.vlgmr.msra.gmra.mxu1 %vm397_vm4, %v1489_v2 }
0x271b   :  { %3103 = vmatpush3.bf16.msra.mxu1 %v3885_v56  ;;  %3106 = vmatprep.mubr.msk.bf16.mxu1 %vm3478_vm1, %v3477_v0 }
0x271c   :  { %3104 = vmatprep.subr.bf16.mxu1 %v3477_v0 }
0x271f   :  { %3105 = vmatpush3.bf16.msra.mxu1 %v3894_v57 }
0x2720   :  { %3118 = vmatprep.subr.bf16.mxu1 %v3477_v0 }
0x27da   :  { %v1527_v23 = vpop.f32.mrf.mxu1 }
0x27db   :  { %v1533_v43 = vadd.f32 %v1527_v23, %v294_v21  ;;  %v302_v23 = vadd.f32 %v3937_v60, %v3793_v32 }
0x27dc   :  { %v3092_v44 = vpop.f32.mrf.mxu1 }
0x27dd   :  { %v2794_v5 = vmul.f32 -1.442695, %v1533_v43 }
0x27de   :  { %v1530_v45 = vpop.f32.mrf.mxu1 }
0x27df   :  { %3323 = vpow2.f32 %v2794_v5 }
0x27e0   :  { %v3093_v22 = vpop.f32.mrf.mxu1 }
0x27ec   :  { %v3324_v46 = vpop.eup %3323 }
0x27ed   :  { %v1537_v47 = vadd.f32 1.0, %v3324_v46 }
0x27ef   :  { %3325 = vrcp.f32 %v1537_v47 }
0x27fc   :  { %v3326_v48 = vpop.eup %3325 }
0x27fd   :  { %v1540_v49 = vmul.f32 2.0, %v3326_v48  ;;  %v1542_v51 = vmul.f32 %v3326_v48, %v1483_v26 }
0x27ff   :  { %v2795_v12 = vadd.f32 -1.0, %v1540_v49 }
0x2801   :  { %1544 = vrot.lane.b32.xlu1 %v2795_v12, %s3480_s1 }
0x2873   :  { %v1545_v27 = vpop.permute.xlu1 %1544 }
0x2874   :  { %v1547_v50 = vmul.f32 %v3326_v48, %v1545_v27 }
0x2876   :  { %1549 = vrot.lane.b32.xlu0 %v1547_v50, %s3481_s28 }
0x28e8   :  { %v1550_v52 = vpop.permute.xlu0 %1549 }
0x28e9   :  { %v1552_v53 = vadd.f32 %v1550_v52, %v1542_v51 }
0x28eb   :  { %3327 = vtanh.f32 %v1552_v53  ;;  %v1561_v28 = vsel %vm1559_vm3, %v1552_v53, %v1483_v26 }
0x28f8   :  { %v3328_v55 = vpop.eup %3327 }
0x28f9   :  { %1555 = vrot.lane.b32.xlu1 %v3328_v55, %s3480_s1 }
0x296b   :  { %v1556_v20 = vpop.permute.xlu1 %1555 }
0x296c   :  { %v1558_v58 = vmul.f32 %v3326_v48, %v1556_v20 }
0x296e   :  { %v1560_v59 = vsel %vm1559_vm3, %v1558_v58, %v1482_v18 }
0x296f   :  { %v1564_v61 = vpack.c.bf16 %v1560_v59, %v1560_v59 }
0x2971   :  { %1566 = vrot.lane.b32.xlu0 %v1564_v61, %s3481_s28 }
0x29e3   :  { %v1567_v62 = vpop.permute.xlu0 %1566 }
0x29e4   :  { %3099 = vmatmul.mubr.msk.bf16.vlgmr.msra.gmra.mxu0 %vm397_vm4, %v1567_v62 }
0x29e5   :  { %3111 = vmatpush3.bf16.msra.mxu0 %v3885_v56  ;;  %3114 = vmatprep.mubr.msk.bf16.mxu0 %vm3478_vm1, %v3477_v0 }
0x29e6   :  { %3112 = vmatprep.subr.bf16.mxu0 %v3477_v0 }
0x29e9   :  { %3113 = vmatpush3.bf16.msra.mxu0 %v3894_v57 }
0x29ea   :  { %3126 = vmatprep.subr.bf16.mxu0 %v3477_v0 }
0x2aa4   :  { %v1605_v3 = vpop.f32.mrf.mxu0 }
0x2aa5   :  { %v1611_v25 = vadd.f32 %v1605_v3, %v297_v63  ;;  %v305_v63 = vadd.f32 %v3937_v60, %v3797_v34 }
0x2aa6   :  { %v3100_v4 = vpop.f32.mrf.mxu0 }
0x2aa7   :  { %v2797_v6 = vmul.f32 -1.442695, %v1611_v25 }
0x2aa8   :  { %v1608_v54 = vpop.f32.mrf.mxu0 }
0x2aa9   :  { %3329 = vpow2.f32 %v2797_v6 }
0x2aaa   :  { %v3101_v1 = vpop.f32.mrf.mxu0 }
0x2ab6   :  { %v3330_v7 = vpop.eup %3329 }
0x2ab7   :  { %v1615_v24 = vadd.f32 1.0, %v3330_v7 }
0x2ab9   :  { %3331 = vrcp.f32 %v1615_v24 }
0x2ac6   :  { %v3332_v8 = vpop.eup %3331 }
0x2ac7   :  { %v1618_v9 = vmul.f32 2.0, %v3332_v8  ;;  %v1620_v14 = vmul.f32 %v3332_v8, %v1561_v28 }
0x2ac9   :  { %v2798_v10 = vadd.f32 -1.0, %v1618_v9 }
0x2acb   :  { %1622 = vrot.lane.b32.xlu1 %v2798_v10, %s3480_s1 }
0x2b3d   :  { %v1623_v29 = vpop.permute.xlu1 %1622 }
0x2b3e   :  { %v1625_v13 = vmul.f32 %v3332_v8, %v1623_v29 }
0x2b40   :  { %1627 = vrot.lane.b32.xlu0 %v1625_v13, %s3481_s28 }
0x2bb2   :  { %v1628_v15 = vpop.permute.xlu0 %1627 }
0x2bb3   :  { %v1630_v16 = vadd.f32 %v1628_v15, %v1620_v14 }
0x2bb5   :  { %3333 = vtanh.f32 %v1630_v16  ;;  %v1639_v32 = vsel %vm1637_vm5, %v1630_v16, %v1561_v28 }
0x2bc2   :  { %v3334_v17 = vpop.eup %3333 }
0x2bc3   :  { %1633 = vrot.lane.b32.xlu1 %v3334_v17, %s3480_s1 }
0x2c35   :  { %v1634_v11 = vpop.permute.xlu1 %1633 }
0x2c36   :  { %v1636_v18 = vmul.f32 %v3332_v8, %v1634_v11 }
0x2c38   :  { %v1638_v19 = vsel %vm1637_vm5, %v1636_v18, %v1560_v59 }
0x2c39   :  { %v1642_v2 = vpack.c.bf16 %v1638_v19, %v1638_v19 }
0x2c3b   :  { %1644 = vrot.lane.b32.xlu0 %v1642_v2, %s3481_s28 }
0x2cad   :  { %v1645_v21 = vpop.permute.xlu0 %1644 }
0x2cae   :  { %3107 = vmatmul.mubr.msk.bf16.vlgmr.msra.gmra.mxu1 %vm397_vm4, %v1645_v21  ;;  %v310_v21 = vadd.f32 %v3937_v60, %v3791_v30 }
0x2caf   :  { %3119 = vmatpush3.bf16.msra.mxu1 %v3885_v56  ;;  %3122 = vmatprep.mubr.msk.bf16.mxu1 %vm3478_vm1, %v3477_v0 }
0x2cb0   :  { %3120 = vmatprep.subr.bf16.mxu1 %v3477_v0 }
0x2cb3   :  { %3121 = vmatpush3.bf16.msra.mxu1 %v3894_v57 }
0x2cb4   :  { %3134 = vmatprep.subr.bf16.mxu1 %v3477_v0 }
0x2d6e   :  { %v1683_v43 = vpop.f32.mrf.mxu1 }
0x2d6f   :  { %v1689_v44 = vadd.f32 %v1683_v43, %v302_v23 }
0x2d70   :  { %v3108_v5 = vpop.f32.mrf.mxu1 }
0x2d71   :  { %v2800_v45 = vmul.f32 -1.442695, %v1689_v44 }
0x2d72   :  { %v1686_v22 = vpop.f32.mrf.mxu1 }
0x2d73   :  { %3335 = vpow2.f32 %v2800_v45 }
0x2d74   :  { %v3109_v46 = vpop.f32.mrf.mxu1 }
0x2d80   :  { %v3336_v47 = vpop.eup %3335 }
0x2d81   :  { %v1693_v48 = vadd.f32 1.0, %v3336_v47 }
0x2d83   :  { %3337 = vrcp.f32 %v1693_v48 }
0x2d90   :  { %v3338_v49 = vpop.eup %3337 }
0x2d91   :  { %v1696_v12 = vmul.f32 2.0, %v3338_v49  ;;  %v1698_v51 = vmul.f32 %v3338_v49, %v1639_v32 }
0x2d93   :  { %v2801_v27 = vadd.f32 -1.0, %v1696_v12 }
0x2d95   :  { %1700 = vrot.lane.b32.xlu1 %v2801_v27, %s3480_s1 }
0x2e07   :  { %v1701_v50 = vpop.permute.xlu1 %1700 }
0x2e08   :  { %v1703_v26 = vmul.f32 %v3338_v49, %v1701_v50 }
0x2e0a   :  { %1705 = vrot.lane.b32.xlu0 %v1703_v26, %s3481_s28 }
0x2e7c   :  { %v1706_v52 = vpop.permute.xlu0 %1705 }
0x2e7d   :  { %v1708_v53 = vadd.f32 %v1706_v52, %v1698_v51 }
0x2e7f   :  { %3339 = vtanh.f32 %v1708_v53  ;;  %v1717_v34 = vsel %vm1715_vm6, %v1708_v53, %v1639_v32 }
0x2e8c   :  { %v3340_v55 = vpop.eup %3339 }
0x2e8d   :  { %1711 = vrot.lane.b32.xlu1 %v3340_v55, %s3480_s1 }
0x2eff   :  { %v1712_v20 = vpop.permute.xlu1 %1711 }
0x2f00   :  { %v1714_v58 = vmul.f32 %v3338_v49, %v1712_v20 }
0x2f02   :  { %v1716_v59 = vsel %vm1715_vm6, %v1714_v58, %v1638_v19 }
0x2f03   :  { %v1720_v61 = vpack.c.bf16 %v1716_v59, %v1716_v59 }
0x2f05   :  { %1722 = vrot.lane.b32.xlu0 %v1720_v61, %s3481_s28  ;;  %v313_v61 = vadd.f32 %v3937_v60, %v3795_v33 }
0x2f77   :  { %v1723_v62 = vpop.permute.xlu0 %1722 }
0x2f78   :  { %3115 = vmatmul.mubr.msk.bf16.vlgmr.msra.gmra.mxu0 %vm397_vm4, %v1723_v62 }
0x2f79   :  { %3127 = vmatpush3.bf16.msra.mxu0 %v3885_v56  ;;  %3130 = vmatprep.mubr.msk.bf16.mxu0 %vm3478_vm1, %v3477_v0 }
0x2f7a   :  { %3128 = vmatprep.subr.bf16.mxu0 %v3477_v0 }
0x2f7d   :  { %3129 = vmatpush3.bf16.msra.mxu0 %v3894_v57 }
0x2f7e   :  { %3142 = vmatprep.subr.bf16.mxu0 %v3477_v0 }
0x3038   :  { %v1761_v3 = vpop.f32.mrf.mxu0 }
0x3039   :  { %v1767_v25 = vadd.f32 %v1761_v3, %v305_v63 }
0x303a   :  { %v3116_v4 = vpop.f32.mrf.mxu0 }
0x303b   :  { %v2803_v6 = vmul.f32 -1.442695, %v1767_v25 }
0x303c   :  { %v1764_v54 = vpop.f32.mrf.mxu0 }
0x303d   :  { %3341 = vpow2.f32 %v2803_v6 }
0x303e   :  { %v3117_v1 = vpop.f32.mrf.mxu0 }
0x304a   :  { %v3342_v7 = vpop.eup %3341 }
0x304b   :  { %v1771_v24 = vadd.f32 1.0, %v3342_v7 }
0x304d   :  { %3343 = vrcp.f32 %v1771_v24 }
0x305a   :  { %v3344_v8 = vpop.eup %3343 }
0x305b   :  { %v1774_v9 = vmul.f32 2.0, %v3344_v8  ;;  %v1776_v28 = vmul.f32 %v3344_v8, %v1717_v34 }
0x305d   :  { %v2804_v10 = vadd.f32 -1.0, %v1774_v9 }
0x305f   :  { %1778 = vrot.lane.b32.xlu1 %v2804_v10, %s3480_s1 }
0x30d1   :  { %v1779_v29 = vpop.permute.xlu1 %1778 }
0x30d2   :  { %v1781_v13 = vmul.f32 %v3344_v8, %v1779_v29 }
0x30d4   :  { %1783 = vrot.lane.b32.xlu0 %v1781_v13, %s3481_s28 }
0x3146   :  { %v1784_v14 = vpop.permute.xlu0 %1783 }
0x3147   :  { %v1786_v15 = vadd.f32 %v1784_v14, %v1776_v28 }
0x3149   :  { %3345 = vtanh.f32 %v1786_v15  ;;  %v1795_v30 = vsel %vm1793_vm7, %v1786_v15, %v1717_v34 }
0x3156   :  { %v3346_v16 = vpop.eup %3345 }
0x3157   :  { %1789 = vrot.lane.b32.xlu1 %v3346_v16, %s3480_s1 }
0x31c9   :  { %v1790_v17 = vpop.permute.xlu1 %1789 }
0x31ca   :  { %v1792_v11 = vmul.f32 %v3344_v8, %v1790_v17 }
0x31cc   :  { %v1794_v18 = vsel %vm1793_vm7, %v1792_v11, %v1716_v59 }
0x31cd   :  { %v1798_v19 = vpack.c.bf16 %v1794_v18, %v1794_v18 }
0x31cf   :  { %1800 = vrot.lane.b32.xlu0 %v1798_v19, %s3481_s28 }
0x3241   :  { %v1801_v2 = vpop.permute.xlu0 %1800 }
0x3242   :  { %3123 = vmatmul.mubr.msk.bf16.vlgmr.msra.gmra.mxu1 %vm397_vm4, %v1801_v2 }
0x3243   :  { %3135 = vmatpush3.bf16.msra.mxu1 %v3885_v56  ;;  %3138 = vmatprep.mubr.msk.bf16.mxu1 %vm3478_vm1, %v3477_v0 }
0x3244   :  { %3136 = vmatprep.subr.bf16.mxu1 %v3477_v0 }
0x3247   :  { %3137 = vmatpush3.bf16.msra.mxu1 %v3894_v57 }
0x3248   :  { %3150 = vmatprep.subr.bf16.mxu1 %v3477_v0 }
0x3302   :  { %v1839_v23 = vpop.f32.mrf.mxu1 }
0x3303   :  { %v1845_v43 = vadd.f32 %v1839_v23, %v310_v21 }
0x3304   :  { %v3124_v44 = vpop.f32.mrf.mxu1 }
0x3305   :  { %v2806_v5 = vmul.f32 -1.442695, %v1845_v43 }
0x3306   :  { %v1842_v45 = vpop.f32.mrf.mxu1 }
0x3307   :  { %3347 = vpow2.f32 %v2806_v5 }
0x3308   :  { %v3125_v22 = vpop.f32.mrf.mxu1 }
0x3314   :  { %v3348_v46 = vpop.eup %3347 }
0x3315   :  { %v1849_v47 = vadd.f32 1.0, %v3348_v46 }
0x3317   :  { %3349 = vrcp.f32 %v1849_v47 }
0x3324   :  { %v3350_v48 = vpop.eup %3349 }
0x3325   :  { %v1852_v49 = vmul.f32 2.0, %v3350_v48  ;;  %v1854_v26 = vmul.f32 %v3350_v48, %v1795_v30 }
0x3327   :  { %v2807_v12 = vadd.f32 -1.0, %v1852_v49 }
0x3329   :  { %1856 = vrot.lane.b32.xlu1 %v2807_v12, %s3480_s1 }
0x339b   :  { %v1857_v27 = vpop.permute.xlu1 %1856 }
0x339c   :  { %v1859_v50 = vmul.f32 %v3350_v48, %v1857_v27 }
0x339e   :  { %1861 = vrot.lane.b32.xlu0 %v1859_v50, %s3481_s28 }
0x3410   :  { %v1862_v32 = vpop.permute.xlu0 %1861 }
0x3411   :  { %v1864_v51 = vadd.f32 %v1862_v32, %v1854_v26 }
0x3413   :  { %3351 = vtanh.f32 %v1864_v51  ;;  %v1873_v33 = vsel %vm1871_vm8, %v1864_v51, %v1795_v30 }
0x3420   :  { %v3352_v52 = vpop.eup %3351 }
0x3421   :  { %1867 = vrot.lane.b32.xlu1 %v3352_v52, %s3480_s1 }
0x3493   :  { %v1868_v53 = vpop.permute.xlu1 %1867 }
0x3494   :  { %v1870_v55 = vmul.f32 %v3350_v48, %v1868_v53 }
0x3496   :  { %v1872_v20 = vsel %vm1871_vm8, %v1870_v55, %v1794_v18  ;;  %v318_v18 = vadd.f32 %v3937_v60, %v3801_v36  ;;  %v321_v55 = vadd.f32 %v3937_v60, %v3805_v39 }
0x3497   :  { %v1876_v58 = vpack.c.bf16 %v1872_v20, %v1872_v20 }
0x3499   :  { %1878 = vrot.lane.b32.xlu0 %v1876_v58, %s3481_s28 }
0x350b   :  { %v1879_v59 = vpop.permute.xlu0 %1878 }
0x350c   :  { %3131 = vmatmul.mubr.msk.bf16.vlgmr.msra.gmra.mxu0 %vm397_vm4, %v1879_v59 }
0x350d   :  { %3143 = vmatpush3.bf16.msra.mxu0 %v3885_v56  ;;  %3146 = vmatprep.mubr.msk.bf16.mxu0 %vm3478_vm1, %v3477_v0 }
0x350e   :  { %3144 = vmatprep.subr.bf16.mxu0 %v3477_v0 }
0x3511   :  { %3145 = vmatpush3.bf16.msra.mxu0 %v3894_v57 }
0x3512   :  { %3158 = vmatprep.subr.bf16.mxu0 %v3477_v0 }
0x35cc   :  { %v1917_v62 = vpop.f32.mrf.mxu0 }
0x35cd   :  { %v1923_v63 = vadd.f32 %v1917_v62, %v313_v61 }
0x35ce   :  { %v3132_v3 = vpop.f32.mrf.mxu0 }
0x35cf   :  { %v2809_v25 = vmul.f32 -1.442695, %v1923_v63 }
0x35d0   :  { %v1920_v4 = vpop.f32.mrf.mxu0 }
0x35d1   :  { %3353 = vpow2.f32 %v2809_v25 }
0x35d2   :  { %v3133_v6 = vpop.f32.mrf.mxu0 }
0x35de   :  { %v3354_v54 = vpop.eup %3353 }
0x35df   :  { %v1927_v1 = vadd.f32 1.0, %v3354_v54 }
0x35e1   :  { %3355 = vrcp.f32 %v1927_v1 }
0x35ee   :  { %v3356_v7 = vpop.eup %3355 }
0x35ef   :  { %v1930_v24 = vmul.f32 2.0, %v3356_v7  ;;  %v1932_v29 = vmul.f32 %v3356_v7, %v1873_v33 }
0x35f1   :  { %v2810_v8 = vadd.f32 -1.0, %v1930_v24 }
0x35f3   :  { %1934 = vrot.lane.b32.xlu1 %v2810_v8, %s3480_s1 }
0x3665   :  { %v1935_v9 = vpop.permute.xlu1 %1934 }
0x3666   :  { %v1937_v10 = vmul.f32 %v3356_v7, %v1935_v9 }
0x3668   :  { %1939 = vrot.lane.b32.xlu0 %v1937_v10, %s3481_s28 }
0x36da   :  { %v1940_v13 = vpop.permute.xlu0 %1939 }
0x36db   :  { %v1942_v34 = vadd.f32 %v1940_v13, %v1932_v29 }
0x36dd   :  { %3357 = vtanh.f32 %v1942_v34  ;;  %v1951_v36 = vsel %vm1949_vm9, %v1942_v34, %v1873_v33 }
0x36ea   :  { %v3358_v28 = vpop.eup %3357 }
0x36eb   :  { %1945 = vrot.lane.b32.xlu1 %v3358_v28, %s3480_s1 }
0x375d   :  { %v1946_v14 = vpop.permute.xlu1 %1945 }
0x375e   :  { %v1948_v15 = vmul.f32 %v3356_v7, %v1946_v14  ;;  %v326_v14 = vadd.f32 %v3937_v60, %v3799_v35 }
0x3760   :  { %v1950_v16 = vsel %vm1949_vm9, %v1948_v15, %v1872_v20 }
0x3761   :  { %v1954_v17 = vpack.c.bf16 %v1950_v16, %v1950_v16 }
0x3763   :  { %1956 = vrot.lane.b32.xlu0 %v1954_v17, %s3481_s28 }
0x37d5   :  { %v1957_v11 = vpop.permute.xlu0 %1956 }
0x37d6   :  { %3139 = vmatmul.mubr.msk.bf16.vlgmr.msra.gmra.mxu1 %vm397_vm4, %v1957_v11 }
0x37d7   :  { %3151 = vmatpush3.bf16.msra.mxu1 %v3885_v56  ;;  %3154 = vmatprep.mubr.msk.bf16.mxu1 %vm3478_vm1, %v3477_v0 }
0x37d8   :  { %3152 = vmatprep.subr.bf16.mxu1 %v3477_v0 }
0x37db   :  { %3153 = vmatpush3.bf16.msra.mxu1 %v3894_v57 }
0x37dc   :  { %3166 = vmatprep.subr.bf16.mxu1 %v3477_v0 }
0x3896   :  { %v1995_v19 = vpop.f32.mrf.mxu1 }
0x3897   :  { %v2001_v2 = vadd.f32 %v1995_v19, %v318_v18 }
0x3898   :  { %v3140_v21 = vpop.f32.mrf.mxu1 }
0x3899   :  { %v2812_v23 = vmul.f32 -1.442695, %v2001_v2 }
0x389a   :  { %v1998_v43 = vpop.f32.mrf.mxu1 }
0x389b   :  { %3359 = vpow2.f32 %v2812_v23 }
0x389c   :  { %v3141_v44 = vpop.f32.mrf.mxu1 }
0x38a8   :  { %v3360_v5 = vpop.eup %3359 }
0x38a9   :  { %v2005_v45 = vadd.f32 1.0, %v3360_v5 }
0x38ab   :  { %3361 = vrcp.f32 %v2005_v45 }
0x38b8   :  { %v3362_v22 = vpop.eup %3361 }
0x38b9   :  { %v2008_v46 = vmul.f32 2.0, %v3362_v22  ;;  %v2010_v12 = vmul.f32 %v3362_v22, %v1951_v36 }
0x38bb   :  { %v2813_v47 = vadd.f32 -1.0, %v2008_v46 }
0x38bd   :  { %2012 = vrot.lane.b32.xlu1 %v2813_v47, %s3480_s1 }
0x392f   :  { %v2013_v48 = vpop.permute.xlu1 %2012 }
0x3930   :  { %v2015_v49 = vmul.f32 %v3362_v22, %v2013_v48 }
0x3932   :  { %2017 = vrot.lane.b32.xlu0 %v2015_v49, %s3481_s28 }
0x39a4   :  { %v2018_v27 = vpop.permute.xlu0 %2017 }
0x39a5   :  { %v2020_v50 = vadd.f32 %v2018_v27, %v2010_v12 }
0x39a7   :  { %3363 = vtanh.f32 %v2020_v50  ;;  %v2029_v39 = vsel %vm2027_vm10, %v2020_v50, %v1951_v36 }
0x39b4   :  { %v3364_v30 = vpop.eup %3363 }
0x39b5   :  { %2023 = vrot.lane.b32.xlu1 %v3364_v30, %s3480_s1  ;;  %v329_v30 = vadd.f32 %v3937_v60, %v3803_v38 }
0x3a27   :  { %v2024_v26 = vpop.permute.xlu1 %2023 }
0x3a28   :  { %v2026_v32 = vmul.f32 %v3362_v22, %v2024_v26 }
0x3a2a   :  { %v2028_v51 = vsel %vm2027_vm10, %v2026_v32, %v1950_v16 }
0x3a2b   :  { %v2032_v52 = vpack.c.bf16 %v2028_v51, %v2028_v51 }
0x3a2d   :  { %2034 = vrot.lane.b32.xlu0 %v2032_v52, %s3481_s28 }
0x3a9f   :  { %v2035_v53 = vpop.permute.xlu0 %2034 }
0x3aa0   :  { %3147 = vmatmul.mubr.msk.bf16.vlgmr.msra.gmra.mxu0 %vm397_vm4, %v2035_v53 }
0x3aa1   :  { %3159 = vmatpush3.bf16.msra.mxu0 %v3885_v56  ;;  %3162 = vmatprep.mubr.msk.bf16.mxu0 %vm3478_vm1, %v3477_v0 }
0x3aa2   :  { %3160 = vmatprep.subr.bf16.mxu0 %v3477_v0 }
0x3aa5   :  { %3161 = vmatpush3.bf16.msra.mxu0 %v3894_v57 }
0x3aa6   :  { %3174 = vmatprep.subr.bf16.mxu0 %v3477_v0 }
0x3b60   :  { %v2073_v20 = vpop.f32.mrf.mxu0 }
0x3b61   :  { %v2079_v58 = vadd.f32 %v2073_v20, %v321_v55 }
0x3b62   :  { %v3148_v59 = vpop.f32.mrf.mxu0 }
0x3b63   :  { %v2815_v61 = vmul.f32 -1.442695, %v2079_v58 }
0x3b64   :  { %v2076_v62 = vpop.f32.mrf.mxu0 }
0x3b65   :  { %3365 = vpow2.f32 %v2815_v61 }
0x3b66   :  { %v3149_v63 = vpop.f32.mrf.mxu0 }
0x3b72   :  { %v3366_v3 = vpop.eup %3365 }
0x3b73   :  { %v2083_v25 = vadd.f32 1.0, %v3366_v3 }
0x3b75   :  { %3367 = vrcp.f32 %v2083_v25 }
0x3b82   :  { %v3368_v4 = vpop.eup %3367 }
0x3b83   :  { %v2086_v6 = vmul.f32 2.0, %v3368_v4  ;;  %v2088_v24 = vmul.f32 %v3368_v4, %v2029_v39 }
0x3b85   :  { %v2816_v54 = vadd.f32 -1.0, %v2086_v6 }
0x3b87   :  { %2090 = vrot.lane.b32.xlu1 %v2816_v54, %s3480_s1 }
0x3bf9   :  { %v2091_v1 = vpop.permute.xlu1 %2090 }
0x3bfa   :  { %v2093_v7 = vmul.f32 %v3368_v4, %v2091_v1 }
0x3bfc   :  { %2095 = vrot.lane.b32.xlu0 %v2093_v7, %s3481_s28 }
0x3c6e   :  { %v2096_v8 = vpop.permute.xlu0 %2095 }
0x3c6f   :  { %v2098_v9 = vadd.f32 %v2096_v8, %v2088_v24 }
0x3c71   :  { %3369 = vtanh.f32 %v2098_v9  ;;  %v2107_v35 = vsel %vm2105_vm11, %v2098_v9, %v2029_v39  ;;  %v334_v9 = vadd.f32 %v3937_v60, %v3809_v41 }
0x3c7e   :  { %v3370_v10 = vpop.eup %3369 }
0x3c7f   :  { %2101 = vrot.lane.b32.xlu1 %v3370_v10, %s3480_s1 }
0x3cf1   :  { %v2102_v33 = vpop.permute.xlu1 %2101 }
0x3cf2   :  { %v2104_v29 = vmul.f32 %v3368_v4, %v2102_v33 }
0x3cf4   :  { %v2106_v13 = vsel %vm2105_vm11, %v2104_v29, %v2028_v51 }
0x3cf5   :  { %v2110_v34 = vpack.c.bf16 %v2106_v13, %v2106_v13 }
0x3cf7   :  { %2112 = vrot.lane.b32.xlu0 %v2110_v34, %s3481_s28 }
0x3d69   :  { %v2113_v28 = vpop.permute.xlu0 %2112 }
0x3d6a   :  { %3155 = vmatmul.mubr.msk.bf16.vlgmr.msra.gmra.mxu1 %vm397_vm4, %v2113_v28 }
0x3d6b   :  { %3167 = vmatpush3.bf16.msra.mxu1 %v3885_v56  ;;  %3170 = vmatprep.mubr.msk.bf16.mxu1 %vm3478_vm1, %v3477_v0 }
0x3d6c   :  { %3168 = vmatprep.subr.bf16.mxu1 %v3477_v0 }
0x3d6f   :  { %3169 = vmatpush3.bf16.msra.mxu1 %v3894_v57 }
0x3d70   :  { %3182 = vmatprep.subr.bf16.mxu1 %v3477_v0 }
0x3e2a   :  { %v2151_v15 = vpop.f32.mrf.mxu1 }
0x3e2b   :  { %v2157_v16 = vadd.f32 %v2151_v15, %v326_v14 }
0x3e2c   :  { %v3156_v17 = vpop.f32.mrf.mxu1 }
0x3e2d   :  { %v2818_v11 = vmul.f32 -1.442695, %v2157_v16 }
0x3e2e   :  { %v2154_v18 = vpop.f32.mrf.mxu1 }
0x3e2f   :  { %3371 = vpow2.f32 %v2818_v11 }
0x3e30   :  { %v3157_v19 = vpop.f32.mrf.mxu1 }
0x3e3c   :  { %v3372_v2 = vpop.eup %3371 }
0x3e3d   :  { %v2161_v21 = vadd.f32 1.0, %v3372_v2 }
0x3e3f   :  { %3373 = vrcp.f32 %v2161_v21 }
0x3e4c   :  { %v3374_v23 = vpop.eup %3373 }
0x3e4d   :  { %v2164_v43 = vmul.f32 2.0, %v3374_v23  ;;  %v2166_v22 = vmul.f32 %v3374_v23, %v2107_v35 }
0x3e4f   :  { %v2819_v44 = vadd.f32 -1.0, %v2164_v43 }
0x3e51   :  { %2168 = vrot.lane.b32.xlu1 %v2819_v44, %s3480_s1 }
0x3ec3   :  { %v2169_v5 = vpop.permute.xlu1 %2168 }
0x3ec4   :  { %v2171_v45 = vmul.f32 %v3374_v23, %v2169_v5 }
0x3ec6   :  { %2173 = vrot.lane.b32.xlu0 %v2171_v45, %s3481_s28 }
0x3f38   :  { %v2174_v46 = vpop.permute.xlu0 %2173 }
0x3f39   :  { %v2176_v47 = vadd.f32 %v2174_v46, %v2166_v22  ;;  %v3411_v22 = vld [vmem:[%s4234_s4] sm:$0xff]   ;;  %v337_v46 = vadd.f32 %v3937_v60, %v3813_v37 }
0x3f3b   :  { %3375 = vtanh.f32 %v2176_v47  ;;  %v2185_v38 = vsel %vm2183_vm12, %v2176_v47, %v2107_v35  ;;  %v3410_v35 = vld [vmem:[%s4234_s4 + $0x8] sm:$0xff]  }
0x3f48   :  { %v3376_v48 = vpop.eup %3375 }
0x3f49   :  { %2179 = vrot.lane.b32.xlu1 %v3376_v48, %s3480_s1 }
0x3fbb   :  { %v2180_v49 = vpop.permute.xlu1 %2179 }
0x3fbc   :  { %v2182_v36 = vmul.f32 %v3374_v23, %v2180_v49 }
0x3fbe   :  { %v2184_v12 = vsel %vm2183_vm12, %v2182_v36, %v2106_v13 }
0x3fbf   :  { %v2188_v27 = vpack.c.bf16 %v2184_v12, %v2184_v12 }
0x3fc1   :  { %2190 = vrot.lane.b32.xlu0 %v2188_v27, %s3481_s28 }
0x4033   :  { %v2191_v50 = vpop.permute.xlu0 %2190 }
0x4034   :  { %3163 = vmatmul.mubr.msk.bf16.vlgmr.msra.gmra.mxu0 %vm397_vm4, %v2191_v50 }
0x4035   :  { %3175 = vmatpush3.bf16.msra.mxu0 %v3885_v56  ;;  %3178 = vmatprep.mubr.msk.bf16.mxu0 %vm3478_vm1, %v3477_v0 }
0x4036   :  { %3176 = vmatprep.subr.bf16.mxu0 %v3477_v0 }
0x4039   :  { %3177 = vmatpush3.bf16.msra.mxu0 %v3894_v57 }
0x403a   :  { %3190 = vmatprep.subr.bf16.mxu0 %v3477_v0 }
0x40f4   :  { %v2229_v26 = vpop.f32.mrf.mxu0 }
0x40f5   :  { %v2235_v32 = vadd.f32 %v2229_v26, %v329_v30 }
0x40f6   :  { %v3164_v51 = vpop.f32.mrf.mxu0 }
0x40f7   :  { %v2821_v52 = vmul.f32 -1.442695, %v2235_v32 }
0x40f8   :  { %v2232_v53 = vpop.f32.mrf.mxu0 }
0x40f9   :  { %3377 = vpow2.f32 %v2821_v52 }
0x40fa   :  { %v3165_v55 = vpop.f32.mrf.mxu0 }
0x4106   :  { %v3378_v20 = vpop.eup %3377 }
0x4107   :  { %v2239_v58 = vadd.f32 1.0, %v3378_v20 }
0x4109   :  { %3379 = vrcp.f32 %v2239_v58 }
0x4116   :  { %v3380_v59 = vpop.eup %3379 }
0x4117   :  { %v2242_v61 = vmul.f32 2.0, %v3380_v59  ;;  %v2244_v25 = vmul.f32 %v3380_v59, %v2185_v38 }
0x4119   :  { %v2822_v62 = vadd.f32 -1.0, %v2242_v61 }
0x411b   :  { %2246 = vrot.lane.b32.xlu1 %v2822_v62, %s3480_s1 }
0x418d   :  { %v2247_v63 = vpop.permute.xlu1 %2246 }
0x418e   :  { %v2249_v3 = vmul.f32 %v3380_v59, %v2247_v63 }
0x4190   :  { %2251 = vrot.lane.b32.xlu0 %v2249_v3, %s3481_s28 }
0x4202   :  { %v2252_v4 = vpop.permute.xlu0 %2251 }
0x4203   :  { %v2254_v6 = vadd.f32 %v2252_v4, %v2244_v25  ;;  %v342_v25 = vadd.f32 %v3937_v60, %v3807_v40 }
0x4205   :  { %3381 = vtanh.f32 %v2254_v6  ;;  %v2263_v41 = vsel %vm2261_vm13, %v2254_v6, %v2185_v38 }
0x4212   :  { %v3382_v54 = vpop.eup %3381 }
0x4213   :  { %2257 = vrot.lane.b32.xlu1 %v3382_v54, %s3480_s1 }
0x4285   :  { %v2258_v1 = vpop.permute.xlu1 %2257 }
0x4286   :  { %v2260_v7 = vmul.f32 %v3380_v59, %v2258_v1 }
0x4288   :  { %v2262_v39 = vsel %vm2261_vm13, %v2260_v7, %v2184_v12 }
0x4289   :  { %v2266_v24 = vpack.c.bf16 %v2262_v39, %v2262_v39 }
0x428b   :  { %2268 = vrot.lane.b32.xlu0 %v2266_v24, %s3481_s28 }
0x42fd   :  { %v2269_v8 = vpop.permute.xlu0 %2268 }
0x42fe   :  { %3171 = vmatmul.mubr.msk.bf16.vlgmr.msra.gmra.mxu1 %vm397_vm4, %v2269_v8 }
0x42ff   :  { %3183 = vmatpush3.bf16.msra.mxu1 %v3885_v56  ;;  %3186 = vmatprep.mubr.msk.bf16.mxu1 %vm3478_vm1, %v3477_v0 }
0x4300   :  { %3184 = vmatprep.subr.bf16.mxu1 %v3477_v0 }
0x4303   :  { %3185 = vmatpush3.bf16.msra.mxu1 %v3894_v57 }
0x4304   :  { %3198 = vmatprep.subr.mxu1 %v3477_v0 }
0x43be   :  { %v2307_v10 = vpop.f32.mrf.mxu1 }
0x43bf   :  { %v2313_v33 = vadd.f32 %v2307_v10, %v334_v9 }
0x43c0   :  { %v3172_v29 = vpop.f32.mrf.mxu1 }
0x43c1   :  { %v2824_v13 = vmul.f32 -1.442695, %v2313_v33 }
0x43c2   :  { %v2310_v34 = vpop.f32.mrf.mxu1 }
0x43c3   :  { %3383 = vpow2.f32 %v2824_v13 }
0x43c4   :  { %v3173_v28 = vpop.f32.mrf.mxu1 }
0x43d0   :  { %v3384_v56 = vpop.eup %3383 }
0x43d1   :  { %v2317_v14 = vadd.f32 1.0, %v3384_v56 }
0x43d3   :  { %3385 = vrcp.f32 %v2317_v14 }
0x43e0   :  { %v3386_v15 = vpop.eup %3385 }
0x43e1   :  { %v2320_v16 = vmul.f32 2.0, %v3386_v15  ;;  %v2322_v18 = vmul.f32 %v3386_v15, %v2263_v41 }
0x43e3   :  { %v2825_v17 = vadd.f32 -1.0, %v2320_v16 }
0x43e5   :  { %2324 = vrot.lane.b32.xlu1 %v2825_v17, %s3480_s1 }
0x4457   :  { %v2325_v57 = vpop.permute.xlu1 %2324 }
0x4458   :  { %v2327_v11 = vmul.f32 %v3386_v15, %v2325_v57 }
0x445a   :  { %2329 = vrot.lane.b32.xlu0 %v2327_v11, %s3481_s28  ;;  %v3412_v11 = vld [vmem:[%s4235_s5] ss:$0 sm:$0xff] }
0x44cc   :  { %v2330_v19 = vpop.permute.xlu0 %2329 }
0x44cd   :  { %v2332_v2 = vadd.f32 %v2330_v19, %v2322_v18 }
0x44cf   :  { %3387 = vtanh.f32 %v2332_v2  ;;  %v2341_v37 = vsel %vm2339_vm14, %v2332_v2, %v2263_v41  ;;  %v345_v41 = vadd.f32 %v3412_v11, %v3811_v42 }
0x44dc   :  { %v3388_v21 = vpop.eup %3387 }
0x44dd   :  { %2335 = vrot.lane.b32.xlu1 %v3388_v21, %s3480_s1 }
0x454f   :  { %v2336_v23 = vpop.permute.xlu1 %2335 }
0x4550   :  { %v2338_v43 = vmul.f32 %v3386_v15, %v2336_v23 }
0x4552   :  { %v2340_v44 = vsel %vm2339_vm14, %v2338_v43, %v2262_v39 }
0x4553   :  { %v2344_v5 = vpack.c.bf16 %v2340_v44, %v2340_v44 }
0x4555   :  { %2346 = vrot.lane.b32.xlu0 %v2344_v5, %s3481_s28 }
0x45c7   :  { %v2347_v45 = vpop.permute.xlu0 %2346 }
0x45c8   :  { %3179 = vmatmul.mubr.msk.bf16.vlgmr.msra.gmra.mxu0 %vm397_vm4, %v2347_v45 }
0x45c9   :  { %3191 = vmatpush3.bf16.msra.mxu0 %v3410_v35  ;;  %3194 = vmatprep.mubr.msk.bf16.mxu0 %vm3478_vm1, %v3477_v0 }
0x45ca   :  { %3192 = vmatprep.subr.bf16.mxu0 %v3477_v0 }
0x45cd   :  { %3193 = vmatpush3.bf16.msra.mxu0 %v3411_v22 }
0x4688   :  { %v2385_v47 = vpop.f32.mrf.mxu0 }
0x4689   :  { %v2391_v48 = vadd.f32 %v2385_v47, %v337_v46 }
0x468a   :  { %v3180_v49 = vpop.f32.mrf.mxu0 }
0x468b   :  { %v2827_v36 = vmul.f32 -1.442695, %v2391_v48 }
0x468c   :  { %v2388_v12 = vpop.f32.mrf.mxu0 }
0x468d   :  { %3389 = vpow2.f32 %v2827_v36  ;;  %v2593_v12 = vld [vmem:[%s4236_s6 + $0x18] sm:$0xff] }
0x468e   :  { %v3181_v27 = vpop.f32.mrf.mxu0 }
0x468f   :  { %v2592_v27 = vld [vmem:[%s4236_s6 + $0x10] sm:$0xff] }
0x469a   :  { %v3390_v50 = vpop.eup %3389 }
0x469b   :  { %v2395_v30 = vadd.f32 1.0, %v3390_v50  ;;  %v2591_v50 = vld [vmem:[%s4236_s6 + $0x8] sm:$0xff] }
0x469d   :  { %3391 = vrcp.f32 %v2395_v30 }
0x46aa   :  { %v3392_v26 = vpop.eup %3391 }
0x46ab   :  { %v2398_v32 = vmul.f32 2.0, %v3392_v26  ;;  %v2400_v55 = vmul.f32 %v3392_v26, %v2341_v37 }
0x46ad   :  { %v2828_v51 = vadd.f32 -1.0, %v2398_v32 }
0x46af   :  { %2402 = vrot.lane.b32.xlu1 %v2828_v51, %s3480_s1  ;;  %v2587_v51 = vstv %s4230_s0  ;;  %s3483_s0 = smov [#allocation6]  }
0x46b0   :  { %vm2588_vm2 = vcmp.eq.s32.totalorder %v3597_v31, %v2587_v51 }
0x4721   :  { %v2403_v52 = vpop.permute.xlu1 %2402 }
0x4722   :  { %v2405_v53 = vmul.f32 %v3392_v26, %v2403_v52 }
0x4724   :  { %2407 = vrot.lane.b32.xlu0 %v2405_v53, %s3481_s28 }
0x4796   :  { %v2408_v20 = vpop.permute.xlu0 %2407 }
0x4797   :  { %v2410_v58 = vadd.f32 %v2408_v20, %v2400_v55 }
0x4799   :  { %3393 = vtanh.f32 %v2410_v58  ;;  %v2419_v40 = vsel %vm2417_vm15, %v2410_v58, %v2341_v37 }
0x47a6   :  { %v3394_v59 = vpop.eup %3393 }
0x47a7   :  { %2413 = vrot.lane.b32.xlu1 %v3394_v59, %s3480_s1 }
0x4819   :  { %v2414_v61 = vpop.permute.xlu1 %2413 }
0x481a   :  { %v2416_v62 = vmul.f32 %v3392_v26, %v2414_v61  ;;  %v2590_v26 = vld [vmem:[%s4236_s6] sm:$0xff]  ;;  %s3482_s6 = smov 96  }
0x481c   :  { %v2418_v63 = vsel %vm2417_vm15, %v2416_v62, %v2340_v44 }
0x481d   :  { %v2422_v3 = vpack.c.bf16 %v2418_v63, %v2418_v63 }
0x481f   :  { %2424 = vrot.lane.b32.xlu0 %v2422_v3, %s3481_s28 }
0x4891   :  { %v2425_v38 = vpop.permute.xlu0 %2424 }
0x4892   :  { %3187 = vmatmul.mubr.msk.bf16.vlgmr.msra.gmra.mxu1 %vm397_vm4, %v2425_v38 }
0x4893   :  { %3206 = vmatprep.mubr.msk.f32.mxu1 %vm3478_vm1, %v3477_v0  ;;  %vm2495_vm1 = vcmp.gt.s32.totalorder %v3597_v31, 26  ;;  %3199 = vmatpush3.msra.mxu1 %v2593_v12 }
0x4894   :  { %3200 = vmatprep.subr.mxu1 %v3477_v0 }
0x4895   :  { %3201 = vmatpush3.msra.mxu1 %v2592_v27 }
0x4896   :  { %3202 = vmatprep.subr.mxu1 %v3477_v0 }
0x4897   :  { %3203 = vmatpush3.msra.mxu1 %v2591_v50 }
0x4898   :  { %3204 = vmatprep.subr.mxu1 %v3477_v0 }
0x4899   :  { %3205 = vmatpush3.msra.mxu1 %v2590_v26 }
0x4952   :  { %v2463_v4 = vpop.f32.mrf.mxu1 }
0x4953   :  { %v2469_v6 = vadd.f32 %v2463_v4, %v342_v25 }
0x4954   :  { %v3188_v54 = vpop.f32.mrf.mxu1 }
0x4955   :  { %v2830_v1 = vmul.f32 -1.442695, %v2469_v6 }
0x4956   :  { %v2466_v7 = vpop.f32.mrf.mxu1 }
0x4957   :  { %3395 = vpow2.f32 %v2830_v1 }
0x4958   :  { %v3189_v39 = vpop.f32.mrf.mxu1 }
0x4964   :  { %v3396_v24 = vpop.eup %3395 }
0x4965   :  { %v2473_v8 = vadd.f32 1.0, %v3396_v24 }
0x4967   :  { %3397 = vrcp.f32 %v2473_v8 }
0x4974   :  { %v3398_v9 = vpop.eup %3397 }
0x4975   :  { %v2476_v10 = vmul.f32 2.0, %v3398_v9  ;;  %v2478_v60 = vmul.f32 %v3398_v9, %v2419_v40 }
0x4977   :  { %v2831_v33 = vadd.f32 -1.0, %v2476_v10 }
0x4979   :  { %2480 = vrot.lane.b32.xlu1 %v2831_v33, %s3480_s1 }
0x49eb   :  { %v2481_v29 = vpop.permute.xlu1 %2480 }
0x49ec   :  { %v2483_v13 = vmul.f32 %v3398_v9, %v2481_v29 }
0x49ee   :  { %2485 = vrot.lane.b32.xlu0 %v2483_v13, %s3481_s28 }
0x4a60   :  { %v2486_v34 = vpop.permute.xlu0 %2485 }
0x4a61   :  { %v2488_v28 = vadd.f32 %v2486_v34, %v2478_v60 }
0x4a63   :  { %3399 = vtanh.f32 %v2488_v28  ;;  %v2497_v42 = vsel %vm2495_vm1, %v2488_v28, %v2419_v40 }
0x4a70   :  { %v3400_v56 = vpop.eup %3399 }
0x4a71   :  { %2491 = vrot.lane.b32.xlu1 %v3400_v56, %s3480_s1 }
0x4ae3   :  { %v2492_v14 = vpop.permute.xlu1 %2491 }
0x4ae4   :  { %v2494_v15 = vmul.f32 %v3398_v9, %v2492_v14 }
0x4ae6   :  { %v2496_v16 = vsel %vm2495_vm1, %v2494_v15, %v2418_v63 }
0x4ae7   :  { %v2500_v17 = vpack.c.bf16 %v2496_v16, %v2496_v16 }
0x4ae9   :  { %2502 = vrot.lane.b32.xlu0 %v2500_v17, %s3481_s28 }
0x4b5b   :  { %v2503_v57 = vpop.permute.xlu0 %2502 }
0x4b5c   :  { %3195 = vmatmul.mubr.msk.bf16.vlgmr.msra.gmra.mxu0 %vm397_vm4, %v2503_v57 }
0x4c1c   :  { %v2541_v18 = vpop.f32.mrf.mxu0 }
0x4c1d   :  { %v2547_v19 = vadd.f32 %v2541_v18, %v345_v41 }
0x4c1e   :  { %v3196_v2 = vpop.f32.mrf.mxu0 }
0x4c1f   :  { %v2833_v21 = vmul.f32 -1.442695, %v2547_v19 }
0x4c20   :  { %v2544_v23 = vpop.f32.mrf.mxu0 }
0x4c21   :  { %3401 = vpow2.f32 %v2833_v21 }
0x4c22   :  { %v3197_v43 = vpop.f32.mrf.mxu0 }
0x4c2e   :  { %v3402_v44 = vpop.eup %3401 }
0x4c2f   :  { %v2551_v5 = vadd.f32 1.0, %v3402_v44 }
0x4c31   :  { %3403 = vrcp.f32 %v2551_v5 }
0x4c3e   :  { %v3404_v45 = vpop.eup %3403 }
0x4c3f   :  { %v2554_v35 = vmul.f32 2.0, %v3404_v45  ;;  %v2556_v48 = vmul.f32 %v3404_v45, %v2497_v42 }
0x4c41   :  { %v2834_v22 = vadd.f32 -1.0, %v2554_v35 }
0x4c43   :  { %2558 = vrot.lane.b32.xlu1 %v2834_v22, %s3480_s1 }
0x4cb5   :  { %v2559_v46 = vpop.permute.xlu1 %2558 }
0x4cb6   :  { %v2561_v47 = vmul.f32 %v3404_v45, %v2559_v46 }
0x4cb8   :  { %2563 = vrot.lane.b32.xlu0 %v2561_v47, %s3481_s28 }
0x4d2a   :  { %v2564_v49 = vpop.permute.xlu0 %2563 }
0x4d2b   :  { %v2566_v36 = vadd.f32 %v2564_v49, %v2556_v48 }
0x4d2d   :  { %3405 = vtanh.f32 %v2566_v36  ;;  %v2575_v55 = vsel %vm2573_vm0, %v2566_v36, %v2497_v42 }
0x4d3a   :  { %v3406_v30 = vpop.eup %3405 }
0x4d3b   :  { %2569 = vrot.lane.b32.xlu1 %v3406_v30, %s3480_s1  ;;  %s2694_s1 = sshll.u32 %s3483_s0, 4  ;;  %s2695_s1 = int_to_ptr.vmem [resolvable:$true] %s2694_s1 }
0x4d3c   :  { %s3413_s12 = scalar_lea.vmem %s2695_s1, 128  ;;  %p3418_p1 = scmp.lt.s32.totalorder %s2695_s1, %s2695_s1 }
0x4d3d   :  { %p3414_p0 = scmp.ne.s32.totalorder %s2695_s1, %s3413_s12  ;;  %p3419_p2 = scmp.lt.s32.totalorder %s3413_s12, %s3413_s12 }
0x4d3f   :  { %p3420_p3 = por %p3419_p2, %p3418_p1 }
0x4d41   :  { %p3421_p4 = pnand %p3420_p3, %p3414_p0 }
0x4dad   :  { %v2570_v32 = vpop.permute.xlu1 %2569 }
0x4dae   :  { %v2572_v52 = vmul.f32 %v3404_v45, %v2570_v32 }
0x4db0   :  { %v2574_v53 = vsel %vm2573_vm0, %v2572_v52, %v2496_v16 }
0x4db1   :  { %2577 = vrot.lane.b32.xlu1 %v2574_v53, %s3481_s28  ;;  %v2589_v37 = vsel %vm2588_vm2, %v2574_v53, 0.0 }
0x4db2   :  { %2602 = vrot.lane.b32.xlu0 %v2589_v37, %s3481_s28 }
0x4db6   :  { %2582 = vrot.lane.b32.xlu0 %v2575_v55, %s3482_s6 }
0x4e23   :  { %v2578_v0 = vpop.permute.xlu1 %2577 }
0x4e24   :  { %2580 = vst.msk [vmem:[#allocation6] sm:$0xff] %vm397_vm4, %v2578_v0  ;;  %v2603_v20 = vpop.permute.xlu0 %2602 }
0x4e25   :  { %3207 = vmatmul.mubr.msk.f32.vlgmr.msra.gmra.mxu1 %vm397_vm4, %v2603_v20 }
0x4e28   :  { %v2583_v58 = vpop.permute.xlu0 %2582 }
0x4e29   :  { %2585 = vst.msk [vmem:[#allocation8] sm:$0xff] %vm397_vm4, %v2583_v58 }
0x4e2a   :  { %3424 = shalt.err (!%p3421_p4)
}
0x4e2b   :  { %2697 = dma.vmem_to_hbm [thread:$0]  %s2695_s1, 128, %s4239_s9, [#allocation7]  }
0x4e2c   :  { %s3484_s13 = smov [#allocation8]  }
0x4e2d   :  { %s2704_s14 = sshll.u32 %s3484_s13, 4  ;;  %s2705_s14 = int_to_ptr.vmem [resolvable:$true] %s2704_s14 }
0x4e2e   :  { %s3433_s15 = scalar_lea.vmem %s2705_s14, 128  ;;  %p3438_p6 = scmp.lt.s32.totalorder %s2705_s14, %s2705_s14 }
0x4e2f   :  { %p3434_p5 = scmp.ne.s32.totalorder %s2705_s14, %s3433_s15  ;;  %p3439_p7 = scmp.lt.s32.totalorder %s3433_s15, %s3433_s15 }
0x4e31   :  { %p3440_p8 = por %p3439_p7, %p3438_p6 }
0x4e33   :  { %p3441_p9 = pnand %p3440_p8, %p3434_p5 }
0x4e35   :  { %3444 = shalt.err (!%p3441_p9)
}
0x4e36   :  { %2707 = dma.vmem_to_hbm [thread:$0]  %s2705_s14, 128, %s4240_s10, [#allocation7]   ;;  %v2835_v31 = vld [vmem:[%s4237_s7] ss:$0 sm:$0xff]  ;;  %vm2676_vm4 = vcmask 80896  }
0x4e37   :  { %s3485_s20 = smov [#allocation4]  }
0x4e38   :  { %s2684_s9 = sshll.u32 %s3485_s20, 4  ;;  %s2685_s9 = int_to_ptr.vmem [resolvable:$true] %s2684_s9 }
0x4e39   :  { %s3453_s21 = scalar_lea.vmem %s2685_s9, 128  ;;  %p3458_p11 = scmp.lt.s32.totalorder %s2685_s9, %s2685_s9 }
0x4e3a   :  { %p3454_p10 = scmp.ne.s32.totalorder %s2685_s9, %s3453_s21  ;;  %p3459_p12 = scmp.lt.s32.totalorder %s3453_s21, %s3453_s21 }
0x4e3c   :  { %p3460_p13 = por %p3459_p12, %p3458_p11 }
0x4e3e   :  { %p3461_p0 = pnand %p3460_p13, %p3454_p10 }
0x4ee5   :  { %v2672_v59 = vpop.f32.mrf.mxu1 }
0x4ee6   :  { %v2673_v61 = vadd.f32 %v2835_v31, %v2672_v59 }
0x4ee7   :  { %v3208_v62 = vpop.f32.mrf.mxu1 }
0x4ee8   :  { %2677 = vst.msk [vmem:[#allocation4] sm:$0xff] %vm2676_vm4, %v2673_v61 }
0x4ee9   :  { %3464 = shalt.err (!%p3461_p0)
}
0x4eea   :  { %2687 = dma.vmem_to_hbm [thread:$0]  %s2685_s9, 128, %s4238_s8, [#allocation5]  }
0x4eeb   :  { %3473 = dma.done.wait [#allocation5], 128  }
0x4eec   :  { %3474 = vsyncadd [#allocation5], 4294967168 }
0x4eed   :  { %3475 = dma.done.wait [#allocation7], 256  }
0x4eee   :  { %3476 = vsyncadd [#allocation7], 4294967040 }
0x4eef   :  { %2717 = vsyncpa [#allocation5], 1 }
0x4ef0   :  { %2718 = vsyncpa [#allocation7], 1 }

</bundles_post_ra>
